<compile_context>
chip_gen: v7x
topology: tpu7x:2x2x1
jax: 0.10.0
libtpu: 0.0.40
codegen_flags: <defaults>
</compile_context>

<pallas_src>
import jax
import jax.numpy as jnp
from jax.experimental import pallas as pl
from jax.experimental.pallas import tpu as pltpu


# ------------------------------- Pallas kernel ------------------------------ #

def _basic_block_kernel(x_ref, w1_ref, b1_ref, w2_ref, b2_ref, w3_ref, b3_ref,
                        o_ref):
    """Fused BasicBlock forward for one image.

    x_ref : (1, H, W, Cin)    input tile (NHWC)
    w1_ref: (9, Cin, Cin)     conv1 weights, one (Cin, Cin) slab per 3x3 tap
    b1_ref: (1, Cin)
    w2_ref: (9, Cin, Cout)    conv2 weights
    b2_ref: (1, Cout)
    w3_ref: (Cin, Cout)       1x1 shortcut conv weights
    b3_ref: (1, Cout)
    o_ref : (1, Hh*Wh, Cout)  packed output (unpacked to NHWC by a free reshape)
    """
    H, W, Cin = x_ref.shape[1], x_ref.shape[2], x_ref.shape[3]
    Cout = o_ref.shape[2]
    Hh, Wh = H // 2, W // 2

    x = x_ref[0]                                        # (H, W, Cin), stays in VMEM

    def lrelu(v):
        return jnp.where(v >= 0, v, 0.2 * v)

    def conv3x3(v, w_ref, b_ref, cout):
        """Reflect-pad(1) + 3x3 conv: 9 accumulated small matmuls, f32 accumulator."""
        # reflect pad by 1 (index arithmetic on the VMEM-resident tile, no HBM pad)
        vp = jnp.concatenate([v[1:2], v, v[H - 2:H - 1]], axis=0)           # (H+2, W, Cin)
        vp = jnp.concatenate([vp[:, 1:2], vp, vp[:, W - 2:W - 1]], axis=1)  # (H+2, W+2, Cin)
        # bias folded into accumulator init
        acc = jnp.zeros((H * W, cout), jnp.float32) + b_ref[...]
        # 9 shifted windows -> (H*W, Cin) @ (Cin, cout); never materializes im2col
        for k in range(9):
            dy, dx = k // 3, k % 3
            win = vp[dy:dy + H, dx:dx + W, :].reshape(H * W, Cin)
            acc = acc + jnp.dot(win, w_ref[k], preferred_element_type=jnp.float32)
        return acc                                                          # (H*W, cout)

    def pool2x2(v):
        """2x2 / stride-2 average pool via reshape + tiny reductions (no pool matrix)."""
        Hv, Wv, C = v.shape
        Hp, Wp = Hv // 2, Wv // 2
        vh = v.reshape(Hp, 2, Wv, C)            # free split of the leading dim
        vh = vh[:, 0] + vh[:, 1]                # pool along H -> (Hp, Wv, C)
        vw = vh.reshape(Hp, Wp, 2, C)
        return 0.25 * jnp.sum(vw, axis=2)       # pool along W -> (Hp, Wp, C)

    # main branch: lrelu -> conv1 (Cin->Cin) -> lrelu -> conv2 (Cin->Cout) -> pool
    y = conv3x3(lrelu(x), w1_ref, b1_ref, Cin).reshape(H, W, Cin)
    y2 = conv3x3(lrelu(y), w2_ref, b2_ref, Cout).reshape(H, W, Cout)
    pooled = pool2x2(y2).reshape(Hh * Wh, Cout)                             # (Hh*Wh, Cout)

    # shortcut: avg-pool(x) -> 1x1 conv
    xs = pool2x2(x).reshape(Hh * Wh, Cin)                                   # (Hh*Wh, Cin)
    sc = jnp.dot(xs, w3_ref[...], preferred_element_type=jnp.float32) + b3_ref[...]

    # NOTE: Cout=8 < 128 lanes -> masked stores; at production channel counts the
    # last dim is lane-dense and this store becomes unmasked for free.
    o_ref[0] = (pooled + sc).astype(o_ref.dtype)


# ------------------------------ host-side wrapper ---------------------------- #

def basic_block_forward_nhwc(x_nhwc, params):
    """BasicBlock forward, NHWC in / NHWC out (no layout transposes)."""
    N, H, W, Cin = x_nhwc.shape
    Cout = params["w2"].shape[-1]
    Hh, Wh = H // 2, W // 2

    w1 = params["w1"].reshape(9, Cin, Cin)      # (dy*3+dx, cin, cout) tap-major
    w2 = params["w2"].reshape(9, Cin, Cout)

    out2d = pl.pallas_call(
        _basic_block_kernel,
        out_shape=jax.ShapeDtypeStruct((N, Hh * Wh, Cout), jnp.float32),
        grid=(N,),
        in_specs=[
            pl.BlockSpec((1, H, W, Cin), lambda n: (n, 0, 0, 0)),
            pl.BlockSpec((9, Cin, Cin), lambda n: (0, 0, 0)),
            pl.BlockSpec((1, Cin), lambda n: (0, 0)),
            pl.BlockSpec((9, Cin, Cout), lambda n: (0, 0, 0)),
            pl.BlockSpec((1, Cout), lambda n: (0, 0)),
            pl.BlockSpec((Cin, Cout), lambda n: (0, 0)),
            pl.BlockSpec((1, Cout), lambda n: (0, 0)),
        ],
        out_specs=pl.BlockSpec((1, Hh * Wh, Cout), lambda n: (n, 0, 0)),
        compiler_params=pltpu.CompilerParams(
            dimension_semantics=("parallel",),        # batch shards across TCs (v7x)
            vmem_limit_bytes=32 * 1024 * 1024,        # explicit scoped-VMEM budget
        ),
    )(x_nhwc, w1, params["b1"], w2, params["b2"], params["w3"], params["b3"])

    return out2d.reshape(N, Hh, Wh, Cout)             # free unpack


@jax.jit
def basic_block_forward(x_nchw, params):
    """NCHW compatibility wrapper matching the PyTorch module's layout.

    In a real NHWC-end-to-end model, call basic_block_forward_nhwc directly and
    these two transposes (full-tensor HBM round trips) disappear.
    """
    x = jnp.transpose(x_nchw, (0, 2, 3, 1))            # NCHW -> NHWC
    out = basic_block_forward_nhwc(x, params)
    return jnp.transpose(out, (0, 3, 1, 2))            # NHWC -> NCHW


# ------------------------------ params / reference -------------------------- #

def init_params(key, cin, cout):
    k1, k2, k3, k4, k5, k6 = jax.random.split(key, 6)
    s = 0.1
    return dict(
        w1=s * jax.random.normal(k1, (3, 3, cin, cin), jnp.float32),
        b1=s * jax.random.normal(k2, (1, cin), jnp.float32),
        w2=s * jax.random.normal(k3, (3, 3, cin, cout), jnp.float32),
        b2=s * jax.random.normal(k4, (1, cout), jnp.float32),
        w3=s * jax.random.normal(k5, (cin, cout), jnp.float32),
        b3=s * jax.random.normal(k6, (1, cout), jnp.float32),
    )


def _reference_forward(x_nchw, params):
    """Pure-JAX reference mirroring the PyTorch module semantics."""
    x = jnp.transpose(x_nchw, (0, 2, 3, 1))

    def lrelu(v):
        return jnp.where(v >= 0, v, 0.2 * v)

    def conv3x3(v, w, b):
        vp = jnp.pad(v, ((0, 0), (1, 1), (1, 1), (0, 0)), mode="reflect")
        out = jax.lax.conv_general_dilated(
            vp, w, (1, 1), "VALID", dimension_numbers=("NHWC", "HWIO", "NHWC"))
        return out + b

    def pool(v):
        N, H, W, C = v.shape
        return v.reshape(N, H // 2, 2, W // 2, 2, C).mean(axis=(2, 4))

    y = lrelu(x)
    y = conv3x3(y, params["w1"], params["b1"])
    y = lrelu(y)
    y = conv3x3(y, params["w2"], params["b2"])
    out = pool(y)
    sc = pool(x)
    sc = jnp.einsum("nhwc,co->nhwo", sc, params["w3"]) + params["b3"]
    return jnp.transpose(out + sc, (0, 3, 1, 2))


# ----------------------------------- main ----------------------------------- #

if __name__ == "__main__":
    N, Cin, Cout, H, W = 2, 4, 8, 16, 16
    key = jax.random.PRNGKey(0)
    kx, kp = jax.random.split(key)
    x = jax.random.normal(kx, (N, Cin, H, W), jnp.float32)
    params = init_params(kp, Cin, Cout)

    out = basic_block_forward(x, params)
    out = jax.block_until_ready(out)

    ref = _reference_forward(x, params)
    assert out.shape == (N, Cout, H // 2, W // 2), out.shape
    assert jnp.allclose(out, ref, atol=1e-4, rtol=1e-4), \
        float(jnp.max(jnp.abs(out - ref)))

    print("KERNEL_OK")
</pallas_src>

<mosaic_0001>
module attributes {stable_mosaic.version = 11 : i64} {
  func.func @_basic_block_kernel(%arg0: i32, %arg1: memref<1x16x16x4xf32, #tpu.memory_space<vmem>>, %arg2: memref<9x4x4xf32, #tpu.memory_space<vmem>>, %arg3: memref<1x4xf32, #tpu.memory_space<vmem>>, %arg4: memref<9x4x8xf32, #tpu.memory_space<vmem>>, %arg5: memref<1x8xf32, #tpu.memory_space<vmem>>, %arg6: memref<4x8xf32, #tpu.memory_space<vmem>>, %arg7: memref<1x8xf32, #tpu.memory_space<vmem>>, %arg8: memref<1x64x8xf32, #tpu.memory_space<vmem>>) attributes {dimension_semantics = [#tpu.dimension_semantics<parallel>], iteration_bounds = array<i64: 2>, scalar_prefetch = 0 : i64, scratch_operands = 0 : i64, tpu.core_type = #tpu.core_type<tc>, window_params = [{transform_indices = @transform_0, window_bounds = array<i64: 1, 16, 16, 4>}, {pipeline_mode = #tpu.pipeline_mode<synchronous>, transform_indices = @transform_1, window_bounds = array<i64: 9, 4, 4>}, {pipeline_mode = #tpu.pipeline_mode<synchronous>, transform_indices = @transform_2, window_bounds = array<i64: 1, 4>}, {pipeline_mode = #tpu.pipeline_mode<synchronous>, transform_indices = @transform_3, window_bounds = array<i64: 9, 4, 8>}, {pipeline_mode = #tpu.pipeline_mode<synchronous>, transform_indices = @transform_4, window_bounds = array<i64: 1, 8>}, {pipeline_mode = #tpu.pipeline_mode<synchronous>, transform_indices = @transform_5, window_bounds = array<i64: 4, 8>}, {pipeline_mode = #tpu.pipeline_mode<synchronous>, transform_indices = @transform_6, window_bounds = array<i64: 1, 8>}, {transform_indices = @transform_7, window_bounds = array<i64: 1, 64, 8>}]} {
    %c0 = arith.constant 0 : index
    %c0_0 = arith.constant 0 : index
    %c0_1 = arith.constant 0 : index
    %c0_2 = arith.constant 0 : index
    %0 = vector.load %arg1[%c0, %c0_0, %c0_1, %c0_2] : memref<1x16x16x4xf32, #tpu.memory_space<vmem>>, vector<1x16x16x4xf32>
    %1 = vector.shape_cast %0 : vector<1x16x16x4xf32> to vector<16x16x4xf32>
    %cst = arith.constant 0.000000e+00 : f32
    %2 = vector.broadcast %cst : f32 to vector<16x16x4xf32>
    %3 = arith.cmpf oge, %1, %2 : vector<16x16x4xf32>
    %cst_3 = arith.constant 2.000000e-01 : f32
    %4 = vector.broadcast %cst_3 : f32 to vector<16x16x4xf32>
    %5 = arith.mulf %4, %1 : vector<16x16x4xf32>
    %6 = arith.select %3, %1, %5 : vector<16x16x4xi1>, vector<16x16x4xf32>
    %7 = vector.extract_strided_slice %6 {offsets = [1, 0, 0], sizes = [1, 16, 4], strides = [1, 1, 1]} : vector<16x16x4xf32> to vector<1x16x4xf32>
    %8 = vector.extract_strided_slice %6 {offsets = [14, 0, 0], sizes = [1, 16, 4], strides = [1, 1, 1]} : vector<16x16x4xf32> to vector<1x16x4xf32>
    %9 = tpu.concatenate %7, %6, %8 in 0 : vector<1x16x4xf32>, vector<16x16x4xf32>, vector<1x16x4xf32> -> vector<18x16x4xf32>
    %10 = vector.extract_strided_slice %9 {offsets = [0, 1, 0], sizes = [18, 1, 4], strides = [1, 1, 1]} : vector<18x16x4xf32> to vector<18x1x4xf32>
    %11 = vector.extract_strided_slice %9 {offsets = [0, 14, 0], sizes = [18, 1, 4], strides = [1, 1, 1]} : vector<18x16x4xf32> to vector<18x1x4xf32>
    %12 = tpu.concatenate %10, %9, %11 in 1 : vector<18x1x4xf32>, vector<18x16x4xf32>, vector<18x1x4xf32> -> vector<18x18x4xf32>
    %cst_4 = arith.constant 0.000000e+00 : f32
    %13 = vector.broadcast %cst_4 : f32 to vector<256x4xf32>
    %c0_5 = arith.constant 0 : index
    %c0_6 = arith.constant 0 : index
    %14 = vector.load %arg3[%c0_5, %c0_6] : memref<1x4xf32, #tpu.memory_space<vmem>>, vector<1x4xf32>
    %15 = vector.broadcast %14 : vector<1x4xf32> to vector<256x4xf32>
    %16 = arith.addf %13, %15 : vector<256x4xf32>
    %17 = vector.extract_strided_slice %12 {offsets = [0, 0, 0], sizes = [16, 16, 4], strides = [1, 1, 1]} : vector<18x18x4xf32> to vector<16x16x4xf32>
    %18 = vector.shape_cast %17 : vector<16x16x4xf32> to vector<256x4xf32>
    %c0_7 = arith.constant 0 : index
    %c0_8 = arith.constant 0 : index
    %c0_9 = arith.constant 0 : index
    %19 = vector.load %arg2[%c0_7, %c0_8, %c0_9] : memref<9x4x4xf32, #tpu.memory_space<vmem>>, vector<1x4x4xf32>
    %20 = vector.shape_cast %19 : vector<1x4x4xf32> to vector<4x4xf32>
    %cst_10 = arith.constant dense<0.000000e+00> : vector<256x4xf32>
    %21 = tpu.matmul %18, %20, %cst_10 {dimension_numbers = #tpu.dot_dimension_numbers<[1], [0], [0], [1], [0, 0, 1, 1], [], []>} : vector<256x4xf32>, vector<4x4xf32>, vector<256x4xf32> -> vector<256x4xf32>
    %22 = arith.addf %16, %21 : vector<256x4xf32>
    %23 = vector.extract_strided_slice %12 {offsets = [0, 1, 0], sizes = [16, 16, 4], strides = [1, 1, 1]} : vector<18x18x4xf32> to vector<16x16x4xf32>
    %24 = vector.shape_cast %23 : vector<16x16x4xf32> to vector<256x4xf32>
    %c1 = arith.constant 1 : index
    %c0_11 = arith.constant 0 : index
    %c0_12 = arith.constant 0 : index
    %25 = vector.load %arg2[%c1, %c0_11, %c0_12] : memref<9x4x4xf32, #tpu.memory_space<vmem>>, vector<1x4x4xf32>
    %26 = vector.shape_cast %25 : vector<1x4x4xf32> to vector<4x4xf32>
    %cst_13 = arith.constant dense<0.000000e+00> : vector<256x4xf32>
    %27 = tpu.matmul %24, %26, %cst_13 {dimension_numbers = #tpu.dot_dimension_numbers<[1], [0], [0], [1], [0, 0, 1, 1], [], []>} : vector<256x4xf32>, vector<4x4xf32>, vector<256x4xf32> -> vector<256x4xf32>
    %28 = arith.addf %22, %27 : vector<256x4xf32>
    %29 = vector.extract_strided_slice %12 {offsets = [0, 2, 0], sizes = [16, 16, 4], strides = [1, 1, 1]} : vector<18x18x4xf32> to vector<16x16x4xf32>
    %30 = vector.shape_cast %29 : vector<16x16x4xf32> to vector<256x4xf32>
    %c2 = arith.constant 2 : index
    %c0_14 = arith.constant 0 : index
    %c0_15 = arith.constant 0 : index
    %31 = vector.load %arg2[%c2, %c0_14, %c0_15] : memref<9x4x4xf32, #tpu.memory_space<vmem>>, vector<1x4x4xf32>
    %32 = vector.shape_cast %31 : vector<1x4x4xf32> to vector<4x4xf32>
    %cst_16 = arith.constant dense<0.000000e+00> : vector<256x4xf32>
    %33 = tpu.matmul %30, %32, %cst_16 {dimension_numbers = #tpu.dot_dimension_numbers<[1], [0], [0], [1], [0, 0, 1, 1], [], []>} : vector<256x4xf32>, vector<4x4xf32>, vector<256x4xf32> -> vector<256x4xf32>
    %34 = arith.addf %28, %33 : vector<256x4xf32>
    %35 = vector.extract_strided_slice %12 {offsets = [1, 0, 0], sizes = [16, 16, 4], strides = [1, 1, 1]} : vector<18x18x4xf32> to vector<16x16x4xf32>
    %36 = vector.shape_cast %35 : vector<16x16x4xf32> to vector<256x4xf32>
    %c3 = arith.constant 3 : index
    %c0_17 = arith.constant 0 : index
    %c0_18 = arith.constant 0 : index
    %37 = vector.load %arg2[%c3, %c0_17, %c0_18] : memref<9x4x4xf32, #tpu.memory_space<vmem>>, vector<1x4x4xf32>
    %38 = vector.shape_cast %37 : vector<1x4x4xf32> to vector<4x4xf32>
    %cst_19 = arith.constant dense<0.000000e+00> : vector<256x4xf32>
    %39 = tpu.matmul %36, %38, %cst_19 {dimension_numbers = #tpu.dot_dimension_numbers<[1], [0], [0], [1], [0, 0, 1, 1], [], []>} : vector<256x4xf32>, vector<4x4xf32>, vector<256x4xf32> -> vector<256x4xf32>
    %40 = arith.addf %34, %39 : vector<256x4xf32>
    %41 = vector.extract_strided_slice %12 {offsets = [1, 1, 0], sizes = [16, 16, 4], strides = [1, 1, 1]} : vector<18x18x4xf32> to vector<16x16x4xf32>
    %42 = vector.shape_cast %41 : vector<16x16x4xf32> to vector<256x4xf32>
    %c4 = arith.constant 4 : index
    %c0_20 = arith.constant 0 : index
    %c0_21 = arith.constant 0 : index
    %43 = vector.load %arg2[%c4, %c0_20, %c0_21] : memref<9x4x4xf32, #tpu.memory_space<vmem>>, vector<1x4x4xf32>
    %44 = vector.shape_cast %43 : vector<1x4x4xf32> to vector<4x4xf32>
    %cst_22 = arith.constant dense<0.000000e+00> : vector<256x4xf32>
    %45 = tpu.matmul %42, %44, %cst_22 {dimension_numbers = #tpu.dot_dimension_numbers<[1], [0], [0], [1], [0, 0, 1, 1], [], []>} : vector<256x4xf32>, vector<4x4xf32>, vector<256x4xf32> -> vector<256x4xf32>
    %46 = arith.addf %40, %45 : vector<256x4xf32>
    %47 = vector.extract_strided_slice %12 {offsets = [1, 2, 0], sizes = [16, 16, 4], strides = [1, 1, 1]} : vector<18x18x4xf32> to vector<16x16x4xf32>
    %48 = vector.shape_cast %47 : vector<16x16x4xf32> to vector<256x4xf32>
    %c5 = arith.constant 5 : index
    %c0_23 = arith.constant 0 : index
    %c0_24 = arith.constant 0 : index
    %49 = vector.load %arg2[%c5, %c0_23, %c0_24] : memref<9x4x4xf32, #tpu.memory_space<vmem>>, vector<1x4x4xf32>
    %50 = vector.shape_cast %49 : vector<1x4x4xf32> to vector<4x4xf32>
    %cst_25 = arith.constant dense<0.000000e+00> : vector<256x4xf32>
    %51 = tpu.matmul %48, %50, %cst_25 {dimension_numbers = #tpu.dot_dimension_numbers<[1], [0], [0], [1], [0, 0, 1, 1], [], []>} : vector<256x4xf32>, vector<4x4xf32>, vector<256x4xf32> -> vector<256x4xf32>
    %52 = arith.addf %46, %51 : vector<256x4xf32>
    %53 = vector.extract_strided_slice %12 {offsets = [2, 0, 0], sizes = [16, 16, 4], strides = [1, 1, 1]} : vector<18x18x4xf32> to vector<16x16x4xf32>
    %54 = vector.shape_cast %53 : vector<16x16x4xf32> to vector<256x4xf32>
    %c6 = arith.constant 6 : index
    %c0_26 = arith.constant 0 : index
    %c0_27 = arith.constant 0 : index
    %55 = vector.load %arg2[%c6, %c0_26, %c0_27] : memref<9x4x4xf32, #tpu.memory_space<vmem>>, vector<1x4x4xf32>
    %56 = vector.shape_cast %55 : vector<1x4x4xf32> to vector<4x4xf32>
    %cst_28 = arith.constant dense<0.000000e+00> : vector<256x4xf32>
    %57 = tpu.matmul %54, %56, %cst_28 {dimension_numbers = #tpu.dot_dimension_numbers<[1], [0], [0], [1], [0, 0, 1, 1], [], []>} : vector<256x4xf32>, vector<4x4xf32>, vector<256x4xf32> -> vector<256x4xf32>
    %58 = arith.addf %52, %57 : vector<256x4xf32>
    %59 = vector.extract_strided_slice %12 {offsets = [2, 1, 0], sizes = [16, 16, 4], strides = [1, 1, 1]} : vector<18x18x4xf32> to vector<16x16x4xf32>
    %60 = vector.shape_cast %59 : vector<16x16x4xf32> to vector<256x4xf32>
    %c7 = arith.constant 7 : index
    %c0_29 = arith.constant 0 : index
    %c0_30 = arith.constant 0 : index
    %61 = vector.load %arg2[%c7, %c0_29, %c0_30] : memref<9x4x4xf32, #tpu.memory_space<vmem>>, vector<1x4x4xf32>
    %62 = vector.shape_cast %61 : vector<1x4x4xf32> to vector<4x4xf32>
    %cst_31 = arith.constant dense<0.000000e+00> : vector<256x4xf32>
    %63 = tpu.matmul %60, %62, %cst_31 {dimension_numbers = #tpu.dot_dimension_numbers<[1], [0], [0], [1], [0, 0, 1, 1], [], []>} : vector<256x4xf32>, vector<4x4xf32>, vector<256x4xf32> -> vector<256x4xf32>
    %64 = arith.addf %58, %63 : vector<256x4xf32>
    %65 = vector.extract_strided_slice %12 {offsets = [2, 2, 0], sizes = [16, 16, 4], strides = [1, 1, 1]} : vector<18x18x4xf32> to vector<16x16x4xf32>
    %66 = vector.shape_cast %65 : vector<16x16x4xf32> to vector<256x4xf32>
    %c8 = arith.constant 8 : index
    %c0_32 = arith.constant 0 : index
    %c0_33 = arith.constant 0 : index
    %67 = vector.load %arg2[%c8, %c0_32, %c0_33] : memref<9x4x4xf32, #tpu.memory_space<vmem>>, vector<1x4x4xf32>
    %68 = vector.shape_cast %67 : vector<1x4x4xf32> to vector<4x4xf32>
    %cst_34 = arith.constant dense<0.000000e+00> : vector<256x4xf32>
    %69 = tpu.matmul %66, %68, %cst_34 {dimension_numbers = #tpu.dot_dimension_numbers<[1], [0], [0], [1], [0, 0, 1, 1], [], []>} : vector<256x4xf32>, vector<4x4xf32>, vector<256x4xf32> -> vector<256x4xf32>
    %70 = arith.addf %64, %69 : vector<256x4xf32>
    %71 = vector.shape_cast %70 : vector<256x4xf32> to vector<16x16x4xf32>
    %cst_35 = arith.constant 0.000000e+00 : f32
    %72 = vector.broadcast %cst_35 : f32 to vector<16x16x4xf32>
    %73 = arith.cmpf oge, %71, %72 : vector<16x16x4xf32>
    %cst_36 = arith.constant 2.000000e-01 : f32
    %74 = vector.broadcast %cst_36 : f32 to vector<16x16x4xf32>
    %75 = arith.mulf %74, %71 : vector<16x16x4xf32>
    %76 = arith.select %73, %71, %75 : vector<16x16x4xi1>, vector<16x16x4xf32>
    %77 = vector.extract_strided_slice %76 {offsets = [1, 0, 0], sizes = [1, 16, 4], strides = [1, 1, 1]} : vector<16x16x4xf32> to vector<1x16x4xf32>
    %78 = vector.extract_strided_slice %76 {offsets = [14, 0, 0], sizes = [1, 16, 4], strides = [1, 1, 1]} : vector<16x16x4xf32> to vector<1x16x4xf32>
    %79 = tpu.concatenate %77, %76, %78 in 0 : vector<1x16x4xf32>, vector<16x16x4xf32>, vector<1x16x4xf32> -> vector<18x16x4xf32>
    %80 = vector.extract_strided_slice %79 {offsets = [0, 1, 0], sizes = [18, 1, 4], strides = [1, 1, 1]} : vector<18x16x4xf32> to vector<18x1x4xf32>
    %81 = vector.extract_strided_slice %79 {offsets = [0, 14, 0], sizes = [18, 1, 4], strides = [1, 1, 1]} : vector<18x16x4xf32> to vector<18x1x4xf32>
    %82 = tpu.concatenate %80, %79, %81 in 1 : vector<18x1x4xf32>, vector<18x16x4xf32>, vector<18x1x4xf32> -> vector<18x18x4xf32>
    %cst_37 = arith.constant 0.000000e+00 : f32
    %83 = vector.broadcast %cst_37 : f32 to vector<256x8xf32>
    %c0_38 = arith.constant 0 : index
    %c0_39 = arith.constant 0 : index
    %84 = vector.load %arg5[%c0_38, %c0_39] : memref<1x8xf32, #tpu.memory_space<vmem>>, vector<1x8xf32>
    %85 = vector.broadcast %84 : vector<1x8xf32> to vector<256x8xf32>
    %86 = arith.addf %83, %85 : vector<256x8xf32>
    %87 = vector.extract_strided_slice %82 {offsets = [0, 0, 0], sizes = [16, 16, 4], strides = [1, 1, 1]} : vector<18x18x4xf32> to vector<16x16x4xf32>
    %88 = vector.shape_cast %87 : vector<16x16x4xf32> to vector<256x4xf32>
    %c0_40 = arith.constant 0 : index
    %c0_41 = arith.constant 0 : index
    %c0_42 = arith.constant 0 : index
    %89 = vector.load %arg4[%c0_40, %c0_41, %c0_42] : memref<9x4x8xf32, #tpu.memory_space<vmem>>, vector<1x4x8xf32>
    %90 = vector.shape_cast %89 : vector<1x4x8xf32> to vector<4x8xf32>
    %cst_43 = arith.constant dense<0.000000e+00> : vector<256x8xf32>
    %91 = tpu.matmul %88, %90, %cst_43 {dimension_numbers = #tpu.dot_dimension_numbers<[1], [0], [0], [1], [0, 0, 1, 1], [], []>} : vector<256x4xf32>, vector<4x8xf32>, vector<256x8xf32> -> vector<256x8xf32>
    %92 = arith.addf %86, %91 : vector<256x8xf32>
    %93 = vector.extract_strided_slice %82 {offsets = [0, 1, 0], sizes = [16, 16, 4], strides = [1, 1, 1]} : vector<18x18x4xf32> to vector<16x16x4xf32>
    %94 = vector.shape_cast %93 : vector<16x16x4xf32> to vector<256x4xf32>
    %c1_44 = arith.constant 1 : index
    %c0_45 = arith.constant 0 : index
    %c0_46 = arith.constant 0 : index
    %95 = vector.load %arg4[%c1_44, %c0_45, %c0_46] : memref<9x4x8xf32, #tpu.memory_space<vmem>>, vector<1x4x8xf32>
    %96 = vector.shape_cast %95 : vector<1x4x8xf32> to vector<4x8xf32>
    %cst_47 = arith.constant dense<0.000000e+00> : vector<256x8xf32>
    %97 = tpu.matmul %94, %96, %cst_47 {dimension_numbers = #tpu.dot_dimension_numbers<[1], [0], [0], [1], [0, 0, 1, 1], [], []>} : vector<256x4xf32>, vector<4x8xf32>, vector<256x8xf32> -> vector<256x8xf32>
    %98 = arith.addf %92, %97 : vector<256x8xf32>
    %99 = vector.extract_strided_slice %82 {offsets = [0, 2, 0], sizes = [16, 16, 4], strides = [1, 1, 1]} : vector<18x18x4xf32> to vector<16x16x4xf32>
    %100 = vector.shape_cast %99 : vector<16x16x4xf32> to vector<256x4xf32>
    %c2_48 = arith.constant 2 : index
    %c0_49 = arith.constant 0 : index
    %c0_50 = arith.constant 0 : index
    %101 = vector.load %arg4[%c2_48, %c0_49, %c0_50] : memref<9x4x8xf32, #tpu.memory_space<vmem>>, vector<1x4x8xf32>
    %102 = vector.shape_cast %101 : vector<1x4x8xf32> to vector<4x8xf32>
    %cst_51 = arith.constant dense<0.000000e+00> : vector<256x8xf32>
    %103 = tpu.matmul %100, %102, %cst_51 {dimension_numbers = #tpu.dot_dimension_numbers<[1], [0], [0], [1], [0, 0, 1, 1], [], []>} : vector<256x4xf32>, vector<4x8xf32>, vector<256x8xf32> -> vector<256x8xf32>
    %104 = arith.addf %98, %103 : vector<256x8xf32>
    %105 = vector.extract_strided_slice %82 {offsets = [1, 0, 0], sizes = [16, 16, 4], strides = [1, 1, 1]} : vector<18x18x4xf32> to vector<16x16x4xf32>
    %106 = vector.shape_cast %105 : vector<16x16x4xf32> to vector<256x4xf32>
    %c3_52 = arith.constant 3 : index
    %c0_53 = arith.constant 0 : index
    %c0_54 = arith.constant 0 : index
    %107 = vector.load %arg4[%c3_52, %c0_53, %c0_54] : memref<9x4x8xf32, #tpu.memory_space<vmem>>, vector<1x4x8xf32>
    %108 = vector.shape_cast %107 : vector<1x4x8xf32> to vector<4x8xf32>
    %cst_55 = arith.constant dense<0.000000e+00> : vector<256x8xf32>
    %109 = tpu.matmul %106, %108, %cst_55 {dimension_numbers = #tpu.dot_dimension_numbers<[1], [0], [0], [1], [0, 0, 1, 1], [], []>} : vector<256x4xf32>, vector<4x8xf32>, vector<256x8xf32> -> vector<256x8xf32>
    %110 = arith.addf %104, %109 : vector<256x8xf32>
    %111 = vector.extract_strided_slice %82 {offsets = [1, 1, 0], sizes = [16, 16, 4], strides = [1, 1, 1]} : vector<18x18x4xf32> to vector<16x16x4xf32>
    %112 = vector.shape_cast %111 : vector<16x16x4xf32> to vector<256x4xf32>
    %c4_56 = arith.constant 4 : index
    %c0_57 = arith.constant 0 : index
    %c0_58 = arith.constant 0 : index
    %113 = vector.load %arg4[%c4_56, %c0_57, %c0_58] : memref<9x4x8xf32, #tpu.memory_space<vmem>>, vector<1x4x8xf32>
    %114 = vector.shape_cast %113 : vector<1x4x8xf32> to vector<4x8xf32>
    %cst_59 = arith.constant dense<0.000000e+00> : vector<256x8xf32>
    %115 = tpu.matmul %112, %114, %cst_59 {dimension_numbers = #tpu.dot_dimension_numbers<[1], [0], [0], [1], [0, 0, 1, 1], [], []>} : vector<256x4xf32>, vector<4x8xf32>, vector<256x8xf32> -> vector<256x8xf32>
    %116 = arith.addf %110, %115 : vector<256x8xf32>
    %117 = vector.extract_strided_slice %82 {offsets = [1, 2, 0], sizes = [16, 16, 4], strides = [1, 1, 1]} : vector<18x18x4xf32> to vector<16x16x4xf32>
    %118 = vector.shape_cast %117 : vector<16x16x4xf32> to vector<256x4xf32>
    %c5_60 = arith.constant 5 : index
    %c0_61 = arith.constant 0 : index
    %c0_62 = arith.constant 0 : index
    %119 = vector.load %arg4[%c5_60, %c0_61, %c0_62] : memref<9x4x8xf32, #tpu.memory_space<vmem>>, vector<1x4x8xf32>
    %120 = vector.shape_cast %119 : vector<1x4x8xf32> to vector<4x8xf32>
    %cst_63 = arith.constant dense<0.000000e+00> : vector<256x8xf32>
    %121 = tpu.matmul %118, %120, %cst_63 {dimension_numbers = #tpu.dot_dimension_numbers<[1], [0], [0], [1], [0, 0, 1, 1], [], []>} : vector<256x4xf32>, vector<4x8xf32>, vector<256x8xf32> -> vector<256x8xf32>
    %122 = arith.addf %116, %121 : vector<256x8xf32>
    %123 = vector.extract_strided_slice %82 {offsets = [2, 0, 0], sizes = [16, 16, 4], strides = [1, 1, 1]} : vector<18x18x4xf32> to vector<16x16x4xf32>
    %124 = vector.shape_cast %123 : vector<16x16x4xf32> to vector<256x4xf32>
    %c6_64 = arith.constant 6 : index
    %c0_65 = arith.constant 0 : index
    %c0_66 = arith.constant 0 : index
    %125 = vector.load %arg4[%c6_64, %c0_65, %c0_66] : memref<9x4x8xf32, #tpu.memory_space<vmem>>, vector<1x4x8xf32>
    %126 = vector.shape_cast %125 : vector<1x4x8xf32> to vector<4x8xf32>
    %cst_67 = arith.constant dense<0.000000e+00> : vector<256x8xf32>
    %127 = tpu.matmul %124, %126, %cst_67 {dimension_numbers = #tpu.dot_dimension_numbers<[1], [0], [0], [1], [0, 0, 1, 1], [], []>} : vector<256x4xf32>, vector<4x8xf32>, vector<256x8xf32> -> vector<256x8xf32>
    %128 = arith.addf %122, %127 : vector<256x8xf32>
    %129 = vector.extract_strided_slice %82 {offsets = [2, 1, 0], sizes = [16, 16, 4], strides = [1, 1, 1]} : vector<18x18x4xf32> to vector<16x16x4xf32>
    %130 = vector.shape_cast %129 : vector<16x16x4xf32> to vector<256x4xf32>
    %c7_68 = arith.constant 7 : index
    %c0_69 = arith.constant 0 : index
    %c0_70 = arith.constant 0 : index
    %131 = vector.load %arg4[%c7_68, %c0_69, %c0_70] : memref<9x4x8xf32, #tpu.memory_space<vmem>>, vector<1x4x8xf32>
    %132 = vector.shape_cast %131 : vector<1x4x8xf32> to vector<4x8xf32>
    %cst_71 = arith.constant dense<0.000000e+00> : vector<256x8xf32>
    %133 = tpu.matmul %130, %132, %cst_71 {dimension_numbers = #tpu.dot_dimension_numbers<[1], [0], [0], [1], [0, 0, 1, 1], [], []>} : vector<256x4xf32>, vector<4x8xf32>, vector<256x8xf32> -> vector<256x8xf32>
    %134 = arith.addf %128, %133 : vector<256x8xf32>
    %135 = vector.extract_strided_slice %82 {offsets = [2, 2, 0], sizes = [16, 16, 4], strides = [1, 1, 1]} : vector<18x18x4xf32> to vector<16x16x4xf32>
    %136 = vector.shape_cast %135 : vector<16x16x4xf32> to vector<256x4xf32>
    %c8_72 = arith.constant 8 : index
    %c0_73 = arith.constant 0 : index
    %c0_74 = arith.constant 0 : index
    %137 = vector.load %arg4[%c8_72, %c0_73, %c0_74] : memref<9x4x8xf32, #tpu.memory_space<vmem>>, vector<1x4x8xf32>
    %138 = vector.shape_cast %137 : vector<1x4x8xf32> to vector<4x8xf32>
    %cst_75 = arith.constant dense<0.000000e+00> : vector<256x8xf32>
    %139 = tpu.matmul %136, %138, %cst_75 {dimension_numbers = #tpu.dot_dimension_numbers<[1], [0], [0], [1], [0, 0, 1, 1], [], []>} : vector<256x4xf32>, vector<4x8xf32>, vector<256x8xf32> -> vector<256x8xf32>
    %140 = arith.addf %134, %139 : vector<256x8xf32>
    %141 = vector.shape_cast %140 : vector<256x8xf32> to vector<16x16x8xf32>
    %142 = vector.shape_cast %141 : vector<16x16x8xf32> to vector<8x2x16x8xf32>
    %143 = vector.extract_strided_slice %142 {offsets = [0, 0, 0, 0], sizes = [8, 1, 16, 8], strides = [1, 1, 1, 1]} : vector<8x2x16x8xf32> to vector<8x1x16x8xf32>
    %144 = vector.shape_cast %143 : vector<8x1x16x8xf32> to vector<8x16x8xf32>
    %145 = vector.extract_strided_slice %142 {offsets = [0, 1, 0, 0], sizes = [8, 1, 16, 8], strides = [1, 1, 1, 1]} : vector<8x2x16x8xf32> to vector<8x1x16x8xf32>
    %146 = vector.shape_cast %145 : vector<8x1x16x8xf32> to vector<8x16x8xf32>
    %147 = arith.addf %144, %146 : vector<8x16x8xf32>
    %148 = vector.shape_cast %147 : vector<8x16x8xf32> to vector<8x8x2x8xf32>
    %cst_76 = arith.constant dense<0.000000e+00> : vector<8x8x8xf32>
    %149 = vector.multi_reduction <add>, %148, %cst_76 [2] : vector<8x8x2x8xf32> to vector<8x8x8xf32>
    %cst_77 = arith.constant 2.500000e-01 : f32
    %150 = vector.broadcast %cst_77 : f32 to vector<8x8x8xf32>
    %151 = arith.mulf %150, %149 : vector<8x8x8xf32>
    %152 = vector.shape_cast %151 : vector<8x8x8xf32> to vector<64x8xf32>
    %153 = vector.shape_cast %1 : vector<16x16x4xf32> to vector<8x2x16x4xf32>
    %154 = vector.extract_strided_slice %153 {offsets = [0, 0, 0, 0], sizes = [8, 1, 16, 4], strides = [1, 1, 1, 1]} : vector<8x2x16x4xf32> to vector<8x1x16x4xf32>
    %155 = vector.shape_cast %154 : vector<8x1x16x4xf32> to vector<8x16x4xf32>
    %156 = vector.extract_strided_slice %153 {offsets = [0, 1, 0, 0], sizes = [8, 1, 16, 4], strides = [1, 1, 1, 1]} : vector<8x2x16x4xf32> to vector<8x1x16x4xf32>
    %157 = vector.shape_cast %156 : vector<8x1x16x4xf32> to vector<8x16x4xf32>
    %158 = arith.addf %155, %157 : vector<8x16x4xf32>
    %159 = vector.shape_cast %158 : vector<8x16x4xf32> to vector<8x8x2x4xf32>
    %cst_78 = arith.constant dense<0.000000e+00> : vector<8x8x4xf32>
    %160 = vector.multi_reduction <add>, %159, %cst_78 [2] : vector<8x8x2x4xf32> to vector<8x8x4xf32>
    %cst_79 = arith.constant 2.500000e-01 : f32
    %161 = vector.broadcast %cst_79 : f32 to vector<8x8x4xf32>
    %162 = arith.mulf %161, %160 : vector<8x8x4xf32>
    %163 = vector.shape_cast %162 : vector<8x8x4xf32> to vector<64x4xf32>
    %c0_80 = arith.constant 0 : index
    %c0_81 = arith.constant 0 : index
    %164 = vector.load %arg6[%c0_80, %c0_81] : memref<4x8xf32, #tpu.memory_space<vmem>>, vector<4x8xf32>
    %cst_82 = arith.constant dense<0.000000e+00> : vector<64x8xf32>
    %165 = tpu.matmul %163, %164, %cst_82 {dimension_numbers = #tpu.dot_dimension_numbers<[1], [0], [0], [1], [0, 0, 1, 1], [], []>} : vector<64x4xf32>, vector<4x8xf32>, vector<64x8xf32> -> vector<64x8xf32>
    %c0_83 = arith.constant 0 : index
    %c0_84 = arith.constant 0 : index
    %166 = vector.load %arg7[%c0_83, %c0_84] : memref<1x8xf32, #tpu.memory_space<vmem>>, vector<1x8xf32>
    %167 = vector.broadcast %166 : vector<1x8xf32> to vector<64x8xf32>
    %168 = arith.addf %165, %167 : vector<64x8xf32>
    %169 = arith.addf %152, %168 : vector<64x8xf32>
    %c0_85 = arith.constant 0 : index
    %c0_86 = arith.constant 0 : index
    %c0_87 = arith.constant 0 : index
    %170 = vector.load %arg8[%c0_85, %c0_86, %c0_87] : memref<1x64x8xf32, #tpu.memory_space<vmem>>, vector<1x64x8xf32>
    %171 = vector.shape_cast %170 : vector<1x64x8xf32> to vector<64x8xf32>
    %172 = vector.shape_cast %169 : vector<64x8xf32> to vector<1x64x8xf32>
    tpu.vector_store %arg8[%c0_85, %c0_86, %c0_87], %172 {strides = array<i32>} : memref<1x64x8xf32, #tpu.memory_space<vmem>>, vector<1x64x8xf32>,
    return
  }
  func.func @transform_0(%arg0: i32) -> (i32, i32, i32, i32) {
    %c0_i32 = arith.constant 0 : i32
    %c0_i32_0 = arith.constant 0 : i32
    %c0_i32_1 = arith.constant 0 : i32
    %c0_i32_2 = arith.constant 0 : i32
    return %arg0, %c0_i32, %c0_i32_0, %c0_i32_1 : i32, i32, i32, i32
  }
  func.func @transform_1(%arg0: i32) -> (i32, i32, i32) {
    %c0_i32 = arith.constant 0 : i32
    %c0_i32_0 = arith.constant 0 : i32
    %c0_i32_1 = arith.constant 0 : i32
    %c0_i32_2 = arith.constant 0 : i32
    return %c0_i32, %c0_i32_0, %c0_i32_1 : i32, i32, i32
  }
  func.func @transform_2(%arg0: i32) -> (i32, i32) {
    %c0_i32 = arith.constant 0 : i32
    %c0_i32_0 = arith.constant 0 : i32
    %c0_i32_1 = arith.constant 0 : i32
    return %c0_i32, %c0_i32_0 : i32, i32
  }
  func.func @transform_3(%arg0: i32) -> (i32, i32, i32) {
    %c0_i32 = arith.constant 0 : i32
    %c0_i32_0 = arith.constant 0 : i32
    %c0_i32_1 = arith.constant 0 : i32
    %c0_i32_2 = arith.constant 0 : i32
    return %c0_i32, %c0_i32_0, %c0_i32_1 : i32, i32, i32
  }
  func.func @transform_4(%arg0: i32) -> (i32, i32) {
    %c0_i32 = arith.constant 0 : i32
    %c0_i32_0 = arith.constant 0 : i32
    %c0_i32_1 = arith.constant 0 : i32
    return %c0_i32, %c0_i32_0 : i32, i32
  }
  func.func @transform_5(%arg0: i32) -> (i32, i32) {
    %c0_i32 = arith.constant 0 : i32
    %c0_i32_0 = arith.constant 0 : i32
    %c0_i32_1 = arith.constant 0 : i32
    return %c0_i32, %c0_i32_0 : i32, i32
  }
  func.func @transform_6(%arg0: i32) -> (i32, i32) {
    %c0_i32 = arith.constant 0 : i32
    %c0_i32_0 = arith.constant 0 : i32
    %c0_i32_1 = arith.constant 0 : i32
    return %c0_i32, %c0_i32_0 : i32, i32
  }
  func.func @transform_7(%arg0: i32) -> (i32, i32, i32) {
    %c0_i32 = arith.constant 0 : i32
    %c0_i32_0 = arith.constant 0 : i32
    %c0_i32_1 = arith.constant 0 : i32
    return %arg0, %c0_i32, %c0_i32_0 : i32, i32, i32
  }
}

</mosaic_0001>

<bundles_post_ra>
// kernel: basic_block_forward.1
= control target key start
LH: loop header
LB: loop body
LE: loop exit
PB: predicated region body
PF: predicated region fallthrough
CT: control target
= control target key end

     0   :  { %s11688_s24 = smov 0   ;;  %s15228_s0 = inlined_call_operand.vmem [shape: f32[2,16,16,4], index: 0, kind: input, shape index: {}]   ;;  %s15229_s1 = inlined_call_operand.vmem [shape: f32[9,4,4], index: 1, kind: input, shape index: {}]   ;;  %s15230_s2 = inlined_call_operand.vmem [shape: f32[1,4], index: 2, kind: input, shape index: {}]   ;;  %s15231_s3 = inlined_call_operand.vmem [shape: f32[9,4,8], index: 3, kind: input, shape index: {}]   ;;  %s15232_s4 = inlined_call_operand.vmem [shape: f32[1,8], index: 4, kind: input, shape index: {}]   ;;  %s15233_s5 = inlined_call_operand.vmem [shape: f32[4,8], index: 5, kind: input, shape index: {}]   ;;  %s15234_s6 = inlined_call_operand.vmem [shape: f32[1,8], index: 6, kind: input, shape index: {}]   ;;  %s15235_s7 = inlined_call_operand.vmem [shape: f32[2,64,8], index: 7, kind: output, shape index: {}]  }
   0x1 LB: > { %s8883_s25 = sadd.s32 4294967295, %s11645_s24   ;;  %p8887_p0 = scmp.ge.s32.totalorder %s11645_s24, 1  ;;  %s11645_s24 = sphi %s11688_s24, %s17_s24  }
   0x2   : > { %p237_p1 = scmp.lt.s32.totalorder %s11645_s24, 3 }
   0x4   : > { %p238_p2 = pnand %p8887_p0, %p237_p1 }
   0x6   : > { %241 = sbr.rel (%p238_p2) target bundleno = 1960 (0x7a8), region = 48 }
   0xd   : > { %v624_v0 = vld [vmem:[%s15229_s1] sm:$0xf]  ;;  %vm701_vm0 = vcmask 1043456   ;;  %p269_p3 = scmp.lt.s32.totalorder %s8883_s25, 1  ;;  %v8926_v1 = vld [vmem:[%s15229_s1 + $0x4] sm:$0xf] }
   0xe   : > { %10121 = vmatprep.subr.msk.mxu0 %vm701_vm0, %v624_v0  ;;  %11035 = vmatprep.subr.msk.mxu1 %vm701_vm0, %v624_v0  ;;  %vm471_vm3 = vcmask 1040384   ;;  %vm625_vm6 = vcmask 31744   ;;  %v11740_v23 = vld [vmem:[%s15229_s1 + $0x8] sm:$0xf] }
   0xf   : > { %10122 = vmatpush3.msk.msra.mxu0 %vm701_vm0, %v624_v0  ;;  %s15851_s25 = smov (!%p269_p3, %s8883_s25), 1  ;;  %11036 = vmatpush3.msk.msra.mxu1 %vm701_vm0, %v624_v0 }
  0x10   : > { %10171 = vmatprep.subr.msk.mxu0 %vm701_vm0, %v8926_v1  ;;  %s9516_s30 = sshll.u32 %s15851_s25, 8  ;;  %s9517_s9 = sshll.u32 %s15851_s25, 6 }
  0x11   : > { %s11713_s10 = scalar_lea.vmem %s15228_s0, %s9516_s30  ;;  %s14903_s11 = scalar_lea.vmem %s15235_s7, %s9517_s9 }
  0x12   : > { %v281_v2 = vld [vmem:[%s11713_s10 + $0x10] sm:$0xff]  ;;  %v282_v3 = vld [vmem:[%s11713_s10 + $0x18] sm:$0xff]  ;;  %v279_v4 = vld [vmem:[%s11713_s10] sm:$0xff] }
  0x13   : > { %vm313_vm1 = vcmp.ge.f32.partialorder %v281_v2, 0.0  ;;  %v345_v5 = vmul.f32 0.2, %v281_v2  ;;  %vm314_vm2 = vcmp.ge.f32.partialorder %v282_v3, 0.0  ;;  %v346_v6 = vmul.f32 0.2, %v282_v3 }
  0x14   : > { %vm311_vm4 = vcmp.ge.f32.partialorder %v279_v4, 0.0  ;;  %v343_v7 = vmul.f32 0.2, %v279_v4  ;;  %v11718_v8 = vadd.f32 %v281_v2, %v279_v4  ;;  %v280_v9 = vld [vmem:[%s11713_s10 + $0x8] sm:$0xff]  ;;  %v283_v26 = vld [vmem:[%s11713_s10 + $0x20] sm:$0xff]  ;;  %v285_v29 = vld [vmem:[%s11713_s10 + $0x30] sm:$0xff] }
  0x15   : > { %v377_v10 = vsel %vm313_vm1, %v281_v2, %v345_v5  ;;  %v11721_v11 = vsel %vm314_vm2, %v282_v3, %v346_v6  ;;  %vm312_vm5 = vcmp.ge.f32.partialorder %v280_v9, 0.0  ;;  %v344_v12 = vmul.f32 0.2, %v280_v9  ;;  %v284_v28 = vld [vmem:[%s11713_s10 + $0x28] sm:$0xff]  ;;  %v286_v30 = vld [vmem:[%s11713_s10 + $0x38] sm:$0xff]  ;;  %v287_v49 = vld [vmem:[%s11713_s10 + $0x40] sm:$0xff] }
  0x16   : > { %15470 = vst [vmem:[#allocation2_spill] sm:$0xff] %v11718_v8  ;;  %v423_v13 = vrot.slane %v377_v10, 1  ;;  %v472_v14 = vrot.slane %v377_v10, 7  ;;  %v15247_v15 = vrot.slane %v11721_v11, 7  ;;  %v375_v16 = vsel %vm311_vm4, %v279_v4, %v343_v7  ;;  %v288_v51 = vld [vmem:[%s11713_s10 + $0x48] sm:$0xff]  ;;  %v289_v57 = vld [vmem:[%s11713_s10 + $0x50] sm:$0xff] }
  0x17   : > { %v11724_v17 = vsel %vm312_vm5, %v280_v9, %v344_v12  ;;  %v424_v20 = vrot.slane %v375_v16, 1  ;;  %v475_v21 = vrot.slane %v375_v16, 7  ;;  %v11747_v25 = vadd.f32 %v282_v3, %v280_v9  ;;  %v290_v58 = vld [vmem:[%s11713_s10 + $0x58] sm:$0xff]  ;;  %v291_v63 = vld [vmem:[%s11713_s10 + $0x60] sm:$0xff]  ;;  %v292_v9 = vld [vmem:[%s11713_s10 + $0x68] sm:$0xff] }
  0x18   : > { %v11727_v18 = vsel %vm471_vm3, %v423_v13, %v472_v14  ;;  %v11732_v19 = vsel %vm471_vm3, %v472_v14, %v15247_v15  ;;  %v15246_v22 = vrot.slane %v11724_v17, 7  ;;  %vm315_vm7 = vcmp.ge.f32.partialorder %v283_v26, 0.0  ;;  %v293_v14 = vld [vmem:[%s11713_s10 + $0x70] sm:$0xff] }
  0x19   : > { %10123 = vmatprep.mubr.msk.f32.mxu0 %vm625_vm6, %v11727_v18  ;;  %v11745_v24 = vsel %vm471_vm3, %v424_v20, %v475_v21  ;;  %15471 = vst [vmem:[#allocation3_spill] sm:$0xff] %v11747_v25  ;;  %v347_v31 = vmul.f32 0.2, %v283_v26  ;;  %vm316_vm8 = vcmp.ge.f32.partialorder %v284_v28, 0.0  ;;  %v348_v32 = vmul.f32 0.2, %v284_v28 }
  0x1a   : > { %10124 = vmatmul.mubr.msk.f32.vlgmr.msra.gmra.mrb[0].mxu0 %vm625_vm6, %v11732_v19  ;;  %v11756_v27 = vsel %vm471_vm3, %v475_v21, %v15246_v22  ;;  %vm317_vm9 = vcmp.ge.f32.partialorder %v285_v29, 0.0  ;;  %v349_v33 = vmul.f32 0.2, %v285_v29  ;;  %v11767_v34 = vadd.f32 %v285_v29, %v283_v26 }
  0x1b   : > { %10172 = vmatpush3.msk.msra.mxu0 %vm701_vm0, %v8926_v1  ;;  %10126 = vmatprep.mubr.msk.f32.mxu0 %vm625_vm6, %v11745_v24  ;;  %vm318_vm10 = vcmp.ge.f32.partialorder %v286_v30, 0.0  ;;  %v350_v35 = vmul.f32 0.2, %v286_v30  ;;  %v379_v36 = vsel %vm315_vm7, %v283_v26, %v347_v31  ;;  %v11769_v37 = vsel %vm316_vm8, %v284_v28, %v348_v32 }
  0x1c   : > { %10221 = vmatprep.subr.msk.mxu0 %vm701_vm0, %v11740_v23  ;;  %15472 = vst [vmem:[#allocation4_spill] sm:$0xff] %v11767_v34  ;;  %v11771_v38 = vadd.f32 %v286_v30, %v284_v28  ;;  %v425_v39 = vrot.slane %v379_v36, 1  ;;  %v478_v40 = vrot.slane %v379_v36, 7  ;;  %v15245_v41 = vrot.slane %v11769_v37, 7 }
  0x1d   : > { %v381_v42 = vsel %vm317_vm9, %v285_v29, %v349_v33  ;;  %v11776_v43 = vsel %vm318_vm10, %v286_v30, %v350_v35  ;;  %vm319_vm11 = vcmp.ge.f32.partialorder %v287_v49, 0.0  ;;  %v351_v53 = vmul.f32 0.2, %v287_v49  ;;  %v294_v29 = vld [vmem:[%s11713_s10 + $0x78] sm:$0xff] }
  0x1e   : > { %10127 = vmatmul.mubr.msk.f32.gmra.mrb[2].mxu0 %vm625_vm6, %v11756_v27  ;;  %15473 = vst [vmem:[#allocation5_spill] sm:$0xff] %v11771_v38  ;;  %v11779_v44 = vsel %vm471_vm3, %v425_v39, %v478_v40  ;;  %v11784_v45 = vsel %vm471_vm3, %v478_v40, %v15245_v41  ;;  %v426_v46 = vrot.slane %v381_v42, 1  ;;  %v481_v47 = vrot.slane %v381_v42, 7  ;;  %v12082_v38 = vld [vmem:[%s11713_s10 + $0xe8] sm:$0xff] }
  0x1f   : > { %10129 = vmatprep.mubr.msk.f32.mxu0 %vm625_vm6, %v11727_v18  ;;  %v15243_v48 = vrot.slane %v11776_v43, 7  ;;  %vm320_vm12 = vcmp.ge.f32.partialorder %v288_v51, 0.0  ;;  %v352_v54 = vmul.f32 0.2, %v288_v51  ;;  %v383_v55 = vsel %vm319_vm11, %v287_v49, %v351_v53  ;;  %v295_v53 = vld [vmem:[%s11713_s10 + $0x80] sm:$0xff] }
  0x20   : > { %v11793_v50 = vsel %vm471_vm3, %v426_v46, %v481_v47  ;;  %v427_v59 = vrot.slane %v383_v55, 1  ;;  %v484_v60 = vrot.slane %v383_v55, 7  ;;  %vm321_vm13 = vcmp.ge.f32.partialorder %v289_v57, 0.0  ;;  %v296_v55 = vld [vmem:[%s11713_s10 + $0x88] sm:$0xff] }
  0x21   : > { %v11801_v52 = vsel %vm471_vm3, %v481_v47, %v15243_v48  ;;  %v11805_v56 = vsel %vm320_vm12, %v288_v51, %v352_v54  ;;  %v353_v62 = vmul.f32 0.2, %v289_v57  ;;  %v11819_v2 = vadd.f32 %v289_v57, %v287_v49 }
  0x22   : > { %10130 = vmatmul.mubr.msk.f32.gmra.mrb[4].mxu0 %vm625_vm6, %v11732_v19  ;;  %v15241_v61 = vrot.slane %v11805_v56, 7  ;;  %v11812_v0 = vsel %vm471_vm3, %v427_v59, %v484_v60  ;;  %vm322_vm14 = vcmp.ge.f32.partialorder %v290_v58, 0.0  ;;  %v354_v4 = vmul.f32 0.2, %v290_v58 }
  0x23   : > { %10132 = vmatprep.mubr.msk.f32.mxu0 %vm625_vm6, %v11779_v44  ;;  %15474 = vst [vmem:[#allocation6_spill] sm:$0xff] %v11819_v2  ;;  %v385_v3 = vsel %vm321_vm13, %v289_v57, %v353_v62  ;;  %v11823_v5 = vadd.f32 %v290_v58, %v288_v51  ;;  %vm323_vm15 = vcmp.ge.f32.partialorder %v291_v63, 0.0  ;;  %v355_v12 = vmul.f32 0.2, %v291_v63 }
  0x24   : > { %v11817_v1 = vsel %vm471_vm3, %v484_v60, %v15241_v61  ;;  %v428_v6 = vrot.slane %v385_v3, 1  ;;  %v487_v7 = vrot.slane %v385_v3, 7  ;;  %v11828_v10 = vsel %vm322_vm14, %v290_v58, %v354_v4  ;;  %v297_v58 = vld [vmem:[%s11713_s10 + $0x90] sm:$0xff]  ;;  %v304_v61 = vld [vmem:[%s11713_s10 + $0xc8] sm:$0xff] }
  0x25   : > { %15475 = vst [vmem:[#allocation7_spill] sm:$0xff] %v11823_v5  ;;  %v15240_v16 = vrot.slane %v11828_v10, 7  ;;  %v387_v20 = vsel %vm323_vm15, %v291_v63, %v355_v12  ;;  %vm324_vm1 = vcmp.ge.f32.partialorder %v292_v9, 0.0  ;;  %v356_v28 = vmul.f32 0.2, %v292_v9 }
  0x26   : > { %10133 = vmatmul.mubr.msk.f32.gmra.mrb[6].mxu0 %vm625_vm6, %v11784_v45  ;;  %v11831_v13 = vsel %vm471_vm3, %v428_v6, %v487_v7  ;;  %v429_v21 = vrot.slane %v387_v20, 1  ;;  %v490_v26 = vrot.slane %v387_v20, 7  ;;  %vm325_vm2 = vcmp.ge.f32.partialorder %v293_v14, 0.0  ;;  %v298_v6 = vld [vmem:[%s11713_s10 + $0x98] sm:$0xff] }
  0x27   : > { %10135 = vmatprep.mubr.msk.f32.mxu0 %vm625_vm6, %v11793_v50  ;;  %v11841_v30 = vsel %vm471_vm3, %v487_v7, %v15240_v16  ;;  %v11848_v32 = vsel %vm324_vm1, %v292_v9, %v356_v28  ;;  %v357_v33 = vmul.f32 0.2, %v293_v14  ;;  %v11850_v35 = vadd.f32 %v293_v14, %v291_v63 }
  0x28   : > { %v11846_v31 = vsel %vm471_vm3, %v429_v21, %v490_v26  ;;  %v15239_v36 = vrot.slane %v11848_v32, 7  ;;  %vm326_vm4 = vcmp.ge.f32.partialorder %v294_v29, 0.0  ;;  %v358_v39 = vmul.f32 0.2, %v294_v29  ;;  %v299_v21 = vld [vmem:[%s11713_s10 + $0xa0] sm:$0xff] }
  0x29   : > { %15476 = vst [vmem:[#allocation8_spill] sm:$0xff] %v11850_v35  ;;  %v389_v40 = vsel %vm325_vm2, %v293_v14, %v357_v33  ;;  %v11855_v42 = vadd.f32 %v294_v29, %v292_v9  ;;  %vm327_vm5 = vcmp.ge.f32.partialorder %v295_v53, 0.0  ;;  %v359_v60 = vmul.f32 0.2, %v295_v53 }
  0x2a   : > { %10136 = vmatmul.mubr.msk.f32.gmra.mrb[8].mxu0 %vm625_vm6, %v11801_v52  ;;  %v11860_v46 = vsel %vm471_vm3, %v490_v26, %v15239_v36  ;;  %v430_v47 = vrot.slane %v389_v40, 1  ;;  %v493_v49 = vrot.slane %v389_v40, 7  ;;  %v11862_v51 = vsel %vm326_vm4, %v294_v29, %v358_v39  ;;  %v303_v36 = vld [vmem:[%s11713_s10 + $0xc0] sm:$0xff] }
  0x2b   : > { %10138 = vmatprep.mubr.msk.f32.mxu0 %vm625_vm6, %v11812_v0  ;;  %15477 = vst [vmem:[#allocation9_spill] sm:$0xff] %v11855_v42  ;;  %v15238_v54 = vrot.slane %v11862_v51, 7  ;;  %vm328_vm7 = vcmp.ge.f32.partialorder %v296_v55, 0.0  ;;  %v360_v62 = vmul.f32 0.2, %v296_v55  ;;  %v391_v63 = vsel %vm327_vm5, %v295_v53, %v359_v60  ;;  %v301_v60 = vld [vmem:[%s11713_s10 + $0xb0] sm:$0xff] }
  0x2c   : > { %v11870_v57 = vsel %vm471_vm3, %v430_v47, %v493_v49  ;;  %vm329_vm8 = vcmp.ge.f32.partialorder %v297_v58, 0.0  ;;  %v361_v3 = vmul.f32 0.2, %v297_v58  ;;  %v11882_v4 = vadd.f32 %v297_v58, %v295_v53  ;;  %v300_v47 = vld [vmem:[%s11713_s10 + $0xa8] sm:$0xff] }
  0x2d   : > { %v11878_v59 = vsel %vm471_vm3, %v493_v49, %v15238_v54  ;;  %v431_v7 = vrot.slane %v391_v63, 1  ;;  %v496_v9 = vrot.slane %v391_v63, 7  ;;  %v11885_v12 = vsel %vm328_vm7, %v296_v55, %v360_v62 }
  0x2e   : > { %10139 = vmatmul.mubr.msk.f32.gmra.mrb[10].mxu0 %vm625_vm6, %v11817_v1  ;;  %15478 = vst [vmem:[#allocation10_spill] sm:$0xff] %v11882_v4  ;;  %v15237_v14 = vrot.slane %v11885_v12, 7  ;;  %v393_v20 = vsel %vm329_vm8, %v297_v58, %v361_v3  ;;  %vm330_vm9 = vcmp.ge.f32.partialorder %v298_v6, 0.0  ;;  %v362_v39 = vmul.f32 0.2, %v298_v6 }
  0x2f   : > { %10141 = vmatprep.mubr.msk.f32.mxu0 %vm625_vm6, %v11831_v13  ;;  %v11890_v26 = vsel %vm471_vm3, %v431_v7, %v496_v9  ;;  %v432_v28 = vrot.slane %v393_v20, 1  ;;  %v499_v29 = vrot.slane %v393_v20, 7  ;;  %v11899_v40 = vadd.f32 %v298_v6, %v296_v55  ;;  %v302_v55 = vld [vmem:[%s11713_s10 + $0xb8] sm:$0xff] }
  0x30   : > { %v11897_v33 = vsel %vm471_vm3, %v496_v9, %v15237_v14  ;;  %vm331_vm10 = vcmp.ge.f32.partialorder %v299_v21, 0.0  ;;  %v11909_v53 = vsel %vm330_vm9, %v298_v6, %v362_v39  ;;  %v363_v58 = vmul.f32 0.2, %v299_v21 }
  0x31   : > { %15479 = vst [vmem:[#allocation11_spill] sm:$0xff] %v11899_v40  ;;  %v11905_v49 = vsel %vm471_vm3, %v432_v28, %v499_v29  ;;  %v15236_v62 = vrot.slane %v11909_v53, 7  ;;  %vm332_vm11 = vcmp.ge.f32.partialorder %v300_v47, 0.0  ;;  %v364_v3 = vmul.f32 0.2, %v300_v47 }
  0x32   : > { %10142 = vmatmul.mubr.msk.f32.gmra.mrb[12].mxu0 %vm625_vm6, %v11841_v30  ;;  %v395_v63 = vsel %vm331_vm10, %v299_v21, %v363_v58  ;;  %vm333_vm12 = vcmp.ge.f32.partialorder %v301_v60, 0.0  ;;  %v365_v28 = vmul.f32 0.2, %v301_v60  ;;  %v11923_v39 = vadd.f32 %v301_v60, %v299_v21 }
  0x33   : > { %10144 = vmatprep.mubr.msk.f32.mxu0 %vm625_vm6, %v11846_v31  ;;  %v11917_v7 = vsel %vm471_vm3, %v499_v29, %v15236_v62  ;;  %v433_v9 = vrot.slane %v395_v63, 1  ;;  %v502_v20 = vrot.slane %v395_v63, 7  ;;  %v11921_v6 = vsel %vm332_vm11, %v300_v47, %v364_v3 }
  0x34   : > { %15480 = vst [vmem:[#allocation12_spill] sm:$0xff] %v11923_v39  ;;  %vm334_vm13 = vcmp.ge.f32.partialorder %v302_v55, 0.0  ;;  %v15242_v29 = vrot.slane %v11921_v6, 7  ;;  %v366_v62 = vmul.f32 0.2, %v302_v55  ;;  %v397_v63 = vsel %vm333_vm12, %v301_v60, %v365_v28 }
  0x35   : > { %v11926_v58 = vsel %vm471_vm3, %v433_v9, %v502_v20  ;;  %v11931_v14 = vadd.f32 %v302_v55, %v300_v47  ;;  %v434_v21 = vrot.slane %v397_v63, 1  ;;  %v505_v54 = vrot.slane %v397_v63, 7  ;;  %v11963_v63 = vld [vmem:[%s11713_s10 + $0xd8] sm:$0xff] }
  0x36   : > { %10145 = vmatmul.mubr.msk.f32.gmra.mrb[14].mxu0 %vm625_vm6, %v11860_v46  ;;  %v11936_v3 = vsel %vm471_vm3, %v502_v20, %v15242_v29  ;;  %v11938_v9 = vsel %vm334_vm13, %v302_v55, %v366_v62  ;;  %v552_v60 = vrot.slane %v11721_v11, 5  ;;  %v11957_v55 = vld [vmem:[%s11713_s10 + $0xd0] sm:$0xff]  ;;  %vm335_vm14 = vcmp.ge.f32.partialorder %v303_v36, 0.0 }
  0x37   : > { %10147 = vmatprep.mubr.msk.f32.mxu0 %vm625_vm6, %v11870_v57  ;;  %15481 = vst [vmem:[#allocation13_spill] sm:$0xff] %v11931_v14  ;;  %v15244_v16 = vrot.slane %v11938_v9, 7  ;;  %v11946_v47 = vsel %vm471_vm3, %v434_v21, %v505_v54  ;;  %v367_v20 = vmul.f32 0.2, %v303_v36  ;;  %v11960_v28 = vadd.f32 %v11957_v55, %v303_v36 }
  0x38   : > { %vm336_vm15 = vcmp.ge.f32.partialorder %v304_v61, 0.0  ;;  %v368_v29 = vmul.f32 0.2, %v304_v61  ;;  %v11968_v48 = vadd.f32 %v11963_v63, %v304_v61  ;;  %v978_v22 = vrot.slane %v11727_v18, 1 }
  0x39   : > { %v11954_v62 = vsel %vm471_vm3, %v505_v54, %v15244_v16  ;;  %15482 = vst [vmem:[#allocation14_spill] sm:$0xff] %v11960_v28  ;;  %v399_v21 = vsel %vm335_vm14, %v303_v36, %v367_v20  ;;  %v553_v54 = vrot.slane %v11724_v17, 5  ;;  %vm977_vm1 = vcmask 1046528  }
  0x3a   : > { %10148 = vmatmul.mubr.msk.f32.gmra.mrb[16].mxu0 %vm625_vm6, %v11878_v59  ;;  %15483 = vst [vmem:[#allocation15_spill] sm:$0xff] %v11968_v48  ;;  %v435_v16 = vrot.slane %v399_v21, 1  ;;  %v508_v41 = vrot.slane %v399_v21, 7  ;;  %v11972_v15 = vsel %vm336_vm15, %v304_v61, %v368_v29  ;;  %v979_v14 = vrot.slane %v11732_v19, 1 }
  0x3b   : > { %10150 = vmatprep.mubr.msk.f32.mxu0 %vm625_vm6, %v11890_v26  ;;  %v15484_v40 = vrot.slane %v11721_v11, 7  ;;  %v983_v20 = vrot.slane %v11745_v24, 1  ;;  %v15252_v21 = vrot.slane %v11972_v15, 7  ;;  %v984_v61 = vrot.slane %v11756_v27, 1 }
  0x3c   : > { %v11981_v36 = vsel %vm471_vm3, %v435_v16, %v508_v41  ;;  %v11989_v29 = vsel %vm977_vm1, %v978_v22, %v979_v14  ;;  %v998_v39 = vrot.slane %v11812_v0, 1  ;;  %v999_v4 = vrot.slane %v11817_v1, 1 }
  0x3d   : > { %v11978_v42 = vsel %vm471_vm3, %v15484_v40, %v552_v60  ;;  %15485 = vst [vmem:[#allocation16_spill] sm:$0xff] %v11989_v29  ;;  %v15486_v40 = vrot.slane %v11724_v17, 7  ;;  %v12000_v16 = vsel %vm471_vm3, %v508_v41, %v15252_v21  ;;  %v554_v17 = vrot.slane %v11769_v37, 5  ;;  %v12017_v41 = vld [vmem:[%s15229_s1 + $0xc] sm:$0xf] }
  0x3e   : > { %10151 = vmatmul.mubr.msk.f32.gmra.mrb[18].mxu0 %vm625_vm6, %v11897_v33  ;;  %v981_v11 = vrot.slane %v11978_v42, 1  ;;  %v15490_v21 = vrot.slane %v11769_v37, 7  ;;  %v993_v37 = vrot.slane %v11793_v50, 1  ;;  %v557_v25 = vrot.slane %v11828_v10, 5 }
  0x3f   : > { %10153 = vmatprep.mubr.msk.f32.mxu0 %vm625_vm6, %v11905_v49  ;;  %v11995_v60 = vsel %vm471_vm3, %v15486_v40, %v553_v54  ;;  %v12012_v54 = vsel %vm977_vm1, %v983_v20, %v984_v61  ;;  %v555_v20 = vrot.slane %v11776_v43, 5  ;;  %v989_v40 = vrot.slane %v11784_v45, 1 }
  0x40   : > { %v12007_v22 = vsel %vm977_vm1, %v979_v14, %v981_v11  ;;  %v986_v48 = vrot.slane %v11995_v60, 1  ;;  %15488 = vst [vmem:[#allocation18_spill] sm:$0xff] %v12012_v54  ;;  %v988_v11 = vrot.slane %v11779_v44, 1  ;;  %v12034_v28 = vsel %vm471_vm3, %v15490_v21, %v554_v17 }
  0x41   : > { %15487 = vst [vmem:[#allocation17_spill] sm:$0xff] %v12007_v22  ;;  %v994_v21 = vrot.slane %v11801_v52, 1  ;;  %v15492_v17 = vrot.slane %v11776_v43, 7  ;;  %v558_v2 = vrot.slane %v11848_v32, 5  ;;  %vm337_vm2 = vcmp.ge.f32.partialorder %v11957_v55, 0.0 }
  0x42   : > { %10154 = vmatmul.mubr.msk.f32.gmra.mrb[20].mxu0 %vm625_vm6, %v11917_v7  ;;  %v12026_v14 = vsel %vm977_vm1, %v984_v61, %v986_v48  ;;  %v991_v48 = vrot.slane %v12034_v28, 1  ;;  %v12045_v61 = vsel %vm977_vm1, %v988_v11, %v989_v40  ;;  %v15493_v11 = vrot.slane %v11805_v56, 7 }
  0x43   : > { %10156 = vmatprep.mubr.msk.f32.mxu0 %vm625_vm6, %v11926_v58  ;;  %15489 = vst [vmem:[#allocation19_spill] sm:$0xff] %v12026_v14  ;;  %15491 = vst [vmem:[#allocation20_spill] sm:$0xff] %v12045_v61  ;;  %v12052_v5 = vsel %vm471_vm3, %v15492_v17, %v555_v20  ;;  %v12071_v17 = vsel %vm977_vm1, %v993_v37, %v994_v21  ;;  %vm338_vm4 = vcmp.ge.f32.partialorder %v11963_v63, 0.0  ;;  %v15498_v37 = vrot.slane %v11828_v10, 7 }
  0x44   : > { %v12067_v43 = vsel %vm977_vm1, %v989_v40, %v991_v48  ;;  %v996_v20 = vrot.slane %v12052_v5, 1  ;;  %15495 = vst [vmem:[#allocation22_spill] sm:$0xff] %v12071_v17  ;;  %v1003_v40 = vrot.slane %v11831_v13, 1  ;;  %v1004_v48 = vrot.slane %v11841_v30, 1 }
  0x45   : > { %15494 = vst [vmem:[#allocation21_spill] sm:$0xff] %v12067_v43  ;;  %v12098_v8 = vsel %vm471_vm3, %v15498_v37, %v557_v25  ;;  %v369_v34 = vmul.f32 0.2, %v11957_v55  ;;  %vm340_vm7 = vcmp.ge.f32.partialorder %v12082_v38, 0.0  ;;  %v1009_v37 = vrot.slane %v11860_v46, 1 }
  0x46   : > { %10157 = vmatmul.mubr.msk.f32.gmra.mrb[22].mxu0 %vm625_vm6, %v11936_v3  ;;  %vm1375_vm8 = vcmask 1045504  }
  0x47   : > { %10159 = vmatprep.mubr.msk.f32.mxu0 %vm625_vm6, %v11946_v47  ;;  %v401_v10 = vsel %vm337_vm2, %v11957_v55, %v369_v34  ;;  %v1006_v34 = vrot.slane %v12098_v8, 1 }
  0x4a   : > { %10160 = vmatmul.mubr.msk.f32.gmra.mrb[24].mxu0 %vm625_vm6, %v11954_v62 }
  0x4b   : > { %10162 = vmatprep.mubr.msk.f32.mxu0 %vm625_vm6, %v11981_v36 }
  0x4e   : > { %10163 = vmatmul.mubr.msk.f32.gmra.mrb[26].mxu0 %vm625_vm6, %v12000_v16 }
  0x4f   : > { %10173 = vmatprep.mubr.msk.f32.mxu0 %vm625_vm6, %v11989_v29 }
  0x52   : > { %10174 = vmatmul.mubr.msk.f32.vlgmr.msra.gmra.mrb[0].mxu0 %vm625_vm6, %v12007_v22 }
  0x53   : > { %10222 = vmatpush3.msk.msra.mxu0 %vm701_vm0, %v11740_v23  ;;  %10176 = vmatprep.mubr.msk.f32.mxu0 %vm625_vm6, %v12012_v54  ;;  %v556_v23 = vrot.slane %v11805_v56, 5  ;;  %v12075_v56 = vsel %vm977_vm1, %v998_v39, %v999_v4  ;;  %v12093_v39 = vsel %vm977_vm1, %v994_v21, %v996_v20  ;;  %v559_v21 = vrot.slane %v11862_v51, 5 }
  0x54   : > { %10271 = vmatprep.subr.msk.mxu0 %vm701_vm0, %v12017_v41  ;;  %15496 = vst [vmem:[#allocation23_spill] sm:$0xff] %v12075_v56  ;;  %15497 = vst [vmem:[#allocation24_spill] sm:$0xff] %v12093_v39  ;;  %v1008_v20 = vrot.slane %v11846_v31, 1 }
  0x55   : > { %v12061_v35 = vsel %vm471_vm3, %v15493_v11, %v556_v23  ;;  %v12079_v11 = vld [vmem:[%s11713_s10 + $0xe0] sm:$0xff] }
  0x56   : > { %10177 = vmatmul.mubr.msk.f32.gmra.mrb[2].mxu0 %vm625_vm6, %v12026_v14  ;;  %v1001_v23 = vrot.slane %v12061_v35, 1  ;;  %vm339_vm5 = vcmp.ge.f32.partialorder %v12079_v11, 0.0 }
  0x57   : > { %10179 = vmatprep.mubr.msk.f32.mxu0 %vm625_vm6, %v11989_v29  ;;  %v511_v29 = vrot.slane %v401_v10, 7 }
  0x58   : > { %v12119_v54 = vsel %vm977_vm1, %v999_v4, %v1001_v23 }
  0x59   : > { %15499 = vst [vmem:[#allocation25_spill] sm:$0xff] %v12119_v54 }
  0x5a   : > { %10180 = vmatmul.mubr.msk.f32.gmra.mrb[4].mxu0 %vm625_vm6, %v12007_v22  ;;  %v436_v22 = vrot.slane %v401_v10, 1  ;;  %v15501_v10 = vrot.slane %v11848_v32, 7 }
  0x5b   : > { %10182 = vmatprep.mubr.msk.f32.mxu0 %vm625_vm6, %v12045_v61  ;;  %v371_v61 = vmul.f32 0.2, %v12079_v11 }
  0x5c   : > { %v12136_v14 = vsel %vm471_vm3, %v15501_v10, %v558_v2  ;;  %v12139_v4 = vsel %vm471_vm3, %v436_v22, %v511_v29  ;;  %v560_v2 = vrot.slane %v11885_v12, 5  ;;  %v15505_v10 = vrot.slane %v11862_v51, 7 }
  0x5d   : > { %v403_v55 = vsel %vm339_vm5, %v12079_v11, %v371_v61  ;;  %10165 = vmatprep.mubr.msk.f32.mxu1 %vm625_vm6, %v12139_v4  ;;  %v1011_v22 = vrot.slane %v12136_v14, 1 }
  0x5e   : > { %10183 = vmatmul.mubr.msk.f32.gmra.mrb[6].mxu0 %vm625_vm6, %v12067_v43  ;;  %v370_v43 = vmul.f32 0.2, %v11963_v63  ;;  %v437_v23 = vrot.slane %v403_v55, 1  ;;  %v12171_v32 = vsel %vm471_vm3, %v15505_v10, %v559_v21  ;;  %v1019_v10 = vrot.slane %v11897_v33, 1 }
  0x5f   : > { %10185 = vmatprep.mubr.msk.f32.mxu0 %vm625_vm6, %v12071_v17  ;;  %v372_v17 = vmul.f32 0.2, %v12082_v38  ;;  %v12188_v51 = vsel %vm977_vm1, %v1009_v37, %v1011_v22  ;;  %v1016_v21 = vrot.slane %v12171_v32, 1 }
  0x60   : > { %v12110_v25 = vsel %vm338_vm4, %v11963_v63, %v370_v43  ;;  %v12131_v43 = vsel %vm977_vm1, %v1003_v40, %v1004_v48  ;;  %v1013_v40 = vrot.slane %v11870_v57, 1  ;;  %15507 = vst [vmem:[#allocation29_spill] sm:$0xff] %v12188_v51 }
  0x61   : > { %v12128_v63 = vsel %vm340_vm7, %v12082_v38, %v372_v17  ;;  %15500 = vst [vmem:[#allocation26_spill] sm:$0xff] %v12131_v43 }
  0x62   : > { %10186 = vmatmul.mubr.msk.f32.gmra.mrb[8].mxu0 %vm625_vm6, %v12093_v39  ;;  %v514_v39 = vrot.slane %v403_v55, 7  ;;  %v1014_v55 = vrot.slane %v11878_v59, 1 }
  0x63   : > { %10188 = vmatprep.mubr.msk.f32.mxu0 %vm625_vm6, %v12075_v56  ;;  %v15502_v56 = vrot.slane %v12110_v25, 7 }
  0x64   : > { %v12161_v17 = vsel %vm471_vm3, %v437_v23, %v514_v39  ;;  %v12192_v23 = vsel %vm977_vm1, %v1013_v40, %v1014_v55  ;;  %v12207_v22 = vsel %vm977_vm1, %v1014_v55, %v1016_v21  ;;  %v563_v55 = vrot.slane %v11938_v9, 5 }
  0x65   : > { %v12144_v61 = vsel %vm471_vm3, %v511_v29, %v15502_v56  ;;  %v12157_v29 = vsel %vm977_vm1, %v1004_v48, %v1006_v34  ;;  %v12164_v56 = vsel %vm977_vm1, %v1008_v20, %v1009_v37  ;;  %v15506_v48 = vrot.slane %v12128_v63, 7  ;;  %15508 = vst [vmem:[#allocation30_spill] sm:$0xff] %v12192_v23  ;;  %15510 = vst [vmem:[#allocation31_spill] sm:$0xff] %v12207_v22 }
  0x66   : > { %10189 = vmatmul.mubr.msk.f32.gmra.mrb[10].mxu0 %vm625_vm6, %v12119_v54  ;;  %10166 = vmatmul.mubr.msk.f32.vlgmr.msra.gmra.mrb[0].mxu1 %vm625_vm6, %v12144_v61  ;;  %15503 = vst [vmem:[#allocation27_spill] sm:$0xff] %v12157_v29  ;;  %15504 = vst [vmem:[#allocation28_spill] sm:$0xff] %v12164_v56  ;;  %v561_v20 = vrot.slane %v11909_v53, 5  ;;  %v562_v37 = vrot.slane %v11921_v6, 5 }
  0x67   : > { %10191 = vmatprep.mubr.msk.f32.mxu0 %vm625_vm6, %v12131_v43  ;;  %10168 = vmatprep.mubr.msk.f32.mxu1 %vm625_vm6, %v12161_v17  ;;  %v12178_v34 = vsel %vm471_vm3, %v514_v39, %v15506_v48  ;;  %v1018_v39 = vrot.slane %v11890_v26, 1  ;;  %v15509_v48 = vrot.slane %v11885_v12, 7  ;;  %v1023_v12 = vrot.slane %v11905_v49, 1 }
  0x6a   : > { %10192 = vmatmul.mubr.msk.f32.gmra.mrb[12].mxu0 %vm625_vm6, %v12157_v29  ;;  %10169 = vmatmul.mubr.msk.f32.gmra.mrb[2].mxu1 %vm625_vm6, %v12178_v34  ;;  %v12199_v29 = vsel %vm471_vm3, %v15509_v48, %v560_v2  ;;  %v1024_v2 = vrot.slane %v11917_v7, 1  ;;  %v15512_v48 = vrot.slane %v11909_v53, 7  ;;  %v1028_v53 = vrot.slane %v11926_v58, 1 }
  0x6b   : > { %10194 = vmatprep.mubr.msk.f32.mxu0 %vm625_vm6, %v12164_v56  ;;  %v1021_v40 = vrot.slane %v12199_v29, 1  ;;  %v12211_v56 = vsel %vm977_vm1, %v1018_v39, %v1019_v10 }
  0x6c   : > { %15511 = vst [vmem:[#allocation32_spill] sm:$0xff] %v12211_v56 }
  0x6d   : > { %v12226_v21 = vsel %vm977_vm1, %v1019_v10, %v1021_v40  ;;  %v564_v10 = vrot.slane %v11972_v15, 5 }
  0x6e   : > { %10195 = vmatmul.mubr.msk.f32.gmra.mrb[14].mxu0 %vm625_vm6, %v12188_v51  ;;  %v12218_v51 = vsel %vm471_vm3, %v15512_v48, %v561_v20  ;;  %15513 = vst [vmem:[#allocation33_spill] sm:$0xff] %v12226_v21  ;;  %v1029_v20 = vrot.slane %v11936_v3, 1  ;;  %v15515_v48 = vrot.slane %v11921_v6, 7  ;;  %v1033_v6 = vrot.slane %v11946_v47, 1 }
  0x6f   : > { %10197 = vmatprep.mubr.msk.f32.mxu0 %vm625_vm6, %v12192_v23  ;;  %v1026_v39 = vrot.slane %v12218_v51, 1  ;;  %v12230_v23 = vsel %vm977_vm1, %v1023_v12, %v1024_v2 }
  0x70   : > { %15514 = vst [vmem:[#allocation34_spill] sm:$0xff] %v12230_v23 }
  0x71   : > { %v12245_v40 = vsel %vm977_vm1, %v1024_v2, %v1026_v39 }
  0x72   : > { %10198 = vmatmul.mubr.msk.f32.gmra.mrb[16].mxu0 %vm625_vm6, %v12207_v22  ;;  %v12237_v22 = vsel %vm471_vm3, %v15515_v48, %v562_v37  ;;  %15516 = vst [vmem:[#allocation35_spill] sm:$0xff] %v12245_v40  ;;  %v1034_v37 = vrot.slane %v11954_v62, 1  ;;  %v15518_v48 = vrot.slane %v11938_v9, 7 }
  0x73   : > { %10200 = vmatprep.mubr.msk.f32.mxu0 %vm625_vm6, %v12211_v56  ;;  %v1031_v12 = vrot.slane %v12237_v22, 1  ;;  %v12249_v56 = vsel %vm977_vm1, %v1028_v53, %v1029_v20  ;;  %v1038_v53 = vrot.slane %v11981_v36, 1 }
  0x74   : > { %15517 = vst [vmem:[#allocation36_spill] sm:$0xff] %v12249_v56  ;;  %v12269_v9 = vsel %vm977_vm1, %v1033_v6, %v1034_v37 }
  0x75   : > { %v12263_v2 = vsel %vm977_vm1, %v1029_v20, %v1031_v12  ;;  %15520 = vst [vmem:[#allocation38_spill] sm:$0xff] %v12269_v9 }
  0x76   : > { %10201 = vmatmul.mubr.msk.f32.gmra.mrb[18].mxu0 %vm625_vm6, %v12226_v21  ;;  %v12256_v21 = vsel %vm471_vm3, %v15518_v48, %v563_v55  ;;  %15519 = vst [vmem:[#allocation37_spill] sm:$0xff] %v12263_v2  ;;  %v15521_v55 = vrot.slane %v11972_v15, 7  ;;  %v1043_v15 = vrot.slane %v12139_v4, 1 }
  0x77   : > { %10203 = vmatprep.mubr.msk.f32.mxu0 %vm625_vm6, %v12230_v23  ;;  %v1036_v39 = vrot.slane %v12256_v21, 1  ;;  %v1039_v23 = vrot.slane %v12000_v16, 1 }
  0x78   : > { %v12274_v48 = vsel %vm471_vm3, %v15521_v55, %v564_v10  ;;  %v1044_v10 = vrot.slane %v12144_v61, 1  ;;  %v15524_v55 = vrot.slane %v12110_v25, 7 }
  0x79   : > { %v12282_v20 = vsel %vm977_vm1, %v1034_v37, %v1036_v39  ;;  %v12285_v12 = vsel %vm977_vm1, %v1038_v53, %v1039_v23  ;;  %v1041_v6 = vrot.slane %v12274_v48, 1 }
  0x7a   : > { %10204 = vmatmul.mubr.msk.f32.gmra.mrb[20].mxu0 %vm625_vm6, %v12245_v40  ;;  %v565_v40 = vrot.slane %v12110_v25, 5  ;;  %15522 = vst [vmem:[#allocation39_spill] sm:$0xff] %v12282_v20  ;;  %15523 = vst [vmem:[#allocation40_spill] sm:$0xff] %v12285_v12  ;;  %v12305_v53 = vsel %vm977_vm1, %v1043_v15, %v1044_v10  ;;  %v1048_v25 = vrot.slane %v12161_v17, 1 }
  0x7b   : > { %10206 = vmatprep.mubr.msk.f32.mxu0 %vm625_vm6, %v12249_v56  ;;  %v12301_v37 = vsel %vm977_vm1, %v1039_v23, %v1041_v6  ;;  %15526 = vst [vmem:[#allocation42_spill] sm:$0xff] %v12305_v53 }
  0x7c   : > { %v12293_v56 = vsel %vm471_vm3, %v15524_v55, %v565_v40  ;;  %15525 = vst [vmem:[#allocation41_spill] sm:$0xff] %v12301_v37  ;;  %v1049_v40 = vrot.slane %v12178_v34, 1  ;;  %v15527_v55 = vrot.slane %v12128_v63, 7 }
  0x7d   : > { %v1046_v39 = vrot.slane %v12293_v56, 1 }
  0x7e   : > { %10207 = vmatmul.mubr.msk.f32.gmra.mrb[22].mxu0 %vm625_vm6, %v12263_v2  ;;  %v566_v2 = vrot.slane %v12128_v63, 5  ;;  %v12323_v15 = vsel %vm977_vm1, %v1048_v25, %v1049_v40  ;;  %v1376_v63 = vrot.slane %v11727_v18, 2 }
  0x7f   : > { %10209 = vmatprep.mubr.msk.f32.mxu0 %vm625_vm6, %v12269_v9  ;;  %v12319_v23 = vsel %vm977_vm1, %v1044_v10, %v1046_v39  ;;  %v1379_v39 = vrot.slane %v11978_v42, 2 }
  0x80   : > { %15528 = vst [vmem:[#allocation43_spill] sm:$0xff] %v12319_v23 }
  0x82   : > { %10210 = vmatmul.mubr.msk.f32.gmra.mrb[24].mxu0 %vm625_vm6, %v12282_v20  ;;  %v12312_v20 = vsel %vm471_vm3, %v15527_v55, %v566_v2  ;;  %v1377_v2 = vrot.slane %v11732_v19, 2  ;;  %v12330_v55 = vld [vmem:[%s11713_s10 + $0xf0] sm:$0xff] }
  0x83   : > { %10212 = vmatprep.mubr.msk.f32.mxu0 %vm625_vm6, %v12285_v12  ;;  %v1051_v6 = vrot.slane %v12312_v20, 1  ;;  %v12340_v25 = vadd.f32 %v12330_v55, %v12079_v11  ;;  %v12348_v12 = vld [vmem:[%s11713_s10 + $0xf8] sm:$0xff]  ;;  %v1384_v11 = vrot.slane %v11995_v60, 2  ;;  %v1386_v60 = vrot.slane %v11779_v44, 2 }
  0x84   : > { %v12359_v42 = vsel %vm1375_vm8, %v1377_v2, %v1379_v39  ;;  %v1392_v39 = vrot.slane %v11801_v52, 2  ;;  %vm341_vm9 = vcmp.ge.f32.partialorder %v12330_v55, 0.0  ;;  %vm342_vm10 = vcmp.ge.f32.partialorder %v12348_v12, 0.0 }
  0x85   : > { %v12335_v10 = vsel %vm977_vm1, %v1049_v40, %v1051_v6  ;;  %15529 = vst [vmem:[#allocation44_spill] sm:$0xff] %v12340_v25  ;;  %v12354_v40 = vadd.f32 %v12348_v12, %v12082_v38  ;;  %v1397_v25 = vrot.slane %v11817_v1, 2 }
  0x86   : > { %10213 = vmatmul.mubr.msk.f32.gmra.mrb[26].mxu0 %vm625_vm6, %v12301_v37  ;;  %v1382_v37 = vrot.slane %v11756_v27, 2 }
  0x87   : > { %10215 = vmatprep.mubr.msk.f32.mxu0 %vm625_vm6, %v12305_v53  ;;  %v1381_v53 = vrot.slane %v11745_v24, 2  ;;  %15530 = vst [vmem:[#allocation45_spill] sm:$0xff] %v12354_v40  ;;  %v1394_v40 = vrot.slane %v12052_v5, 2 }
  0x88   : > { %v12377_v38 = vsel %vm1375_vm8, %v1382_v37, %v1384_v11 }
  0x89   : > { %v12363_v6 = vsel %vm1375_vm8, %v1381_v53, %v1382_v37  ;;  %v1387_v53 = vrot.slane %v11784_v45, 2  ;;  %v1391_v37 = vrot.slane %v11793_v50, 2 }
  0x8a   : > { %10216 = vmatmul.mubr.msk.f32.gmra.mrb[28].mxu0 %vm625_vm6, %v12319_v23  ;;  %v12345_v23 = vsel %vm1375_vm8, %v1376_v63, %v1377_v2  ;;  %v12368_v63 = vld [vmem:[%s15229_s1 + $0x10] sm:$0xf] }
  0x8b   : > { %10218 = vmatprep.mubr.msk.f32.mxu0 %vm625_vm6, %v12323_v15  ;;  %v12389_v2 = vsel %vm1375_vm8, %v1386_v60, %v1387_v53  ;;  %v1396_v60 = vrot.slane %v11812_v0, 2 }
  0x8c   : > { %15531 = vst [vmem:[#allocation46_spill] sm:$0xff] %v12389_v2 }
  0x8d   : > { %v12415_v5 = vsel %vm1375_vm8, %v1396_v60, %v1397_v25  ;;  %v1407_v60 = vrot.slane %v11860_v46, 2 }
  0x8e   : > { %10219 = vmatmul.mubr.msk.f32.gmra.mrb[30].mxu0 %vm625_vm6, %v12335_v10  ;;  %15533 = vst [vmem:[#allocation48_spill] sm:$0xff] %v12415_v5 }
  0x8f   : > { %10223 = vmatprep.mubr.msk.f32.mxu0 %vm625_vm6, %v12345_v23 }
  0x92   : > { %10224 = vmatmul.mubr.msk.f32.vlgmr.msra.gmra.mrb[0].mxu0 %vm625_vm6, %v12359_v42 }
  0x93   : > { %10272 = vmatpush3.msk.msra.mxu0 %vm701_vm0, %v12017_v41  ;;  %10226 = vmatprep.mubr.msk.f32.mxu0 %vm625_vm6, %v12363_v6  ;;  %v1389_v41 = vrot.slane %v12034_v28, 2  ;;  %v12402_v28 = vsel %vm1375_vm8, %v1391_v37, %v1392_v39  ;;  %v1402_v37 = vrot.slane %v11841_v30, 2 }
  0x94   : > { %10321 = vmatprep.subr.msk.mxu0 %vm701_vm0, %v12368_v63  ;;  %15532 = vst [vmem:[#allocation47_spill] sm:$0xff] %v12402_v28 }
  0x95   : > { %v12398_v11 = vsel %vm1375_vm8, %v1387_v53, %v1389_v41  ;;  %v1399_v53 = vrot.slane %v12061_v35, 2  ;;  %v1401_v41 = vrot.slane %v11831_v13, 2 }
  0x96   : > { %10227 = vmatmul.mubr.msk.f32.gmra.mrb[2].mxu0 %vm625_vm6, %v12377_v38 }
  0x97   : > { %10229 = vmatprep.mubr.msk.f32.mxu0 %vm625_vm6, %v12345_v23  ;;  %v12428_v35 = vsel %vm1375_vm8, %v1401_v41, %v1402_v37  ;;  %v1412_v41 = vrot.slane %v11878_v59, 2 }
  0x98   : > { %15534 = vst [vmem:[#allocation49_spill] sm:$0xff] %v12428_v35 }
  0x9a   : > { %10230 = vmatmul.mubr.msk.f32.gmra.mrb[4].mxu0 %vm625_vm6, %v12359_v42 }
  0x9b   : > { %10232 = vmatprep.mubr.msk.f32.mxu0 %vm625_vm6, %v12389_v2  ;;  %v12411_v2 = vsel %vm1375_vm8, %v1392_v39, %v1394_v40  ;;  %v1404_v40 = vrot.slane %v12098_v8, 2  ;;  %v1406_v39 = vrot.slane %v11846_v31, 2 }
  0x9d   : > { %v12441_v8 = vsel %vm1375_vm8, %v1406_v39, %v1407_v60  ;;  %v1417_v39 = vrot.slane %v11897_v33, 2 }
  0x9e   : > { %10233 = vmatmul.mubr.msk.f32.gmra.mrb[6].mxu0 %vm625_vm6, %v12398_v11  ;;  %15535 = vst [vmem:[#allocation50_spill] sm:$0xff] %v12441_v8 }
  0x9f   : > { %10235 = vmatprep.mubr.msk.f32.mxu0 %vm625_vm6, %v12402_v28  ;;  %v12424_v28 = vsel %vm1375_vm8, %v1397_v25, %v1399_v53  ;;  %v1409_v25 = vrot.slane %v12136_v14, 2  ;;  %v1411_v53 = vrot.slane %v11870_v57, 2 }
  0xa1   : > { %v12454_v14 = vsel %vm1375_vm8, %v1411_v53, %v1412_v41  ;;  %v1422_v53 = vrot.slane %v11917_v7, 2 }
  0xa2   : > { %10236 = vmatmul.mubr.msk.f32.gmra.mrb[8].mxu0 %vm625_vm6, %v12411_v2  ;;  %15536 = vst [vmem:[#allocation51_spill] sm:$0xff] %v12454_v14 }
  0xa3   : > { %10238 = vmatprep.mubr.msk.f32.mxu0 %vm625_vm6, %v12415_v5  ;;  %v12437_v5 = vsel %vm1375_vm8, %v1402_v37, %v1404_v40  ;;  %v1414_v37 = vrot.slane %v12171_v32, 2  ;;  %v1416_v40 = vrot.slane %v11890_v26, 2 }
  0xa5   : > { %v12467_v32 = vsel %vm1375_vm8, %v1416_v40, %v1417_v39  ;;  %v1427_v40 = vrot.slane %v11936_v3, 2 }
  0xa6   : > { %10239 = vmatmul.mubr.msk.f32.gmra.mrb[10].mxu0 %vm625_vm6, %v12424_v28  ;;  %15537 = vst [vmem:[#allocation52_spill] sm:$0xff] %v12467_v32 }
  0xa7   : > { %10241 = vmatprep.mubr.msk.f32.mxu0 %vm625_vm6, %v12428_v35  ;;  %v12450_v35 = vsel %vm1375_vm8, %v1407_v60, %v1409_v25  ;;  %v1419_v60 = vrot.slane %v12199_v29, 2  ;;  %v1421_v25 = vrot.slane %v11905_v49, 2 }
  0xa9   : > { %v12480_v29 = vsel %vm1375_vm8, %v1421_v25, %v1422_v53  ;;  %v1432_v25 = vrot.slane %v11954_v62, 2 }
  0xaa   : > { %10242 = vmatmul.mubr.msk.f32.gmra.mrb[12].mxu0 %vm625_vm6, %v12437_v5  ;;  %15538 = vst [vmem:[#allocation53_spill] sm:$0xff] %v12480_v29 }
  0xab   : > { %10244 = vmatprep.mubr.msk.f32.mxu0 %vm625_vm6, %v12441_v8  ;;  %v12463_v8 = vsel %vm1375_vm8, %v1412_v41, %v1414_v37  ;;  %v1424_v41 = vrot.slane %v12218_v51, 2  ;;  %v1426_v37 = vrot.slane %v11926_v58, 2 }
  0xad   : > { %v12493_v51 = vsel %vm1375_vm8, %v1426_v37, %v1427_v40  ;;  %v1437_v37 = vrot.slane %v12000_v16, 2 }
  0xae   : > { %10245 = vmatmul.mubr.msk.f32.gmra.mrb[14].mxu0 %vm625_vm6, %v12450_v35  ;;  %15540 = vst [vmem:[#allocation55_spill] sm:$0xff] %v12493_v51 }
  0xaf   : > { %10247 = vmatprep.mubr.msk.f32.mxu0 %vm625_vm6, %v12454_v14  ;;  %v12476_v14 = vsel %vm1375_vm8, %v1417_v39, %v1419_v60  ;;  %v1429_v39 = vrot.slane %v12237_v22, 2  ;;  %v1431_v60 = vrot.slane %v11946_v47, 2 }
  0xb1   : > { %v12506_v22 = vsel %vm1375_vm8, %v1431_v60, %v1432_v25  ;;  %v1442_v60 = vrot.slane %v12144_v61, 2 }
  0xb2   : > { %10248 = vmatmul.mubr.msk.f32.gmra.mrb[16].mxu0 %vm625_vm6, %v12463_v8  ;;  %15541 = vst [vmem:[#allocation56_spill] sm:$0xff] %v12506_v22 }
  0xb3   : > { %10250 = vmatprep.mubr.msk.f32.mxu0 %vm625_vm6, %v12467_v32  ;;  %v12489_v32 = vsel %vm1375_vm8, %v1422_v53, %v1424_v41  ;;  %v1434_v53 = vrot.slane %v12256_v21, 2  ;;  %v1436_v41 = vrot.slane %v11981_v36, 2 }
  0xb4   : > { %15539 = vst [vmem:[#allocation54_spill] sm:$0xff] %v12489_v32 }
  0xb5   : > { %v12519_v21 = vsel %vm1375_vm8, %v1436_v41, %v1437_v37  ;;  %v1447_v41 = vrot.slane %v12178_v34, 2 }
  0xb6   : > { %10251 = vmatmul.mubr.msk.f32.gmra.mrb[18].mxu0 %vm625_vm6, %v12476_v14  ;;  %15543 = vst [vmem:[#allocation58_spill] sm:$0xff] %v12519_v21 }
  0xb7   : > { %10253 = vmatprep.mubr.msk.f32.mxu0 %vm625_vm6, %v12480_v29  ;;  %v12502_v29 = vsel %vm1375_vm8, %v1427_v40, %v1429_v39  ;;  %v1439_v40 = vrot.slane %v12274_v48, 2  ;;  %v1441_v39 = vrot.slane %v12139_v4, 2 }
  0xb9   : > { %v12532_v48 = vsel %vm1375_vm8, %v1441_v39, %v1442_v60 }
  0xba   : > { %10254 = vmatmul.mubr.msk.f32.gmra.mrb[20].mxu0 %vm625_vm6, %v12489_v32  ;;  %15544 = vst [vmem:[#allocation59_spill] sm:$0xff] %v12532_v48 }
  0xbb   : > { %10256 = vmatprep.mubr.msk.f32.mxu0 %vm625_vm6, %v12493_v51  ;;  %v12515_v51 = vsel %vm1375_vm8, %v1432_v25, %v1434_v53  ;;  %v1444_v25 = vrot.slane %v12293_v56, 2  ;;  %v1446_v53 = vrot.slane %v12161_v17, 2 }
  0xbc   : > { %15542 = vst [vmem:[#allocation57_spill] sm:$0xff] %v12515_v51 }
  0xbd   : > { %v12545_v56 = vsel %vm1375_vm8, %v1446_v53, %v1447_v41 }
  0xbe   : > { %10257 = vmatmul.mubr.msk.f32.gmra.mrb[22].mxu0 %vm625_vm6, %v12502_v29 }
  0xbf   : > { %10259 = vmatprep.mubr.msk.f32.mxu0 %vm625_vm6, %v12506_v22  ;;  %v12528_v22 = vsel %vm1375_vm8, %v1437_v37, %v1439_v40  ;;  %v1449_v37 = vrot.slane %v12312_v20, 2  ;;  %v9062_v20 = vld [vmem:[%s15229_s1 + $0x14] sm:$0xf] }
  0xc1   : > { %v12552_v40 = vsel %vm1375_vm8, %v1447_v41, %v1449_v37  ;;  %v9096_v37 = vld [vmem:[%s15229_s1 + $0x18] sm:$0xf] }
  0xc2   : > { %10260 = vmatmul.mubr.msk.f32.gmra.mrb[24].mxu0 %vm625_vm6, %v12515_v51 }
  0xc3   : > { %10262 = vmatprep.mubr.msk.f32.mxu0 %vm625_vm6, %v12519_v21  ;;  %v12541_v21 = vsel %vm1375_vm8, %v1442_v60, %v1444_v25 }
  0xc6   : > { %10263 = vmatmul.mubr.msk.f32.gmra.mrb[26].mxu0 %vm625_vm6, %v12528_v22 }
  0xc7   : > { %10265 = vmatprep.mubr.msk.f32.mxu0 %vm625_vm6, %v12532_v48 }
  0xca   : > { %10266 = vmatmul.mubr.msk.f32.gmra.mrb[28].mxu0 %vm625_vm6, %v12541_v21 }
  0xcb   : > { %10268 = vmatprep.mubr.msk.f32.mxu0 %vm625_vm6, %v12545_v56 }
  0xce   : > { %10269 = vmatmul.mubr.msk.f32.gmra.mrb[30].mxu0 %vm625_vm6, %v12552_v40 }
  0xcf   : > { %10273 = vmatprep.mubr.msk.f32.mxu0 %vm625_vm6, %v11745_v24  ;;  %v373_v24 = vmul.f32 0.2, %v12330_v55 }
  0xd2   : > { %10274 = vmatmul.mubr.msk.f32.vlgmr.msra.gmra.mrb[0].mxu0 %vm625_vm6, %v11756_v27  ;;  %v374_v27 = vmul.f32 0.2, %v12348_v12 }
  0xd3   : > { %10322 = vmatpush3.msk.msra.mxu0 %vm701_vm0, %v12368_v63  ;;  %10276 = vmatprep.mubr.msk.f32.mxu0 %vm625_vm6, %v11727_v18  ;;  %v405_v63 = vsel %vm341_vm9, %v12330_v55, %v373_v24  ;;  %v15546_v24 = vld [vmem:[#allocation19_spill] sm:$0xff] }
  0xd4   : > { %10371 = vmatprep.subr.msk.mxu0 %vm701_vm0, %v9062_v20  ;;  %v438_v39 = vrot.slane %v405_v63, 1  ;;  %v517_v60 = vrot.slane %v405_v63, 7  ;;  %v406_v25 = vsel %vm342_vm10, %v12348_v12, %v374_v27  ;;  %v15545_v12 = vld [vmem:[#allocation18_spill] sm:$0xff]  ;;  %v15547_v27 = vld [vmem:[#allocation16_spill] sm:$0xff]  ;;  %v15548_v63 = vld [vmem:[#allocation17_spill] sm:$0xff] }
  0xd5   : > { %v518_v53 = vrot.slane %v406_v25, 7 }
  0xd6   : > { %10277 = vmatmul.mubr.msk.f32.gmra.mrb[2].mxu0 %vm625_vm6, %v11732_v19  ;;  %v12627_v55 = vsel %vm471_vm3, %v438_v39, %v517_v60  ;;  %v15549_v39 = vld [vmem:[#allocation20_spill] sm:$0xff] }
  0xd7   : > { %10279 = vmatprep.mubr.msk.f32.mxu0 %vm625_vm6, %v11779_v44  ;;  %v12634_v41 = vsel %vm471_vm3, %v517_v60, %v518_v53  ;;  %v15550_v60 = vld [vmem:[#allocation21_spill] sm:$0xff] }
  0xda   : > { %10280 = vmatmul.mubr.msk.f32.gmra.mrb[4].mxu0 %vm625_vm6, %v11784_v45 }
  0xdb   : > { %10282 = vmatprep.mubr.msk.f32.mxu0 %vm625_vm6, %v11793_v50 }
  0xde   : > { %10283 = vmatmul.mubr.msk.f32.gmra.mrb[6].mxu0 %vm625_vm6, %v11801_v52 }
  0xdf   : > { %10285 = vmatprep.mubr.msk.f32.mxu0 %vm625_vm6, %v11812_v0 }
  0xe2   : > { %10286 = vmatmul.mubr.msk.f32.gmra.mrb[8].mxu0 %vm625_vm6, %v11817_v1 }
  0xe3   : > { %10288 = vmatprep.mubr.msk.f32.mxu0 %vm625_vm6, %v11831_v13 }
  0xe6   : > { %10289 = vmatmul.mubr.msk.f32.gmra.mrb[10].mxu0 %vm625_vm6, %v11841_v30 }
  0xe7   : > { %10291 = vmatprep.mubr.msk.f32.mxu0 %vm625_vm6, %v11846_v31 }
  0xea   : > { %10292 = vmatmul.mubr.msk.f32.gmra.mrb[12].mxu0 %vm625_vm6, %v11860_v46 }
  0xeb   : > { %10294 = vmatprep.mubr.msk.f32.mxu0 %vm625_vm6, %v11870_v57 }
  0xee   : > { %10295 = vmatmul.mubr.msk.f32.gmra.mrb[14].mxu0 %vm625_vm6, %v11878_v59 }
  0xef   : > { %10297 = vmatprep.mubr.msk.f32.mxu0 %vm625_vm6, %v11890_v26 }
  0xf2   : > { %10298 = vmatmul.mubr.msk.f32.gmra.mrb[16].mxu0 %vm625_vm6, %v11897_v33 }
  0xf3   : > { %10300 = vmatprep.mubr.msk.f32.mxu0 %vm625_vm6, %v11905_v49 }
  0xf6   : > { %10301 = vmatmul.mubr.msk.f32.gmra.mrb[18].mxu0 %vm625_vm6, %v11917_v7 }
  0xf7   : > { %10303 = vmatprep.mubr.msk.f32.mxu0 %vm625_vm6, %v11926_v58 }
  0xfa   : > { %10304 = vmatmul.mubr.msk.f32.gmra.mrb[20].mxu0 %vm625_vm6, %v11936_v3 }
  0xfb   : > { %10306 = vmatprep.mubr.msk.f32.mxu0 %vm625_vm6, %v11946_v47 }
  0xfe   : > { %10307 = vmatmul.mubr.msk.f32.gmra.mrb[22].mxu0 %vm625_vm6, %v11954_v62 }
  0xff   : > { %10309 = vmatprep.mubr.msk.f32.mxu0 %vm625_vm6, %v11981_v36 }
 0x102   : > { %10310 = vmatmul.mubr.msk.f32.gmra.mrb[24].mxu0 %vm625_vm6, %v12000_v16 }
 0x103   : > { %10312 = vmatprep.mubr.msk.f32.mxu0 %vm625_vm6, %v12139_v4 }
 0x106   : > { %10313 = vmatmul.mubr.msk.f32.gmra.mrb[26].mxu0 %vm625_vm6, %v12144_v61 }
 0x107   : > { %10315 = vmatprep.mubr.msk.f32.mxu0 %vm625_vm6, %v12161_v17 }
 0x10a   : > { %10316 = vmatmul.mubr.msk.f32.gmra.mrb[28].mxu0 %vm625_vm6, %v12178_v34 }
 0x10b   : > { %10318 = vmatprep.mubr.msk.f32.mxu0 %vm625_vm6, %v12627_v55 }
 0x10e   : > { %10319 = vmatmul.mubr.msk.f32.gmra.mrb[30].mxu0 %vm625_vm6, %v12634_v41 }
 0x10f   : > { %10323 = vmatprep.mubr.msk.f32.mxu0 %vm625_vm6, %v15545_v12  ;;  %v15551_v12 = vld [vmem:[#allocation22_spill] sm:$0xff] }
 0x112   : > { %10324 = vmatmul.mubr.msk.f32.vlgmr.msra.gmra.mrb[0].mxu0 %vm625_vm6, %v15546_v24  ;;  %v15552_v24 = vld [vmem:[#allocation24_spill] sm:$0xff] }
 0x113   : > { %10372 = vmatpush3.msk.msra.mxu0 %vm701_vm0, %v9062_v20  ;;  %10326 = vmatprep.mubr.msk.f32.mxu0 %vm625_vm6, %v15547_v27  ;;  %v15553_v20 = vld [vmem:[#allocation23_spill] sm:$0xff] }
 0x114   : > { %10421 = vmatprep.subr.msk.mxu0 %vm701_vm0, %v9096_v37 }
 0x116   : > { %10327 = vmatmul.mubr.msk.f32.gmra.mrb[2].mxu0 %vm625_vm6, %v15548_v63  ;;  %v15554_v63 = vld [vmem:[#allocation27_spill] sm:$0xff] }
 0x117   : > { %10329 = vmatprep.mubr.msk.f32.mxu0 %vm625_vm6, %v15549_v39  ;;  %v15555_v39 = vld [vmem:[#allocation28_spill] sm:$0xff] }
 0x11a   : > { %10330 = vmatmul.mubr.msk.f32.gmra.mrb[4].mxu0 %vm625_vm6, %v15550_v60  ;;  %v15556_v60 = vld [vmem:[#allocation29_spill] sm:$0xff] }
 0x11b   : > { %10332 = vmatprep.mubr.msk.f32.mxu0 %vm625_vm6, %v15551_v12  ;;  %v15557_v12 = vld [vmem:[#allocation30_spill] sm:$0xff] }
 0x11e   : > { %10333 = vmatmul.mubr.msk.f32.gmra.mrb[6].mxu0 %vm625_vm6, %v15552_v24  ;;  %v15558_v24 = vld [vmem:[#allocation31_spill] sm:$0xff] }
 0x11f   : > { %10335 = vmatprep.mubr.msk.f32.mxu0 %vm625_vm6, %v15553_v20  ;;  %v15559_v20 = vld [vmem:[#allocation32_spill] sm:$0xff] }
 0x122   : > { %10336 = vmatmul.mubr.msk.f32.gmra.mrb[8].mxu0 %vm625_vm6, %v12119_v54  ;;  %v15560_v54 = vld [vmem:[#allocation33_spill] sm:$0xff] }
 0x123   : > { %10338 = vmatprep.mubr.msk.f32.mxu0 %vm625_vm6, %v12131_v43  ;;  %v15561_v43 = vld [vmem:[#allocation34_spill] sm:$0xff] }
 0x126   : > { %10339 = vmatmul.mubr.msk.f32.gmra.mrb[10].mxu0 %vm625_vm6, %v15554_v63  ;;  %v15562_v63 = vld [vmem:[#allocation35_spill] sm:$0xff] }
 0x127   : > { %10341 = vmatprep.mubr.msk.f32.mxu0 %vm625_vm6, %v15555_v39  ;;  %v15563_v39 = vld [vmem:[#allocation36_spill] sm:$0xff] }
 0x12a   : > { %10342 = vmatmul.mubr.msk.f32.gmra.mrb[12].mxu0 %vm625_vm6, %v15556_v60  ;;  %v15564_v60 = vld [vmem:[#allocation37_spill] sm:$0xff] }
 0x12b   : > { %10344 = vmatprep.mubr.msk.f32.mxu0 %vm625_vm6, %v15557_v12 }
 0x12e   : > { %10345 = vmatmul.mubr.msk.f32.gmra.mrb[14].mxu0 %vm625_vm6, %v15558_v24  ;;  %v15565_v24 = vld [vmem:[#allocation39_spill] sm:$0xff] }
 0x12f   : > { %10347 = vmatprep.mubr.msk.f32.mxu0 %vm625_vm6, %v15559_v20  ;;  %v15566_v20 = vld [vmem:[#allocation40_spill] sm:$0xff] }
 0x132   : > { %10348 = vmatmul.mubr.msk.f32.gmra.mrb[16].mxu0 %vm625_vm6, %v15560_v54  ;;  %v567_v54 = vrot.slane %v406_v25, 5 }
 0x133   : > { %10350 = vmatprep.mubr.msk.f32.mxu0 %vm625_vm6, %v15561_v43  ;;  %v15567_v43 = vld [vmem:[#allocation41_spill] sm:$0xff] }
 0x134   : > { %v615_v12 = vsel %vm471_vm3, %v518_v53, %v567_v54  ;;  %v9130_v54 = vld [vmem:[%s15229_s1 + $0x1c] sm:$0xf]  ;;  %v15570_v53 = vld [vmem:[#allocation46_spill] sm:$0xff] }
 0x136   : > { %10351 = vmatmul.mubr.msk.f32.gmra.mrb[18].mxu0 %vm625_vm6, %v15562_v63  ;;  %v15568_v63 = vld [vmem:[#allocation42_spill] sm:$0xff] }
 0x137   : > { %10353 = vmatprep.mubr.msk.f32.mxu0 %vm625_vm6, %v15563_v39  ;;  %v2041_v39 = vrot.slane %v12627_v55, 1 }
 0x13a   : > { %10354 = vmatmul.mubr.msk.f32.gmra.mrb[20].mxu0 %vm625_vm6, %v15564_v60  ;;  %v2042_v60 = vrot.slane %v12634_v41, 1 }
 0x13b   : > { %10356 = vmatprep.mubr.msk.f32.mxu0 %vm625_vm6, %v12269_v9  ;;  %v15569_v9 = vld [vmem:[#allocation43_spill] sm:$0xff] }
 0x13c   : > { %v12705_v25 = vsel %vm977_vm1, %v2041_v39, %v2042_v60  ;;  %v15574_v39 = vld [vmem:[#allocation50_spill] sm:$0xff] }
 0x13e   : > { %10357 = vmatmul.mubr.msk.f32.gmra.mrb[22].mxu0 %vm625_vm6, %v15565_v24 }
 0x13f   : > { %10359 = vmatprep.mubr.msk.f32.mxu0 %vm625_vm6, %v15566_v20  ;;  %v2044_v20 = vrot.slane %v615_v12, 1 }
 0x142   : > { %10360 = vmatmul.mubr.msk.f32.gmra.mrb[24].mxu0 %vm625_vm6, %v15567_v43 }
 0x143   : > { %10362 = vmatprep.mubr.msk.f32.mxu0 %vm625_vm6, %v15568_v63  ;;  %v12712_v63 = vsel %vm977_vm1, %v2042_v60, %v2044_v20  ;;  %v15575_v60 = vld [vmem:[#allocation51_spill] sm:$0xff]  ;;  %v15576_v20 = vld [vmem:[#allocation52_spill] sm:$0xff] }
 0x146   : > { %10363 = vmatmul.mubr.msk.f32.gmra.mrb[26].mxu0 %vm625_vm6, %v15569_v9 }
 0x147   : > { %10365 = vmatprep.mubr.msk.f32.mxu0 %vm625_vm6, %v12323_v15 }
 0x14a   : > { %10366 = vmatmul.mubr.msk.f32.gmra.mrb[28].mxu0 %vm625_vm6, %v12335_v10 }
 0x14b   : > { %10368 = vmatprep.mubr.msk.f32.mxu0 %vm625_vm6, %v12705_v25 }
 0x14e   : > { %10369 = vmatmul.mubr.msk.f32.gmra.mrb[30].mxu0 %vm625_vm6, %v12712_v63 }
 0x14f   : > { %10373 = vmatprep.mubr.msk.f32.mxu0 %vm625_vm6, %v12363_v6  ;;  %v15571_v6 = vld [vmem:[#allocation47_spill] sm:$0xff] }
 0x152   : > { %10374 = vmatmul.mubr.msk.f32.vlgmr.msra.gmra.mrb[0].mxu0 %vm625_vm6, %v12377_v38  ;;  %v15572_v38 = vld [vmem:[#allocation48_spill] sm:$0xff] }
 0x153   : > { %10422 = vmatpush3.msk.msra.mxu0 %vm701_vm0, %v9096_v37  ;;  %10376 = vmatprep.mubr.msk.f32.mxu0 %vm625_vm6, %v12345_v23  ;;  %v15573_v37 = vld [vmem:[#allocation49_spill] sm:$0xff] }
 0x154   : > { %10471 = vmatprep.subr.msk.mxu0 %vm701_vm0, %v9130_v54 }
 0x156   : > { %10377 = vmatmul.mubr.msk.f32.gmra.mrb[2].mxu0 %vm625_vm6, %v12359_v42 }
 0x157   : > { %10379 = vmatprep.mubr.msk.f32.mxu0 %vm625_vm6, %v15570_v53 }
 0x15a   : > { %10380 = vmatmul.mubr.msk.f32.gmra.mrb[4].mxu0 %vm625_vm6, %v12398_v11 }
 0x15b   : > { %10382 = vmatprep.mubr.msk.f32.mxu0 %vm625_vm6, %v15571_v6 }
 0x15e   : > { %10383 = vmatmul.mubr.msk.f32.gmra.mrb[6].mxu0 %vm625_vm6, %v12411_v2 }
 0x15f   : > { %10385 = vmatprep.mubr.msk.f32.mxu0 %vm625_vm6, %v15572_v38 }
 0x162   : > { %10386 = vmatmul.mubr.msk.f32.gmra.mrb[8].mxu0 %vm625_vm6, %v12424_v28 }
 0x163   : > { %10388 = vmatprep.mubr.msk.f32.mxu0 %vm625_vm6, %v15573_v37  ;;  %v15577_v37 = vld [vmem:[#allocation53_spill] sm:$0xff] }
 0x166   : > { %10389 = vmatmul.mubr.msk.f32.gmra.mrb[10].mxu0 %vm625_vm6, %v12437_v5 }
 0x167   : > { %10391 = vmatprep.mubr.msk.f32.mxu0 %vm625_vm6, %v15574_v39  ;;  %v15578_v39 = vld [vmem:[#allocation55_spill] sm:$0xff] }
 0x16a   : > { %10392 = vmatmul.mubr.msk.f32.gmra.mrb[12].mxu0 %vm625_vm6, %v12450_v35 }
 0x16b   : > { %10394 = vmatprep.mubr.msk.f32.mxu0 %vm625_vm6, %v15575_v60  ;;  %v15579_v60 = vld [vmem:[#allocation56_spill] sm:$0xff] }
 0x16e   : > { %10395 = vmatmul.mubr.msk.f32.gmra.mrb[14].mxu0 %vm625_vm6, %v12463_v8 }
 0x16f   : > { %10397 = vmatprep.mubr.msk.f32.mxu0 %vm625_vm6, %v15576_v20  ;;  %v15580_v20 = vld [vmem:[#allocation58_spill] sm:$0xff] }
 0x172   : > { %10398 = vmatmul.mubr.msk.f32.gmra.mrb[16].mxu0 %vm625_vm6, %v12476_v14 }
 0x173   : > { %10400 = vmatprep.mubr.msk.f32.mxu0 %vm625_vm6, %v15577_v37 }
 0x176   : > { %10401 = vmatmul.mubr.msk.f32.gmra.mrb[18].mxu0 %vm625_vm6, %v12489_v32  ;;  %v2313_v32 = vrot.slane %v12634_v41, 2 }
 0x177   : > { %10403 = vmatprep.mubr.msk.f32.mxu0 %vm625_vm6, %v15578_v39  ;;  %v2312_v39 = vrot.slane %v12627_v55, 2 }
 0x17a   : > { %10404 = vmatmul.mubr.msk.f32.gmra.mrb[20].mxu0 %vm625_vm6, %v12502_v29 }
 0x17b   : > { %10406 = vmatprep.mubr.msk.f32.mxu0 %vm625_vm6, %v15579_v60  ;;  %v12782_v60 = vsel %vm1375_vm8, %v2312_v39, %v2313_v32 }
 0x17e   : > { %10407 = vmatmul.mubr.msk.f32.gmra.mrb[22].mxu0 %vm625_vm6, %v12515_v51  ;;  %v2315_v51 = vrot.slane %v615_v12, 2  ;;  %v9164_v12 = vld [vmem:[%s15229_s1 + $0x20] sm:$0xf] }
 0x17f   : > { %10409 = vmatprep.mubr.msk.f32.mxu0 %vm625_vm6, %v15580_v20 }
 0x182   : > { %10410 = vmatmul.mubr.msk.f32.gmra.mrb[24].mxu0 %vm625_vm6, %v12528_v22 }
 0x183   : > { %10412 = vmatprep.mubr.msk.f32.mxu0 %vm625_vm6, %v12532_v48  ;;  %v12789_v48 = vsel %vm1375_vm8, %v2313_v32, %v2315_v51 }
 0x186   : > { %10413 = vmatmul.mubr.msk.f32.gmra.mrb[26].mxu0 %vm625_vm6, %v12541_v21 }
 0x187   : > { %10415 = vmatprep.mubr.msk.f32.mxu0 %vm625_vm6, %v12545_v56 }
 0x18a   : > { %10416 = vmatmul.mubr.msk.f32.gmra.mrb[28].mxu0 %vm625_vm6, %v12552_v40 }
 0x18b   : > { %10418 = vmatprep.mubr.msk.f32.mxu0 %vm625_vm6, %v12782_v60 }
 0x18e   : > { %10419 = vmatmul.mubr.msk.f32.gmra.mrb[30].mxu0 %vm625_vm6, %v12789_v48 }
 0x18f   : > { %10423 = vmatprep.mubr.msk.f32.mxu0 %vm625_vm6, %v11727_v18  ;;  %v15581_v18 = vld [vmem:[#allocation17_spill] sm:$0xff] }
 0x192   : > { %10424 = vmatmul.mubr.msk.f32.vlgmr.msra.gmra.mrb[0].mxu0 %vm625_vm6, %v11732_v19  ;;  %v15582_v19 = vld [vmem:[#allocation20_spill] sm:$0xff] }
 0x193   : > { %10472 = vmatpush3.msk.msra.mxu0 %vm701_vm0, %v9130_v54  ;;  %10426 = vmatprep.mubr.msk.f32.mxu0 %vm625_vm6, %v11779_v44  ;;  %v15583_v44 = vld [vmem:[#allocation21_spill] sm:$0xff] }
 0x194   : > { %10521 = vmatprep.subr.msk.mxu0 %vm701_vm0, %v9164_v12 }
 0x196   : > { %10427 = vmatmul.mubr.msk.f32.gmra.mrb[2].mxu0 %vm625_vm6, %v11784_v45  ;;  %v15584_v45 = vld [vmem:[#allocation22_spill] sm:$0xff] }
 0x197   : > { %10429 = vmatprep.mubr.msk.f32.mxu0 %vm625_vm6, %v11793_v50  ;;  %v15585_v50 = vld [vmem:[#allocation24_spill] sm:$0xff] }
 0x19a   : > { %10430 = vmatmul.mubr.msk.f32.gmra.mrb[4].mxu0 %vm625_vm6, %v11801_v52  ;;  %v15586_v52 = vld [vmem:[#allocation23_spill] sm:$0xff] }
 0x19b   : > { %10432 = vmatprep.mubr.msk.f32.mxu0 %vm625_vm6, %v11812_v0  ;;  %v15587_v0 = vld [vmem:[#allocation25_spill] sm:$0xff] }
 0x19e   : > { %10433 = vmatmul.mubr.msk.f32.gmra.mrb[6].mxu0 %vm625_vm6, %v11817_v1  ;;  %v15588_v1 = vld [vmem:[#allocation26_spill] sm:$0xff] }
 0x19f   : > { %10435 = vmatprep.mubr.msk.f32.mxu0 %vm625_vm6, %v11831_v13  ;;  %v15589_v13 = vld [vmem:[#allocation27_spill] sm:$0xff] }
 0x1a2   : > { %10436 = vmatmul.mubr.msk.f32.gmra.mrb[8].mxu0 %vm625_vm6, %v11841_v30  ;;  %v15590_v30 = vld [vmem:[#allocation28_spill] sm:$0xff] }
 0x1a3   : > { %10438 = vmatprep.mubr.msk.f32.mxu0 %vm625_vm6, %v11846_v31  ;;  %v15591_v31 = vld [vmem:[#allocation29_spill] sm:$0xff] }
 0x1a6   : > { %10439 = vmatmul.mubr.msk.f32.gmra.mrb[10].mxu0 %vm625_vm6, %v11860_v46  ;;  %v15592_v46 = vld [vmem:[#allocation30_spill] sm:$0xff] }
 0x1a7   : > { %10441 = vmatprep.mubr.msk.f32.mxu0 %vm625_vm6, %v11870_v57  ;;  %v15593_v57 = vld [vmem:[#allocation31_spill] sm:$0xff] }
 0x1aa   : > { %10442 = vmatmul.mubr.msk.f32.gmra.mrb[12].mxu0 %vm625_vm6, %v11878_v59  ;;  %v15594_v59 = vld [vmem:[#allocation32_spill] sm:$0xff] }
 0x1ab   : > { %10444 = vmatprep.mubr.msk.f32.mxu0 %vm625_vm6, %v11890_v26  ;;  %v15595_v26 = vld [vmem:[#allocation33_spill] sm:$0xff] }
 0x1ae   : > { %10445 = vmatmul.mubr.msk.f32.gmra.mrb[14].mxu0 %vm625_vm6, %v11897_v33  ;;  %v15596_v33 = vld [vmem:[#allocation34_spill] sm:$0xff] }
 0x1af   : > { %10447 = vmatprep.mubr.msk.f32.mxu0 %vm625_vm6, %v11905_v49  ;;  %v15597_v49 = vld [vmem:[#allocation35_spill] sm:$0xff] }
 0x1b2   : > { %10448 = vmatmul.mubr.msk.f32.gmra.mrb[16].mxu0 %vm625_vm6, %v11917_v7  ;;  %v15598_v7 = vld [vmem:[#allocation36_spill] sm:$0xff] }
 0x1b3   : > { %10450 = vmatprep.mubr.msk.f32.mxu0 %vm625_vm6, %v11926_v58  ;;  %v15599_v58 = vld [vmem:[#allocation37_spill] sm:$0xff] }
 0x1b6   : > { %10451 = vmatmul.mubr.msk.f32.gmra.mrb[18].mxu0 %vm625_vm6, %v11936_v3  ;;  %v15600_v3 = vld [vmem:[#allocation38_spill] sm:$0xff] }
 0x1b7   : > { %10453 = vmatprep.mubr.msk.f32.mxu0 %vm625_vm6, %v11946_v47  ;;  %v15601_v47 = vld [vmem:[#allocation40_spill] sm:$0xff] }
 0x1ba   : > { %10454 = vmatmul.mubr.msk.f32.gmra.mrb[20].mxu0 %vm625_vm6, %v11954_v62  ;;  %v15602_v62 = vld [vmem:[#allocation42_spill] sm:$0xff] }
 0x1bb   : > { %10456 = vmatprep.mubr.msk.f32.mxu0 %vm625_vm6, %v11981_v36  ;;  %v15603_v36 = vld [vmem:[#allocation49_spill] sm:$0xff] }
 0x1be   : > { %10457 = vmatmul.mubr.msk.f32.gmra.mrb[22].mxu0 %vm625_vm6, %v12000_v16  ;;  %v15604_v16 = vld [vmem:[#allocation50_spill] sm:$0xff] }
 0x1bf   : > { %10459 = vmatprep.mubr.msk.f32.mxu0 %vm625_vm6, %v12139_v4  ;;  %v15606_v4 = vld [vmem:[#allocation52_spill] sm:$0xff] }
 0x1c2   : > { %10460 = vmatmul.mubr.msk.f32.gmra.mrb[24].mxu0 %vm625_vm6, %v12144_v61  ;;  %v15607_v61 = vld [vmem:[#allocation54_spill] sm:$0xff] }
 0x1c3   : > { %10462 = vmatprep.mubr.msk.f32.mxu0 %vm625_vm6, %v12161_v17 }
 0x1c6   : > { %10463 = vmatmul.mubr.msk.f32.gmra.mrb[26].mxu0 %vm625_vm6, %v12178_v34 }
 0x1c7   : > { %10465 = vmatprep.mubr.msk.f32.mxu0 %vm625_vm6, %v12627_v55 }
 0x1ca   : > { %10466 = vmatmul.mubr.msk.f32.gmra.mrb[28].mxu0 %vm625_vm6, %v12634_v41 }
 0x1cb   : > { %10468 = vmatprep.mubr.msk.f32.mxu0 %vm625_vm6, %v12161_v17  ;;  %v15608_v17 = vld [vmem:[#allocation55_spill] sm:$0xff] }
 0x1ce   : > { %10469 = vmatmul.mubr.msk.f32.gmra.mrb[30].mxu0 %vm625_vm6, %v12178_v34  ;;  %v15609_v34 = vld [vmem:[#allocation56_spill] sm:$0xff] }
 0x1cf   : > { %10473 = vmatprep.mubr.msk.f32.mxu0 %vm625_vm6, %v15547_v27 }
 0x1d2   : > { %10474 = vmatmul.mubr.msk.f32.vlgmr.msra.gmra.mrb[0].mxu0 %vm625_vm6, %v15581_v18 }
 0x1d3   : > { %10522 = vmatpush3.msk.msra.mxu0 %vm701_vm0, %v9164_v12  ;;  %10476 = vmatprep.mubr.msk.f32.mxu0 %vm625_vm6, %v15582_v19 }
 0x1d6   : > { %10477 = vmatmul.mubr.msk.f32.gmra.mrb[2].mxu0 %vm625_vm6, %v15583_v44 }
 0x1d7   : > { %10479 = vmatprep.mubr.msk.f32.mxu0 %vm625_vm6, %v15584_v45 }
 0x1da   : > { %10480 = vmatmul.mubr.msk.f32.gmra.mrb[4].mxu0 %vm625_vm6, %v15585_v50 }
 0x1db   : > { %10482 = vmatprep.mubr.msk.f32.mxu0 %vm625_vm6, %v15586_v52 }
 0x1de   : > { %10483 = vmatmul.mubr.msk.f32.gmra.mrb[6].mxu0 %vm625_vm6, %v15587_v0 }
 0x1df   : > { %10485 = vmatprep.mubr.msk.f32.mxu0 %vm625_vm6, %v15588_v1 }
 0x1e2   : > { %10486 = vmatmul.mubr.msk.f32.gmra.mrb[8].mxu0 %vm625_vm6, %v15589_v13 }
 0x1e3   : > { %10488 = vmatprep.mubr.msk.f32.mxu0 %vm625_vm6, %v15590_v30 }
 0x1e6   : > { %10489 = vmatmul.mubr.msk.f32.gmra.mrb[10].mxu0 %vm625_vm6, %v15591_v31 }
 0x1e7   : > { %10491 = vmatprep.mubr.msk.f32.mxu0 %vm625_vm6, %v15592_v46 }
 0x1ea   : > { %10492 = vmatmul.mubr.msk.f32.gmra.mrb[12].mxu0 %vm625_vm6, %v15593_v57 }
 0x1eb   : > { %10494 = vmatprep.mubr.msk.f32.mxu0 %vm625_vm6, %v15594_v59 }
 0x1ee   : > { %10495 = vmatmul.mubr.msk.f32.gmra.mrb[14].mxu0 %vm625_vm6, %v15595_v26 }
 0x1ef   : > { %10497 = vmatprep.mubr.msk.f32.mxu0 %vm625_vm6, %v15596_v33 }
 0x1f2   : > { %10498 = vmatmul.mubr.msk.f32.gmra.mrb[16].mxu0 %vm625_vm6, %v15597_v49 }
 0x1f3   : > { %10500 = vmatprep.mubr.msk.f32.mxu0 %vm625_vm6, %v15598_v7 }
 0x1f6   : > { %10501 = vmatmul.mubr.msk.f32.gmra.mrb[18].mxu0 %vm625_vm6, %v15599_v58 }
 0x1f7   : > { %10503 = vmatprep.mubr.msk.f32.mxu0 %vm625_vm6, %v15600_v3 }
 0x1fa   : > { %10504 = vmatmul.mubr.msk.f32.gmra.mrb[20].mxu0 %vm625_vm6, %v15565_v24 }
 0x1fb   : > { %10506 = vmatprep.mubr.msk.f32.mxu0 %vm625_vm6, %v15601_v47 }
 0x1fe   : > { %10507 = vmatmul.mubr.msk.f32.gmra.mrb[22].mxu0 %vm625_vm6, %v15567_v43  ;;  %v15605_v43 = vld [vmem:[#allocation51_spill] sm:$0xff] }
 0x1ff   : > { %10509 = vmatprep.mubr.msk.f32.mxu0 %vm625_vm6, %v15602_v62 }
 0x202   : > { %10510 = vmatmul.mubr.msk.f32.gmra.mrb[24].mxu0 %vm625_vm6, %v15569_v9  ;;  %v15610_v9 = vld [vmem:[#allocation57_spill] sm:$0xff] }
 0x203   : > { %10512 = vmatprep.mubr.msk.f32.mxu0 %vm625_vm6, %v12323_v15 }
 0x206   : > { %10513 = vmatmul.mubr.msk.f32.gmra.mrb[26].mxu0 %vm625_vm6, %v12335_v10 }
 0x207   : > { %10515 = vmatprep.mubr.msk.f32.mxu0 %vm625_vm6, %v12705_v25 }
 0x20a   : > { %10516 = vmatmul.mubr.msk.f32.gmra.mrb[28].mxu0 %vm625_vm6, %v12712_v63 }
 0x20b   : > { %10518 = vmatprep.mubr.msk.f32.mxu0 %vm625_vm6, %v12323_v15  ;;  %v3681_v15 = vld [vmem:[%s15231_s3] sm:$0xf] }
 0x20c   : > { %10571 = vmatprep.subr.msk.mxu1 %vm701_vm0, %v3681_v15 }
 0x20d   : > { %10572 = vmatpush3.msk.msra.mxu1 %vm701_vm0, %v3681_v15 }
 0x20e   : > { %10519 = vmatmul.mubr.msk.f32.gmra.mrb[30].mxu0 %vm625_vm6, %v12335_v10  ;;  %v12999_v10 = vld [vmem:[%s15231_s3 + $0x4] sm:$0xf] }
 0x20f   : > { %10523 = vmatprep.mubr.msk.f32.mxu0 %vm625_vm6, %v12345_v23  ;;  %v15611_v23 = vld [vmem:[#allocation59_spill] sm:$0xff]  ;;  %10621 = vmatprep.subr.msk.mxu1 %vm701_vm0, %v12999_v10 }
 0x212   : > { %10524 = vmatmul.mubr.msk.f32.vlgmr.msra.gmra.mrb[0].mxu0 %vm625_vm6, %v12359_v42  ;;  %v13003_v42 = vpop.f32.mrb[0].mxu1 }
 0x213   : > { %10526 = vmatprep.mubr.msk.f32.mxu0 %vm625_vm6, %v15570_v53 }
 0x216   : > { %10527 = vmatmul.mubr.msk.f32.gmra.mrb[2].mxu0 %vm625_vm6, %v12398_v11 }
 0x217   : > { %10529 = vmatprep.mubr.msk.f32.mxu0 %vm625_vm6, %v15571_v6 }
 0x21a   : > { %10530 = vmatmul.mubr.msk.f32.gmra.mrb[4].mxu0 %vm625_vm6, %v12411_v2  ;;  %v13005_v2 = vpop.f32.mrb[1].mxu1 }
 0x21b   : > { %10532 = vmatprep.mubr.msk.f32.mxu0 %vm625_vm6, %v15572_v38  ;;  %v13007_v11 = vpop.f32.mrb[2].mxu1 }
 0x21e   : > { %10533 = vmatmul.mubr.msk.f32.gmra.mrb[6].mxu0 %vm625_vm6, %v12424_v28  ;;  %v13009_v28 = vpop.f32.mrb[3].mxu1 }
 0x21f   : > { %10535 = vmatprep.mubr.msk.f32.mxu0 %vm625_vm6, %v15603_v36 }
 0x222   : > { %10536 = vmatmul.mubr.msk.f32.gmra.mrb[8].mxu0 %vm625_vm6, %v12437_v5  ;;  %v13014_v5 = vld [vmem:[%s15230_s2] ss:$0 sm:$0xff] }
 0x223   : > { %10538 = vmatprep.mubr.msk.f32.mxu0 %vm625_vm6, %v15604_v16  ;;  %v13053_v16 = vld [vmem:[%s15231_s3 + $0x8] sm:$0xf] }
 0x226   : > { %10539 = vmatmul.mubr.msk.f32.gmra.mrb[10].mxu0 %vm625_vm6, %v12450_v35 }
 0x227   : > { %10541 = vmatprep.mubr.msk.f32.mxu0 %vm625_vm6, %v15605_v43 }
 0x22a   : > { %10542 = vmatmul.mubr.msk.f32.gmra.mrb[12].mxu0 %vm625_vm6, %v12463_v8 }
 0x22b   : > { %10544 = vmatprep.mubr.msk.f32.mxu0 %vm625_vm6, %v15606_v4 }
 0x22e   : > { %10545 = vmatmul.mubr.msk.f32.gmra.mrb[14].mxu0 %vm625_vm6, %v12476_v14 }
 0x22f   : > { %10547 = vmatprep.mubr.msk.f32.mxu0 %vm625_vm6, %v15577_v37 }
 0x232   : > { %10548 = vmatmul.mubr.msk.f32.gmra.mrb[16].mxu0 %vm625_vm6, %v15607_v61 }
 0x233   : > { %10550 = vmatprep.mubr.msk.f32.mxu0 %vm625_vm6, %v15608_v17 }
 0x236   : > { %10551 = vmatmul.mubr.msk.f32.gmra.mrb[18].mxu0 %vm625_vm6, %v12502_v29 }
 0x237   : > { %10553 = vmatprep.mubr.msk.f32.mxu0 %vm625_vm6, %v15609_v34 }
 0x23a   : > { %10554 = vmatmul.mubr.msk.f32.gmra.mrb[20].mxu0 %vm625_vm6, %v15610_v9 }
 0x23b   : > { %10556 = vmatprep.mubr.msk.f32.mxu0 %vm625_vm6, %v15580_v20 }
 0x23e   : > { %10557 = vmatmul.mubr.msk.f32.gmra.mrb[22].mxu0 %vm625_vm6, %v12528_v22 }
 0x23f   : > { %10559 = vmatprep.mubr.msk.f32.mxu0 %vm625_vm6, %v15611_v23 }
 0x242   : > { %10560 = vmatmul.mubr.msk.f32.gmra.mrb[24].mxu0 %vm625_vm6, %v12541_v21 }
 0x243   : > { %10562 = vmatprep.mubr.msk.f32.mxu0 %vm625_vm6, %v12545_v56 }
 0x246   : > { %10563 = vmatmul.mubr.msk.f32.gmra.mrb[26].mxu0 %vm625_vm6, %v12552_v40 }
 0x247   : > { %10565 = vmatprep.mubr.msk.f32.mxu0 %vm625_vm6, %v12782_v60 }
 0x24a   : > { %10566 = vmatmul.mubr.msk.f32.gmra.mrb[28].mxu0 %vm625_vm6, %v12789_v48 }
 0x24b   : > { %10568 = vmatprep.mubr.msk.f32.mxu0 %vm625_vm6, %v12545_v56 }
 0x24e   : > { %10569 = vmatmul.mubr.msk.f32.gmra.mrb[30].mxu0 %vm625_vm6, %v12552_v40 }
 0x2e5   : > { %v10525_v35 = vpop.f32.mrb[0].mxu0 }
 0x2e6   : > { %v11037_v8 = vadd.f32 %v10525_v35, %v13014_v5  ;;  %v3178_v14 = vpop.f32.mrb[1].mxu0 }
 0x2e7   : > { %v11038_v32 = vadd.f32 %v13014_v5, %v3178_v14 }
 0x2e8   : > { %vm3370_vm11 = vcmp.ge.f32.partialorder %v11037_v8, 0.0  ;;  %v3402_v29 = vmul.f32 0.2, %v11037_v8 }
 0x2e9   : > { %vm3369_vm12 = vcmp.ge.f32.partialorder %v11038_v32, 0.0  ;;  %v3401_v51 = vmul.f32 0.2, %v11038_v32  ;;  %v10528_v22 = vpop.f32.mrb[2].mxu0 }
 0x2ea   : > { %v3434_v21 = vsel %vm3370_vm11, %v11037_v8, %v3402_v29  ;;  %v11039_v48 = vadd.f32 %v10528_v22, %v13014_v5  ;;  %v3188_v56 = vpop.f32.mrb[3].mxu0 }
 0x2eb   : > { %v3533_v40 = vrot.slane %v3434_v21, 7  ;;  %v3610_v55 = vrot.slane %v3434_v21, 5  ;;  %v3433_v41 = vsel %vm3369_vm12, %v11038_v32, %v3401_v51  ;;  %v11040_v27 = vadd.f32 %v13014_v5, %v3188_v56 }
 0x2ec   : > { %v3532_v63 = vrot.slane %v3433_v41, 7  ;;  %vm3372_vm13 = vcmp.ge.f32.partialorder %v11039_v48, 0.0  ;;  %v3404_v24 = vmul.f32 0.2, %v11039_v48  ;;  %v3482_v30 = vrot.slane %v3433_v41, 1 }
 0x2ed   : > { %vm3371_vm14 = vcmp.ge.f32.partialorder %v11040_v27, 0.0  ;;  %v3403_v25 = vmul.f32 0.2, %v11040_v27  ;;  %v10531_v54 = vpop.f32.mrb[4].mxu0  ;;  %v13021_v53 = vsel %vm471_vm3, %v3533_v40, %v3610_v55 }
 0x2ee   : > { %v3436_v6 = vsel %vm3372_vm13, %v11039_v48, %v3404_v24  ;;  %v11041_v38 = vadd.f32 %v10531_v54, %v13014_v5  ;;  %v3198_v37 = vpop.f32.mrb[5].mxu0  ;;  %v13025_v39 = vsel %vm471_vm3, %v3532_v63, %v3533_v40  ;;  %v13060_v4 = vsel %vm471_vm3, %v3482_v30, %v3532_v63 }
 0x2ef   : > { %v3530_v60 = vrot.slane %v3436_v6, 7  ;;  %v3609_v20 = vrot.slane %v3436_v6, 5  ;;  %v3435_v12 = vsel %vm3371_vm14, %v11040_v27, %v3403_v25  ;;  %v11042_v18 = vadd.f32 %v13014_v5, %v3198_v37 }
 0x2f0   : > { %v3481_v19 = vrot.slane %v3435_v12, 1  ;;  %vm3374_vm15 = vcmp.ge.f32.partialorder %v11041_v38, 0.0  ;;  %v3406_v44 = vmul.f32 0.2, %v11041_v38  ;;  %v3529_v50 = vrot.slane %v3435_v12, 7 }
 0x2f1   : > { %v13029_v45 = vsel %vm471_vm3, %v3530_v60, %v3609_v20  ;;  %vm3373_vm2 = vcmp.ge.f32.partialorder %v11042_v18, 0.0  ;;  %v3405_v52 = vmul.f32 0.2, %v11042_v18  ;;  %v10534_v0 = vpop.f32.mrb[6].mxu0 }
 0x2f2   : > { %v11043_v1 = vadd.f32 %v10534_v0, %v13014_v5  ;;  %v3208_v13 = vpop.f32.mrb[7].mxu0  ;;  %v13032_v31 = vsel %vm3374_vm15, %v11041_v38, %v3406_v44  ;;  %v13038_v33 = vsel %vm471_vm3, %v3481_v19, %v3529_v50  ;;  %v13041_v49 = vsel %vm471_vm3, %v3529_v50, %v3530_v60 }
 0x2f3   : > { %v13034_v46 = vsel %vm3373_vm2, %v11042_v18, %v3405_v52  ;;  %v11044_v57 = vadd.f32 %v13014_v5, %v3208_v13  ;;  %v3536_v58 = vrot.slane %v13032_v31, 7  ;;  %10573 = vmatprep.mubr.msk.f32.mxu1 %vm625_vm6, %v13038_v33 }
 0x2f4   : > { %vm3376_vm4 = vcmp.ge.f32.partialorder %v11043_v1, 0.0  ;;  %v3408_v59 = vmul.f32 0.2, %v11043_v1  ;;  %v3535_v3 = vrot.slane %v13034_v46, 7  ;;  %10574 = vmatmul.mubr.msk.f32.vlgmr.msra.gmra.mrb[4].mxu1 %vm625_vm6, %v13041_v49  ;;  %v3483_v24 = vrot.slane %v13034_v46, 1 }
 0x2f5   : > { %vm3375_vm5 = vcmp.ge.f32.partialorder %v11044_v57, 0.0  ;;  %v3407_v26 = vmul.f32 0.2, %v11044_v57  ;;  %v10537_v7 = vpop.f32.mrb[8].mxu0  ;;  %10622 = vmatpush3.msk.msra.mxu1 %vm701_vm0, %v12999_v10  ;;  %10576 = vmatprep.mubr.msk.f32.mxu1 %vm625_vm6, %v13060_v4 }
 0x2f6   : > { %v13045_v47 = vsel %vm3376_vm4, %v11043_v1, %v3408_v59  ;;  %v11045_v62 = vadd.f32 %v10537_v7, %v13014_v5  ;;  %v3218_v36 = vpop.f32.mrb[9].mxu0  ;;  %10671 = vmatprep.subr.msk.mxu1 %vm701_vm0, %v13053_v16  ;;  %v13077_v14 = vsel %vm471_vm3, %v3535_v3, %v3536_v58  ;;  %v13127_v0 = vsel %vm471_vm3, %v3483_v24, %v3535_v3 }
 0x2f7   : > { %v13055_v43 = vsel %vm3375_vm5, %v11044_v57, %v3407_v26  ;;  %v11046_v61 = vadd.f32 %v13014_v5, %v3218_v36  ;;  %v3539_v34 = vrot.slane %v13045_v47, 7 }
 0x2f8   : > { %vm3378_vm7 = vcmp.ge.f32.partialorder %v11045_v62, 0.0  ;;  %v3410_v17 = vmul.f32 0.2, %v11045_v62  ;;  %v3538_v9 = vrot.slane %v13055_v43, 7  ;;  %v3484_v59 = vrot.slane %v13055_v43, 1 }
 0x2f9   : > { %vm3377_vm9 = vcmp.ge.f32.partialorder %v11046_v61, 0.0  ;;  %v3409_v23 = vmul.f32 0.2, %v11046_v61  ;;  %v10540_v15 = vpop.f32.mrb[10].mxu0 }
 0x2fa   : > { %v13071_v35 = vsel %vm3378_vm7, %v11045_v62, %v3410_v17  ;;  %v11047_v8 = vadd.f32 %v10540_v15, %v13014_v5  ;;  %v3228_v10 = vpop.f32.mrb[11].mxu0  ;;  %v13089_v40 = vsel %vm471_vm3, %v3538_v9, %v3539_v34 }
 0x2fb   : > { %v15352_v32 = vrot.slane %v13071_v35, 7  ;;  %v13080_v29 = vsel %vm3377_vm9, %v11046_v61, %v3409_v23  ;;  %v11048_v51 = vadd.f32 %v13014_v5, %v3228_v10 }
 0x2fc   : > { %v3541_v22 = vrot.slane %v13080_v29, 7  ;;  %vm3380_vm10 = vcmp.ge.f32.partialorder %v11047_v8, 0.0  ;;  %v3412_v21 = vmul.f32 0.2, %v11047_v8  ;;  %10577 = vmatmul.mubr.msk.f32.gmra.mrb[4].mxu1 %vm625_vm6, %v13025_v39 }
 0x2fd   : > { %vm3379_vm11 = vcmp.ge.f32.partialorder %v11048_v51, 0.0  ;;  %v3411_v48 = vmul.f32 0.2, %v11048_v51  ;;  %v10543_v56 = vpop.f32.mrb[12].mxu0  ;;  %10579 = vmatprep.mubr.msk.f32.mxu1 %vm625_vm6, %v13038_v33 }
 0x2fe   : > { %v13091_v55 = vsel %vm3380_vm10, %v11047_v8, %v3412_v21  ;;  %v11049_v41 = vadd.f32 %v10543_v56, %v13014_v5  ;;  %v3238_v27 = vpop.f32.mrb[13].mxu0  ;;  %v13099_v63 = vsel %vm471_vm3, %v3541_v22, %v15352_v32 }
 0x2ff   : > { %v15350_v25 = vrot.slane %v13091_v55, 7  ;;  %v13103_v54 = vsel %vm3379_vm11, %v11048_v51, %v3411_v48  ;;  %v11050_v6 = vadd.f32 %v13014_v5, %v3238_v27  ;;  %v13155_v48 = vsel %vm471_vm3, %v3484_v59, %v3538_v9 }
 0x300   : > { %v3544_v38 = vrot.slane %v13103_v54, 7  ;;  %vm3382_vm12 = vcmp.ge.f32.partialorder %v11049_v41, 0.0  ;;  %v3414_v37 = vmul.f32 0.2, %v11049_v41  ;;  %10580 = vmatmul.mubr.msk.f32.gmra.mrb[6].mxu1 %vm625_vm6, %v13041_v49  ;;  %v3485_v27 = vrot.slane %v13080_v29, 1 }
 0x301   : > { %vm3381_vm13 = vcmp.ge.f32.partialorder %v11050_v6, 0.0  ;;  %v3413_v60 = vmul.f32 0.2, %v11050_v6  ;;  %v10546_v20 = vpop.f32.mrb[14].mxu0  ;;  %10582 = vmatprep.mubr.msk.f32.mxu1 %vm625_vm6, %v13127_v0  ;;  %v3486_v29 = vrot.slane %v13103_v54, 1 }
 0x302   : > { %v13111_v12 = vsel %vm3382_vm12, %v11049_v41, %v3414_v37  ;;  %v11051_v18 = vadd.f32 %v10546_v20, %v13014_v5  ;;  %v3248_v19 = vpop.f32.mrb[15].mxu0  ;;  %v13119_v44 = vsel %vm471_vm3, %v3544_v38, %v15350_v25 }
 0x303   : > { %v15347_v50 = vrot.slane %v13111_v12, 7  ;;  %v13122_v52 = vsel %vm3381_vm13, %v11050_v6, %v3413_v60  ;;  %v11052_v1 = vadd.f32 %v13014_v5, %v3248_v19  ;;  %v3611_v60 = vrot.slane %v13032_v31, 5 }
 0x304   : > { %v3547_v13 = vrot.slane %v13122_v52, 7  ;;  %vm3384_vm14 = vcmp.ge.f32.partialorder %v11051_v18, 0.0  ;;  %v3416_v30 = vmul.f32 0.2, %v11051_v18 }
 0x305   : > { %vm3383_vm15 = vcmp.ge.f32.partialorder %v11052_v1, 0.0  ;;  %v3415_v46 = vmul.f32 0.2, %v11052_v1  ;;  %v10549_v57 = vpop.f32.mrb[16].mxu0 }
 0x306   : > { %v13134_v26 = vsel %vm3384_vm14, %v11051_v18, %v3416_v30  ;;  %v11053_v7 = vadd.f32 %v10549_v57, %v13014_v5  ;;  %v3258_v3 = vpop.f32.mrb[17].mxu0  ;;  %v13142_v62 = vsel %vm471_vm3, %v3547_v13, %v15347_v50 }
 0x307   : > { %v15346_v36 = vrot.slane %v13134_v26, 7  ;;  %v13145_v61 = vsel %vm3383_vm15, %v11052_v1, %v3415_v46  ;;  %v11054_v17 = vadd.f32 %v13014_v5, %v3258_v3 }
 0x308   : > { %v3550_v23 = vrot.slane %v13145_v61, 7  ;;  %vm3386_vm2 = vcmp.ge.f32.partialorder %v11053_v7, 0.0  ;;  %v3418_v15 = vmul.f32 0.2, %v11053_v7  ;;  %10583 = vmatmul.mubr.msk.f32.gmra.mrb[6].mxu1 %vm625_vm6, %v13077_v14 }
 0x309   : > { %vm3385_vm4 = vcmp.ge.f32.partialorder %v11054_v17, 0.0  ;;  %v3417_v8 = vmul.f32 0.2, %v11054_v17  ;;  %v10552_v10 = vpop.f32.mrb[18].mxu0  ;;  %10585 = vmatprep.mubr.msk.f32.mxu1 %vm625_vm6, %v13155_v48 }
 0x30a   : > { %v13149_v51 = vsel %vm3386_vm2, %v11053_v7, %v3418_v15  ;;  %v11055_v21 = vadd.f32 %v10552_v10, %v13014_v5  ;;  %v3268_v56 = vpop.f32.mrb[19].mxu0  ;;  %v13162_v41 = vsel %vm471_vm3, %v3550_v23, %v15346_v36  ;;  %v13193_v7 = vsel %vm471_vm3, %v3485_v27, %v3541_v22 }
 0x30b   : > { %v15345_v24 = vrot.slane %v13149_v51, 7  ;;  %v13166_v6 = vsel %vm3385_vm4, %v11054_v17, %v3417_v8  ;;  %v11056_v43 = vadd.f32 %v13014_v5, %v3268_v56 }
 0x30c   : > { %v15351_v9 = vrot.slane %v13166_v6, 7  ;;  %vm3388_vm5 = vcmp.ge.f32.partialorder %v11055_v21, 0.0  ;;  %v3420_v37 = vmul.f32 0.2, %v11055_v21  ;;  %10586 = vmatmul.mubr.msk.f32.gmra.mrb[8].mxu1 %vm625_vm6, %v13089_v40 }
 0x30d   : > { %vm3387_vm7 = vcmp.ge.f32.partialorder %v11056_v43, 0.0  ;;  %v3419_v20 = vmul.f32 0.2, %v11056_v43  ;;  %v10555_v18 = vpop.f32.mrb[20].mxu0  ;;  %10588 = vmatprep.mubr.msk.f32.mxu1 %vm625_vm6, %v13193_v7 }
 0x30e   : > { %v13175_v19 = vsel %vm3388_vm5, %v11055_v21, %v3420_v37  ;;  %v11057_v1 = vadd.f32 %v10555_v18, %v13014_v5  ;;  %v3278_v30 = vpop.f32.mrb[21].mxu0  ;;  %v13183_v46 = vsel %vm471_vm3, %v15351_v9, %v15345_v24  ;;  %v13202_v21 = vsel %vm471_vm3, %v3536_v58, %v3611_v60 }
 0x30f   : > { %v15343_v57 = vrot.slane %v13175_v19, 7  ;;  %v13186_v59 = vsel %vm3387_vm7, %v11056_v43, %v3419_v20  ;;  %v11058_v3 = vadd.f32 %v13014_v5, %v3278_v30 }
 0x310   : > { %v15344_v17 = vrot.slane %v13186_v59, 7  ;;  %vm3390_vm9 = vcmp.ge.f32.partialorder %v11057_v1, 0.0  ;;  %v3422_v15 = vmul.f32 0.2, %v11057_v1 }
 0x311   : > { %vm3389_vm10 = vcmp.ge.f32.partialorder %v11058_v3, 0.0  ;;  %v3421_v8 = vmul.f32 0.2, %v11058_v3  ;;  %v10558_v10 = vpop.f32.mrb[22].mxu0 }
 0x312   : > { %v13205_v22 = vsel %vm3390_vm9, %v11057_v1, %v3422_v15  ;;  %v11059_v56 = vadd.f32 %v10558_v10, %v13014_v5  ;;  %v3288_v27 = vpop.f32.mrb[23].mxu0  ;;  %v13213_v43 = vsel %vm471_vm3, %v15344_v17, %v15343_v57  ;;  %v13226_v10 = vsel %vm471_vm3, %v3486_v29, %v3544_v38 }
 0x313   : > { %v15342_v37 = vrot.slane %v13205_v22, 7  ;;  %v13216_v31 = vsel %vm3389_vm10, %v11058_v3, %v3421_v8  ;;  %v11060_v58 = vadd.f32 %v13014_v5, %v3288_v27  ;;  %v3487_v27 = vrot.slane %v13122_v52, 1 }
 0x314   : > { %v15341_v60 = vrot.slane %v13216_v31, 7  ;;  %vm3392_vm11 = vcmp.ge.f32.partialorder %v11059_v56, 0.0  ;;  %v3424_v20 = vmul.f32 0.2, %v11059_v56  ;;  %10589 = vmatmul.mubr.msk.f32.gmra.mrb[8].mxu1 %vm625_vm6, %v13099_v63  ;;  %v958_v17 = vadd.f32 %v13014_v5, %v13005_v2 }
 0x315   : > { %vm3391_vm12 = vcmp.ge.f32.partialorder %v11060_v58, 0.0  ;;  %v3423_v18 = vmul.f32 0.2, %v11060_v58  ;;  %v10561_v1 = vpop.f32.mrb[24].mxu0  ;;  %10591 = vmatprep.mubr.msk.f32.mxu1 %vm625_vm6, %v13226_v10  ;;  %vm8260_vm10 = vcmask 1043459  }
 0x316   : > { %v13220_v30 = vsel %vm3392_vm11, %v11059_v56, %v3424_v20  ;;  %v11061_v15 = vadd.f32 %v10561_v1, %v13014_v5  ;;  %v3298_v3 = vpop.f32.mrb[25].mxu0  ;;  %v13233_v8 = vsel %vm471_vm3, %v15341_v60, %v15342_v37  ;;  %v3612_v1 = vrot.slane %v13045_v47, 5 }
 0x317   : > { %v15349_v56 = vrot.slane %v13220_v30, 7  ;;  %v13237_v20 = vsel %vm3391_vm12, %v11060_v58, %v3423_v18  ;;  %v11062_v54 = vadd.f32 %v13014_v5, %v3298_v3  ;;  %v959_v58 = vadd.f32 %v13003_v42, %v13014_v5 }
 0x318   : > { %v15348_v38 = vrot.slane %v13237_v20, 7  ;;  %vm3394_vm13 = vcmp.ge.f32.partialorder %v11061_v15, 0.0  ;;  %v3426_v29 = vmul.f32 0.2, %v11061_v15  ;;  %10592 = vmatmul.mubr.msk.f32.gmra.mrb[10].mxu1 %vm625_vm6, %v13119_v44  ;;  %v13268_v42 = vsel %vm471_vm3, %v3487_v27, %v3547_v13 }
 0x319   : > { %vm3393_vm14 = vcmp.ge.f32.partialorder %v11062_v54, 0.0  ;;  %v3425_v60 = vmul.f32 0.2, %v11062_v54  ;;  %v10564_v37 = vpop.f32.mrb[26].mxu0  ;;  %10594 = vmatprep.mubr.msk.f32.mxu1 %vm625_vm6, %v13268_v42  ;;  %v13279_v52 = vsel %vm471_vm3, %v3539_v34, %v3612_v1  ;;  %v3488_v13 = vrot.slane %v13145_v61, 1 }
 0x31a   : > { %v13248_v18 = vsel %vm3394_vm13, %v11061_v15, %v3426_v29  ;;  %v11063_v57 = vadd.f32 %v10564_v37, %v13014_v5  ;;  %v3308_v3 = vpop.f32.mrb[27].mxu0  ;;  %v13258_v24 = vsel %vm471_vm3, %v15348_v38, %v15349_v56  ;;  %v961_v29 = vadd.f32 %v13007_v11, %v13014_v5 }
 0x31b   : > { %v15355_v36 = vrot.slane %v13248_v18, 7  ;;  %v13261_v50 = vsel %vm3393_vm14, %v11062_v54, %v3425_v60  ;;  %v11064_v2 = vadd.f32 %v13014_v5, %v3308_v3  ;;  %v960_v47 = vadd.f32 %v13014_v5, %v13009_v28 }
 0x31c   : > { %v15354_v37 = vrot.slane %v13261_v50, 7  ;;  %vm3396_vm15 = vcmp.ge.f32.partialorder %v11063_v57, 0.0  ;;  %v3428_v15 = vmul.f32 0.2, %v11063_v57  ;;  %v3613_v1 = vrot.slane %v13071_v35, 5 }
 0x31d   : > { %vm3395_vm2 = vcmp.ge.f32.partialorder %v11064_v2, 0.0  ;;  %v3427_v60 = vmul.f32 0.2, %v11064_v2  ;;  %v10567_v54 = vpop.f32.mrb[28].mxu0  ;;  %v3489_v5 = vrot.slane %v13166_v6, 1  ;;  %vm8262_vm11 = vcmask 1044484  }
 0x31e   : > { %v3460_v27 = vsel %vm3396_vm15, %v11063_v57, %v3428_v15  ;;  %v11066_v3 = vadd.f32 %v10567_v54, %v959_v58  ;;  %v3318_v38 = vpop.f32.mrb[29].mxu0  ;;  %v13287_v56 = vsel %vm471_vm3, %v15354_v37, %v15355_v36  ;;  %v15616_v37 = vrot.slane %v13134_v26, 7 }
 0x31f   : > { %v3569_v25 = vrot.slane %v3460_v27, 7  ;;  %v13289_v9 = vsel %vm3395_vm2, %v11064_v2, %v3427_v60  ;;  %v11068_v11 = vadd.f32 %v3318_v38, %v958_v17  ;;  %v13298_v2 = vsel %vm471_vm3, %v3488_v13, %v3550_v23 }
 0x320   : > { %v15353_v34 = vrot.slane %v13289_v9, 7  ;;  %vm3398_vm4 = vcmp.ge.f32.partialorder %v11066_v3, 0.0  ;;  %v3430_v57 = vmul.f32 0.2, %v11066_v3  ;;  %10595 = vmatmul.mubr.msk.f32.gmra.mrb[10].mxu1 %vm625_vm6, %v13142_v62  ;;  %v3614_v23 = vrot.slane %v13091_v55, 5 }
 0x321   : > { %vm3397_vm5 = vcmp.ge.f32.partialorder %v11068_v11, 0.0  ;;  %v3429_v58 = vmul.f32 0.2, %v11068_v11  ;;  %v10570_v15 = vpop.f32.mrb[30].mxu0  ;;  %10597 = vmatprep.mubr.msk.f32.mxu1 %vm625_vm6, %v13298_v2  ;;  %v3615_v13 = vrot.slane %v13111_v12, 5  ;;  %vm8264_vm12 = vcmask 1045509  }
 0x322   : > { %v3462_v54 = vsel %vm3398_vm4, %v11066_v3, %v3430_v57  ;;  %v11070_v32 = vadd.f32 %v10570_v15, %v961_v29  ;;  %v3328_v17 = vpop.f32.mrb[31].mxu0  ;;  %v13303_v28 = vsel %vm471_vm3, %v15353_v34, %v3569_v25  ;;  %v15612_v57 = vrot.slane %v13071_v35, 7 }
 0x323   : > { %v3572_v38 = vrot.slane %v3462_v54, 7  ;;  %v13306_v60 = vsel %vm3397_vm5, %v11068_v11, %v3429_v58  ;;  %v11072_v29 = vadd.f32 %v3328_v17, %v960_v47  ;;  %v15613_v47 = vrot.slane %v13166_v6, 7 }
 0x324   : > { %v3571_v61 = vrot.slane %v13306_v60, 7  ;;  %v13321_v11 = vsel %vm471_vm3, %v15612_v57, %v3613_v1  ;;  %10598 = vmatmul.mubr.msk.f32.gmra.mrb[12].mxu1 %vm625_vm6, %v13162_v41  ;;  %v3616_v15 = vrot.slane %v13134_v26, 5  ;;  %v3617_v17 = vrot.slane %v13149_v51, 5 }
 0x325   : > { %v13328_v58 = vsel %vm471_vm3, %v3489_v5, %v15613_v47  ;;  %v15614_v35 = vrot.slane %v13091_v55, 7  ;;  %v15615_v57 = vrot.slane %v13111_v12, 7  ;;  %v3618_v6 = vrot.slane %v13175_v19, 5 }
 0x326   : > { %v13316_v3 = vsel %vm471_vm3, %v3571_v61, %v3572_v38  ;;  %10600 = vmatprep.mubr.msk.f32.mxu1 %vm625_vm6, %v13328_v58  ;;  %v3490_v5 = vrot.slane %v13186_v59, 1  ;;  %v3619_v47 = vrot.slane %v13205_v22, 5  ;;  %v13350_v36 = vsel %vm471_vm3, %v15616_v37, %v3616_v15 }
 0x327   : > { %v13337_v1 = vsel %vm471_vm3, %v15614_v35, %v3614_v23  ;;  %v13342_v34 = vsel %vm471_vm3, %v15615_v57, %v3615_v13  ;;  %v15617_v55 = vrot.slane %v13149_v51, 7  ;;  %v3620_v12 = vrot.slane %v13220_v30, 5 }
 0x328   : > { %v3491_v13 = vrot.slane %v13216_v31, 1  ;;  %v3621_v35 = vrot.slane %v13248_v18, 5  ;;  %v15619_v57 = vrot.slane %v13186_v59, 7  ;;  %v15620_v37 = vrot.slane %v13175_v19, 7 }
 0x329   : > { %v13355_v23 = vsel %vm471_vm3, %v15617_v55, %v3617_v17  ;;  %v15621_v15 = vrot.slane %v13205_v22, 7  ;;  %v3622_v55 = vrot.slane %v3460_v27, 5  ;;  %v15622_v59 = vrot.slane %v13220_v30, 7 }
 0x32a   : > { %15618 = vst [vmem:[#allocation18_spill] sm:$0xff] %v13355_v23  ;;  %v13365_v26 = vsel %vm471_vm3, %v3490_v5, %v15619_v57  ;;  %v13370_v51 = vsel %vm471_vm3, %v15620_v37, %v3618_v6  ;;  %v3623_v23 = vrot.slane %v3462_v54, 5  ;;  %v15623_v19 = vrot.slane %v13216_v31, 7 }
 0x32b   : > { %v13377_v17 = vsel %vm471_vm3, %v15621_v15, %v3619_v47  ;;  %v13382_v5 = vsel %vm471_vm3, %v15622_v59, %v3620_v12  ;;  %v15624_v22 = vrot.slane %v13248_v18, 7  ;;  %v13399_v30 = vsel %vm471_vm3, %v3569_v25, %v3622_v55 }
 0x32c   : > { %10601 = vmatmul.mubr.msk.f32.gmra.mrb[12].mxu1 %vm625_vm6, %v13183_v46  ;;  %v13389_v6 = vsel %vm471_vm3, %v3491_v13, %v15623_v19  ;;  %v13402_v27 = vsel %vm471_vm3, %v3572_v38, %v3623_v23  ;;  %v3492_v54 = vrot.slane %v13237_v20, 1  ;;  %v3493_v31 = vrot.slane %v13261_v50, 1 }
 0x32d   : > { %10603 = vmatprep.mubr.msk.f32.mxu1 %vm625_vm6, %v13365_v26  ;;  %v13394_v47 = vsel %vm471_vm3, %v15624_v22, %v3621_v35  ;;  %v15625_v18 = vrot.slane %v13237_v20, 7  ;;  %v3432_v25 = vmul.f32 0.2, %v11070_v32  ;;  %v3431_v13 = vmul.f32 0.2, %v11072_v29 }
 0x32e   : > { %vm3400_vm7 = vcmp.ge.f32.partialorder %v11070_v32, 0.0  ;;  %vm3399_vm9 = vcmp.ge.f32.partialorder %v11072_v29, 0.0  ;;  %v15626_v38 = vrot.slane %v13261_v50, 7  ;;  %v3494_v57 = vrot.slane %v13289_v9, 1 }
 0x32f   : > { %v13411_v12 = vsel %vm471_vm3, %v3492_v54, %v15625_v18  ;;  %v3464_v20 = vsel %vm3400_vm7, %v11070_v32, %v3432_v25  ;;  %v13424_v35 = vsel %vm3399_vm9, %v11072_v29, %v3431_v13  ;;  %v3495_v55 = vrot.slane %v13306_v60, 1  ;;  %v13471_v13 = vld [vmem:[%s15231_s3 + $0xc] sm:$0xf] }
 0x330   : > { %10604 = vmatmul.mubr.msk.f32.gmra.mrb[14].mxu1 %vm625_vm6, %v13213_v43  ;;  %v13420_v23 = vsel %vm471_vm3, %v3493_v31, %v15626_v38  ;;  %v3575_v37 = vrot.slane %v3464_v20, 7  ;;  %v15357_v15 = vrot.slane %v13424_v35, 7  ;;  %v3624_v59 = vrot.slane %v3464_v20, 5 }
 0x331   : > { %10606 = vmatprep.mubr.msk.f32.mxu1 %vm625_vm6, %v13389_v6  ;;  %v15627_v50 = vrot.slane %v13289_v9, 7  ;;  %v13446_v60 = vsel %vm471_vm3, %v3495_v55, %v3571_v61  ;;  %v4032_v9 = vrot.slane %v13038_v33, 1  ;;  %v4033_v22 = vrot.slane %v13041_v49, 1 }
 0x332   : > { %v13441_v32 = vsel %vm471_vm3, %v15357_v15, %v3575_v37  ;;  %v13449_v29 = vsel %vm471_vm3, %v3575_v37, %v3624_v59  ;;  %v4035_v54 = vrot.slane %v13029_v45, 1  ;;  %v4037_v31 = vrot.slane %v13060_v4, 1 }
 0x333   : > { %v13434_v19 = vsel %vm471_vm3, %v3494_v57, %v15627_v50  ;;  %15628 = vst [vmem:[#allocation19_spill] sm:$0xff] %v13449_v29  ;;  %v4038_v18 = vrot.slane %v13025_v39, 1  ;;  %v13461_v61 = vsel %vm977_vm1, %v4032_v9, %v4033_v22  ;;  %v4040_v20 = vrot.slane %v13021_v53, 1 }
 0x334   : > { %v13466_v25 = vsel %vm977_vm1, %v4033_v22, %v4035_v54  ;;  %v4042_v37 = vrot.slane %v13127_v0, 1  ;;  %v4043_v55 = vrot.slane %v13077_v14, 1  ;;  %v4045_v59 = vrot.slane %v13202_v21, 1 }
 0x335   : > { %v13476_v38 = vsel %vm977_vm1, %v4037_v31, %v4038_v18  ;;  %v13486_v57 = vsel %vm977_vm1, %v4038_v18, %v4040_v20  ;;  %v4047_v50 = vrot.slane %v13155_v48, 1  ;;  %v4048_v9 = vrot.slane %v13089_v40, 1 }
 0x336   : > { %v13505_v22 = vsel %vm977_vm1, %v4043_v55, %v4045_v59  ;;  %v4050_v54 = vrot.slane %v13279_v52, 1  ;;  %v4052_v18 = vrot.slane %v13193_v7, 1  ;;  %v4053_v20 = vrot.slane %v13099_v63, 1 }
 0x337   : > { %v13511_v31 = vsel %vm977_vm1, %v4047_v50, %v4048_v9  ;;  %v4055_v59 = vrot.slane %v13321_v11, 1  ;;  %v4057_v50 = vrot.slane %v13226_v10, 1  ;;  %v4058_v15 = vrot.slane %v13119_v44, 1 }
 0x338   : > { %10607 = vmatmul.mubr.msk.f32.gmra.mrb[14].mxu1 %vm625_vm6, %v13233_v8  ;;  %15629 = vst [vmem:[#allocation16_spill] sm:$0xff] %v13511_v31  ;;  %vm8266_vm13 = vcmask 1046534   ;;  %vm8268_vm14 = vcmask 1047559  }
 0x339   : > { %10609 = vmatprep.mubr.msk.f32.mxu1 %vm625_vm6, %v13411_v12  ;;  %v13531_v29 = vsel %vm977_vm1, %v4053_v20, %v4055_v59  ;;  %v4065_v59 = vrot.slane %v13342_v34, 1 }
 0x33a   : > { %15632 = vst [vmem:[#allocation43_spill] sm:$0xff] %v13531_v29 }
 0x33c   : > { %10610 = vmatmul.mubr.msk.f32.gmra.mrb[16].mxu1 %vm625_vm6, %v13258_v24 }
 0x33d   : > { %10612 = vmatprep.mubr.msk.f32.mxu1 %vm625_vm6, %v13420_v23 }
 0x344   : > { %10613 = vmatmul.mubr.msk.f32.gmra.mrb[16].mxu1 %vm625_vm6, %v13287_v56 }
 0x345   : > { %10615 = vmatprep.mubr.msk.f32.mxu1 %vm625_vm6, %v13434_v19 }
 0x348   : > { %10616 = vmatmul.mubr.msk.f32.gmra.mrb[18].mxu1 %vm625_vm6, %v13303_v28 }
 0x349   : > { %10618 = vmatprep.mubr.msk.f32.mxu1 %vm625_vm6, %v13446_v60 }
 0x350   : > { %10619 = vmatmul.mubr.msk.f32.gmra.mrb[18].mxu1 %vm625_vm6, %v13316_v3 }
 0x351   : > { %10623 = vmatprep.mubr.msk.f32.mxu1 %vm625_vm6, %v13461_v61 }
 0x354   : > { %10624 = vmatmul.mubr.msk.f32.vlgmr.msra.gmra.mrb[4].mxu1 %vm625_vm6, %v13466_v25 }
 0x355   : > { %10672 = vmatpush3.msk.msra.mxu1 %vm701_vm0, %v13053_v16  ;;  %10626 = vmatprep.mubr.msk.f32.mxu1 %vm625_vm6, %v13476_v38  ;;  %v13497_v16 = vsel %vm977_vm1, %v4042_v37, %v4043_v55  ;;  %v13518_v37 = vsel %vm977_vm1, %v4048_v9, %v4050_v54  ;;  %v13523_v55 = vsel %vm977_vm1, %v4052_v18, %v4053_v20  ;;  %v4060_v9 = vrot.slane %v13337_v1, 1 }
 0x356   : > { %10721 = vmatprep.subr.msk.mxu1 %vm701_vm0, %v13471_v13  ;;  %15630 = vst [vmem:[#allocation39_spill] sm:$0xff] %v13518_v37  ;;  %15631 = vst [vmem:[#allocation41_spill] sm:$0xff] %v13523_v55  ;;  %v13537_v54 = vsel %vm977_vm1, %v4057_v50, %v4058_v15  ;;  %v4062_v18 = vrot.slane %v13268_v42, 1  ;;  %v4067_v50 = vrot.slane %v13298_v2, 1 }
 0x357   : > { %15633 = vst [vmem:[#allocation46_spill] sm:$0xff] %v13537_v54 }
 0x35c   : > { %10627 = vmatmul.mubr.msk.f32.gmra.mrb[4].mxu1 %vm625_vm6, %v13486_v57 }
 0x35d   : > { %10629 = vmatprep.mubr.msk.f32.mxu1 %vm625_vm6, %v13461_v61 }
 0x360   : > { %10630 = vmatmul.mubr.msk.f32.gmra.mrb[6].mxu1 %vm625_vm6, %v13466_v25 }
 0x361   : > { %10632 = vmatprep.mubr.msk.f32.mxu1 %vm625_vm6, %v13497_v16 }
 0x368   : > { %10633 = vmatmul.mubr.msk.f32.gmra.mrb[6].mxu1 %vm625_vm6, %v13505_v22 }
 0x369   : > { %10635 = vmatprep.mubr.msk.f32.mxu1 %vm625_vm6, %v13511_v31  ;;  %v4078_v31 = vrot.slane %v13213_v43, 1 }
 0x36c   : > { %10636 = vmatmul.mubr.msk.f32.gmra.mrb[8].mxu1 %vm625_vm6, %v13518_v37  ;;  %v13544_v37 = vsel %vm977_vm1, %v4058_v15, %v4060_v9  ;;  %v4070_v15 = vrot.slane %v13350_v36, 1 }
 0x36d   : > { %10638 = vmatprep.mubr.msk.f32.mxu1 %vm625_vm6, %v13523_v55  ;;  %v4063_v55 = vrot.slane %v13142_v62, 1  ;;  %15634 = vst [vmem:[#allocation47_spill] sm:$0xff] %v13544_v37 }
 0x36f   : > { %v13549_v20 = vsel %vm977_vm1, %v4062_v18, %v4063_v55  ;;  %v4072_v18 = vrot.slane %v13328_v58, 1 }
 0x370   : > { %15635 = vst [vmem:[#allocation48_spill] sm:$0xff] %v13549_v20 }
 0x374   : > { %10639 = vmatmul.mubr.msk.f32.gmra.mrb[8].mxu1 %vm625_vm6, %v13531_v29  ;;  %v4068_v29 = vrot.slane %v13162_v41, 1 }
 0x375   : > { %10641 = vmatprep.mubr.msk.f32.mxu1 %vm625_vm6, %v13537_v54  ;;  %v13557_v54 = vsel %vm977_vm1, %v4063_v55, %v4065_v59  ;;  %v15640_v59 = vld [vmem:[#allocation18_spill] sm:$0xff] }
 0x376   : > { %15636 = vst [vmem:[#allocation53_spill] sm:$0xff] %v13557_v54  ;;  %v13563_v9 = vsel %vm977_vm1, %v4067_v50, %v4068_v29  ;;  %v4075_v50 = vrot.slane %v15640_v59, 1 }
 0x377   : > { %15637 = vst [vmem:[#allocation58_spill] sm:$0xff] %v13563_v9 }
 0x378   : > { %10642 = vmatmul.mubr.msk.f32.gmra.mrb[10].mxu1 %vm625_vm6, %v13544_v37  ;;  %v13570_v37 = vsel %vm977_vm1, %v4068_v29, %v4070_v15  ;;  %v4080_v29 = vrot.slane %v13370_v51, 1 }
 0x379   : > { %10644 = vmatprep.mubr.msk.f32.mxu1 %vm625_vm6, %v13549_v20  ;;  %v4073_v20 = vrot.slane %v13183_v46, 1  ;;  %15638 = vst [vmem:[#allocation17_spill] sm:$0xff] %v13570_v37 }
 0x37b   : > { %v13575_v55 = vsel %vm977_vm1, %v4072_v18, %v4073_v20  ;;  %v4082_v18 = vrot.slane %v13389_v6, 1 }
 0x37c   : > { %15639 = vst [vmem:[#allocation20_spill] sm:$0xff] %v13575_v55 }
 0x380   : > { %10645 = vmatmul.mubr.msk.f32.gmra.mrb[10].mxu1 %vm625_vm6, %v13557_v54  ;;  %v4077_v54 = vrot.slane %v13365_v26, 1 }
 0x381   : > { %10647 = vmatprep.mubr.msk.f32.mxu1 %vm625_vm6, %v13563_v9  ;;  %v13583_v9 = vsel %vm977_vm1, %v4073_v20, %v4075_v50  ;;  %v4087_v50 = vrot.slane %v13411_v12, 1 }
 0x382   : > { %15641 = vst [vmem:[#allocation21_spill] sm:$0xff] %v13583_v9  ;;  %v13589_v15 = vsel %vm977_vm1, %v4077_v54, %v4078_v31  ;;  %v4085_v54 = vrot.slane %v13377_v17, 1 }
 0x383   : > { %15642 = vst [vmem:[#allocation22_spill] sm:$0xff] %v13589_v15 }
 0x384   : > { %10648 = vmatmul.mubr.msk.f32.gmra.mrb[12].mxu1 %vm625_vm6, %v13570_v37  ;;  %v13596_v37 = vsel %vm977_vm1, %v4078_v31, %v4080_v29  ;;  %v4090_v31 = vrot.slane %v13382_v5, 1 }
 0x385   : > { %10650 = vmatprep.mubr.msk.f32.mxu1 %vm625_vm6, %v13575_v55  ;;  %v4083_v55 = vrot.slane %v13233_v8, 1  ;;  %15643 = vst [vmem:[#allocation24_spill] sm:$0xff] %v13596_v37 }
 0x387   : > { %v13601_v20 = vsel %vm977_vm1, %v4082_v18, %v4083_v55  ;;  %v4092_v18 = vrot.slane %v13420_v23, 1 }
 0x388   : > { %15644 = vst [vmem:[#allocation23_spill] sm:$0xff] %v13601_v20 }
 0x38c   : > { %10651 = vmatmul.mubr.msk.f32.gmra.mrb[12].mxu1 %vm625_vm6, %v13583_v9  ;;  %v4088_v9 = vrot.slane %v13258_v24, 1 }
 0x38d   : > { %10653 = vmatprep.mubr.msk.f32.mxu1 %vm625_vm6, %v13589_v15  ;;  %v13609_v15 = vsel %vm977_vm1, %v4083_v55, %v4085_v54  ;;  %v4095_v54 = vrot.slane %v13394_v47, 1 }
 0x38e   : > { %15645 = vst [vmem:[#allocation25_spill] sm:$0xff] %v13609_v15  ;;  %v13615_v29 = vsel %vm977_vm1, %v4087_v50, %v4088_v9  ;;  %v4097_v50 = vrot.slane %v13434_v19, 1 }
 0x38f   : > { %15646 = vst [vmem:[#allocation26_spill] sm:$0xff] %v13615_v29 }
 0x390   : > { %10654 = vmatmul.mubr.msk.f32.gmra.mrb[14].mxu1 %vm625_vm6, %v13596_v37  ;;  %v13622_v37 = vsel %vm977_vm1, %v4088_v9, %v4090_v31  ;;  %v4100_v9 = vrot.slane %v13399_v30, 1 }
 0x391   : > { %10656 = vmatprep.mubr.msk.f32.mxu1 %vm625_vm6, %v13601_v20  ;;  %v4093_v20 = vrot.slane %v13287_v56, 1  ;;  %15647 = vst [vmem:[#allocation27_spill] sm:$0xff] %v13622_v37 }
 0x393   : > { %v13627_v55 = vsel %vm977_vm1, %v4092_v18, %v4093_v20  ;;  %v4102_v18 = vrot.slane %v13446_v60, 1 }
 0x394   : > { %15648 = vst [vmem:[#allocation28_spill] sm:$0xff] %v13627_v55 }
 0x398   : > { %10657 = vmatmul.mubr.msk.f32.gmra.mrb[14].mxu1 %vm625_vm6, %v13609_v15  ;;  %v4098_v15 = vrot.slane %v13303_v28, 1 }
 0x399   : > { %10659 = vmatprep.mubr.msk.f32.mxu1 %vm625_vm6, %v13615_v29  ;;  %v13635_v29 = vsel %vm977_vm1, %v4093_v20, %v4095_v54  ;;  %v4105_v54 = vrot.slane %v13402_v27, 1 }
 0x39a   : > { %15649 = vst [vmem:[#allocation29_spill] sm:$0xff] %v13635_v29  ;;  %v13641_v31 = vsel %vm977_vm1, %v4097_v50, %v4098_v15  ;;  %v4429_v50 = vrot.slane %v13038_v33, 2 }
 0x39b   : > { %15650 = vst [vmem:[#allocation30_spill] sm:$0xff] %v13641_v31 }
 0x39c   : > { %10660 = vmatmul.mubr.msk.f32.gmra.mrb[16].mxu1 %vm625_vm6, %v13622_v37  ;;  %v13648_v37 = vsel %vm977_vm1, %v4098_v15, %v4100_v9  ;;  %v4434_v9 = vrot.slane %v13060_v4, 2 }
 0x39d   : > { %10662 = vmatprep.mubr.msk.f32.mxu1 %vm625_vm6, %v13627_v55  ;;  %v4103_v55 = vrot.slane %v13316_v3, 1  ;;  %15651 = vst [vmem:[#allocation31_spill] sm:$0xff] %v13648_v37 }
 0x39f   : > { %v13653_v20 = vsel %vm977_vm1, %v4102_v18, %v4103_v55  ;;  %v13662_v15 = vsel %vm977_vm1, %v4103_v55, %v4105_v54  ;;  %v4439_v54 = vrot.slane %v13127_v0, 2 }
 0x3a0   : > { %15652 = vst [vmem:[#allocation32_spill] sm:$0xff] %v13653_v20  ;;  %15653 = vst [vmem:[#allocation33_spill] sm:$0xff] %v13662_v15 }
 0x3a4   : > { %10663 = vmatmul.mubr.msk.f32.gmra.mrb[16].mxu1 %vm625_vm6, %v13635_v29  ;;  %v4430_v29 = vrot.slane %v13041_v49, 2 }
 0x3a5   : > { %10665 = vmatprep.mubr.msk.f32.mxu1 %vm625_vm6, %v13641_v31  ;;  %v4432_v31 = vrot.slane %v13029_v45, 2  ;;  %v13679_v45 = vld [vmem:[%s15231_s3 + $0x10] sm:$0xf] }
 0x3a6   : > { %v13669_v18 = vsel %vm1375_vm8, %v4429_v50, %v4430_v29  ;;  %v4440_v50 = vrot.slane %v13077_v14, 2 }
 0x3a7   : > { %15654 = vst [vmem:[#allocation34_spill] sm:$0xff] %v13669_v18 }
 0x3a8   : > { %10666 = vmatmul.mubr.msk.f32.gmra.mrb[18].mxu1 %vm625_vm6, %v13648_v37  ;;  %v4435_v37 = vrot.slane %v13025_v39, 2 }
 0x3a9   : > { %10668 = vmatprep.mubr.msk.f32.mxu1 %vm625_vm6, %v13653_v20  ;;  %v13674_v20 = vsel %vm1375_vm8, %v4430_v29, %v4432_v31  ;;  %v4437_v29 = vrot.slane %v13021_v53, 2  ;;  %v4442_v53 = vrot.slane %v13202_v21, 2 }
 0x3aa   : > { %15655 = vst [vmem:[#allocation35_spill] sm:$0xff] %v13674_v20  ;;  %v13684_v55 = vsel %vm1375_vm8, %v4434_v9, %v4435_v37  ;;  %v4445_v9 = vrot.slane %v13089_v40, 2 }
 0x3ab   : > { %v13694_v31 = vsel %vm1375_vm8, %v4435_v37, %v4437_v29  ;;  %v4444_v37 = vrot.slane %v13155_v48, 2  ;;  %v13713_v29 = vsel %vm1375_vm8, %v4440_v50, %v4442_v53  ;;  %v4454_v53 = vrot.slane %v13226_v10, 2 }
 0x3ac   : > { %15657 = vst [vmem:[#allocation37_spill] sm:$0xff] %v13713_v29 }
 0x3b0   : > { %10669 = vmatmul.mubr.msk.f32.gmra.mrb[18].mxu1 %vm625_vm6, %v13662_v15 }
 0x3b1   : > { %10673 = vmatprep.mubr.msk.f32.mxu1 %vm625_vm6, %v13669_v18 }
 0x3b4   : > { %10674 = vmatmul.mubr.msk.f32.vlgmr.msra.gmra.mrb[4].mxu1 %vm625_vm6, %v13674_v20 }
 0x3b5   : > { %10722 = vmatpush3.msk.msra.mxu1 %vm701_vm0, %v13471_v13  ;;  %10676 = vmatprep.mubr.msk.f32.mxu1 %vm625_vm6, %v13684_v55  ;;  %v13705_v13 = vsel %vm1375_vm8, %v4439_v54, %v4440_v50  ;;  %v13719_v54 = vsel %vm1375_vm8, %v4444_v37, %v4445_v9  ;;  %v4452_v50 = vrot.slane %v13321_v11, 2  ;;  %v4455_v37 = vrot.slane %v13119_v44, 2 }
 0x3b6   : > { %10771 = vmatprep.subr.msk.mxu1 %vm701_vm0, %v13679_v45  ;;  %15656 = vst [vmem:[#allocation36_spill] sm:$0xff] %v13705_v13  ;;  %15658 = vst [vmem:[#allocation38_spill] sm:$0xff] %v13719_v54 }
 0x3bc   : > { %10677 = vmatmul.mubr.msk.f32.gmra.mrb[4].mxu1 %vm625_vm6, %v13694_v31 }
 0x3bd   : > { %10679 = vmatprep.mubr.msk.f32.mxu1 %vm625_vm6, %v13669_v18  ;;  %v4447_v18 = vrot.slane %v13279_v52, 2 }
 0x3bf   : > { %v13726_v21 = vsel %vm1375_vm8, %v4445_v9, %v4447_v18  ;;  %v4457_v18 = vrot.slane %v13337_v1, 2  ;;  %v4459_v9 = vrot.slane %v13268_v42, 2 }
 0x3c0   : > { %10680 = vmatmul.mubr.msk.f32.gmra.mrb[6].mxu1 %vm625_vm6, %v13674_v20  ;;  %v4449_v20 = vrot.slane %v13193_v7, 2  ;;  %15659 = vst [vmem:[#allocation40_spill] sm:$0xff] %v13726_v21 }
 0x3c1   : > { %10682 = vmatprep.mubr.msk.f32.mxu1 %vm625_vm6, %v13705_v13  ;;  %v4450_v13 = vrot.slane %v13099_v63, 2  ;;  %v13752_v11 = vsel %vm1375_vm8, %v4455_v37, %v4457_v18 }
 0x3c2   : > { %15663 = vst [vmem:[#allocation51_spill] sm:$0xff] %v13752_v11 }
 0x3c3   : > { %v13731_v52 = vsel %vm1375_vm8, %v4449_v20, %v4450_v13  ;;  %v13745_v20 = vsel %vm1375_vm8, %v4454_v53, %v4455_v37  ;;  %v4465_v53 = vrot.slane %v13162_v41, 2  ;;  %v4467_v37 = vrot.slane %v13350_v36, 2 }
 0x3c4   : > { %15660 = vst [vmem:[#allocation42_spill] sm:$0xff] %v13731_v52  ;;  %15662 = vst [vmem:[#allocation50_spill] sm:$0xff] %v13745_v20 }
 0x3c8   : > { %10683 = vmatmul.mubr.msk.f32.gmra.mrb[6].mxu1 %vm625_vm6, %v13713_v29 }
 0x3c9   : > { %10685 = vmatprep.mubr.msk.f32.mxu1 %vm625_vm6, %v13719_v54  ;;  %v13739_v54 = vsel %vm1375_vm8, %v4450_v13, %v4452_v50  ;;  %v4462_v13 = vrot.slane %v13342_v34, 2  ;;  %v4464_v50 = vrot.slane %v13298_v2, 2  ;;  %v13778_v34 = vsel %vm1375_vm8, %v4465_v53, %v4467_v37 }
 0x3ca   : > { %15661 = vst [vmem:[#allocation49_spill] sm:$0xff] %v13739_v54  ;;  %15667 = vst [vmem:[#allocation56_spill] sm:$0xff] %v13778_v34 }
 0x3cb   : > { %v13771_v18 = vsel %vm1375_vm8, %v4464_v50, %v4465_v53  ;;  %v4475_v50 = vrot.slane %v13213_v43, 2  ;;  %v4477_v53 = vrot.slane %v13370_v51, 2 }
 0x3cc   : > { %10686 = vmatmul.mubr.msk.f32.gmra.mrb[8].mxu1 %vm625_vm6, %v13726_v21  ;;  %15666 = vst [vmem:[#allocation55_spill] sm:$0xff] %v13771_v18 }
 0x3cd   : > { %10688 = vmatprep.mubr.msk.f32.mxu1 %vm625_vm6, %v13731_v52  ;;  %v4460_v52 = vrot.slane %v13142_v62, 2 }
 0x3cf   : > { %v13757_v1 = vsel %vm1375_vm8, %v4459_v9, %v4460_v52  ;;  %v4469_v9 = vrot.slane %v13328_v58, 2 }
 0x3d0   : > { %15664 = vst [vmem:[#allocation52_spill] sm:$0xff] %v13757_v1 }
 0x3d4   : > { %10689 = vmatmul.mubr.msk.f32.gmra.mrb[8].mxu1 %vm625_vm6, %v13739_v54 }
 0x3d5   : > { %10691 = vmatprep.mubr.msk.f32.mxu1 %vm625_vm6, %v13745_v20  ;;  %v13765_v20 = vsel %vm1375_vm8, %v4460_v52, %v4462_v13  ;;  %v4472_v52 = vrot.slane %v15640_v59, 2  ;;  %v4474_v13 = vrot.slane %v13365_v26, 2  ;;  %v13804_v59 = vsel %vm1375_vm8, %v4475_v50, %v4477_v53 }
 0x3d6   : > { %15665 = vst [vmem:[#allocation54_spill] sm:$0xff] %v13765_v20  ;;  %15671 = vst [vmem:[#allocation60_spill] sm:$0xff] %v13804_v59 }
 0x3d7   : > { %v13797_v37 = vsel %vm1375_vm8, %v4474_v13, %v4475_v50  ;;  %v4485_v13 = vrot.slane %v13258_v24, 2  ;;  %v4487_v50 = vrot.slane %v13382_v5, 2 }
 0x3d8   : > { %10692 = vmatmul.mubr.msk.f32.gmra.mrb[10].mxu1 %vm625_vm6, %v13752_v11  ;;  %15670 = vst [vmem:[#allocation18_spill] sm:$0xff] %v13797_v37 }
 0x3d9   : > { %10694 = vmatprep.mubr.msk.f32.mxu1 %vm625_vm6, %v13757_v1  ;;  %v4470_v1 = vrot.slane %v13183_v46, 2 }
 0x3db   : > { %v13783_v36 = vsel %vm1375_vm8, %v4469_v9, %v4470_v1  ;;  %v4479_v9 = vrot.slane %v13389_v6, 2 }
 0x3dc   : > { %15668 = vst [vmem:[#allocation57_spill] sm:$0xff] %v13783_v36 }
 0x3e0   : > { %10695 = vmatmul.mubr.msk.f32.gmra.mrb[10].mxu1 %vm625_vm6, %v13765_v20 }
 0x3e1   : > { %10697 = vmatprep.mubr.msk.f32.mxu1 %vm625_vm6, %v13771_v18  ;;  %v13791_v18 = vsel %vm1375_vm8, %v4470_v1, %v4472_v52  ;;  %v4482_v1 = vrot.slane %v13377_v17, 2  ;;  %v4484_v52 = vrot.slane %v13411_v12, 2  ;;  %v13830_v17 = vsel %vm1375_vm8, %v4485_v13, %v4487_v50 }
 0x3e2   : > { %15669 = vst [vmem:[#allocation59_spill] sm:$0xff] %v13791_v18  ;;  %15675 = vst [vmem:[#allocation64_spill] sm:$0xff] %v13830_v17 }
 0x3e3   : > { %v13823_v53 = vsel %vm1375_vm8, %v4484_v52, %v4485_v13  ;;  %v4495_v52 = vrot.slane %v13303_v28, 2  ;;  %v4497_v13 = vrot.slane %v13399_v30, 2 }
 0x3e4   : > { %10698 = vmatmul.mubr.msk.f32.gmra.mrb[12].mxu1 %vm625_vm6, %v13778_v34  ;;  %15674 = vst [vmem:[#allocation63_spill] sm:$0xff] %v13823_v53 }
 0x3e5   : > { %10700 = vmatprep.mubr.msk.f32.mxu1 %vm625_vm6, %v13783_v36  ;;  %v4480_v36 = vrot.slane %v13233_v8, 2 }
 0x3e7   : > { %v13809_v51 = vsel %vm1375_vm8, %v4479_v9, %v4480_v36  ;;  %v4489_v9 = vrot.slane %v13420_v23, 2 }
 0x3e8   : > { %15672 = vst [vmem:[#allocation61_spill] sm:$0xff] %v13809_v51 }
 0x3ec   : > { %10701 = vmatmul.mubr.msk.f32.gmra.mrb[12].mxu1 %vm625_vm6, %v13791_v18 }
 0x3ed   : > { %10703 = vmatprep.mubr.msk.f32.mxu1 %vm625_vm6, %v13797_v37  ;;  %v13817_v37 = vsel %vm1375_vm8, %v4480_v36, %v4482_v1  ;;  %v4492_v36 = vrot.slane %v13394_v47, 2  ;;  %v4494_v1 = vrot.slane %v13434_v19, 2  ;;  %v13856_v47 = vsel %vm1375_vm8, %v4495_v52, %v4497_v13  ;;  %v15688_v13 = vld [vmem:[#allocation47_spill] sm:$0xff] }
 0x3ee   : > { %15673 = vst [vmem:[#allocation62_spill] sm:$0xff] %v13817_v37  ;;  %15679 = vst [vmem:[#allocation68_spill] sm:$0xff] %v13856_v47 }
 0x3ef   : > { %v13849_v50 = vsel %vm1375_vm8, %v4494_v1, %v4495_v52  ;;  %v9368_v1 = vld [vmem:[%s15231_s3 + $0x14] sm:$0xf]  ;;  %v15687_v52 = vld [vmem:[#allocation46_spill] sm:$0xff] }
 0x3f0   : > { %10704 = vmatmul.mubr.msk.f32.gmra.mrb[14].mxu1 %vm625_vm6, %v13804_v59  ;;  %15678 = vst [vmem:[#allocation67_spill] sm:$0xff] %v13849_v50 }
 0x3f1   : > { %10706 = vmatprep.mubr.msk.f32.mxu1 %vm625_vm6, %v13809_v51  ;;  %v4490_v51 = vrot.slane %v13287_v56, 2 }
 0x3f3   : > { %v13835_v5 = vsel %vm1375_vm8, %v4489_v9, %v4490_v51  ;;  %v4499_v9 = vrot.slane %v13446_v60, 2 }
 0x3f4   : > { %15676 = vst [vmem:[#allocation65_spill] sm:$0xff] %v13835_v5 }
 0x3f8   : > { %10707 = vmatmul.mubr.msk.f32.gmra.mrb[14].mxu1 %vm625_vm6, %v13817_v37 }
 0x3f9   : > { %10709 = vmatprep.mubr.msk.f32.mxu1 %vm625_vm6, %v13823_v53  ;;  %v13843_v53 = vsel %vm1375_vm8, %v4490_v51, %v4492_v36  ;;  %v4502_v51 = vrot.slane %v13402_v27, 2 }
 0x3fa   : > { %15677 = vst [vmem:[#allocation66_spill] sm:$0xff] %v13843_v53 }
 0x3fc   : > { %10710 = vmatmul.mubr.msk.f32.gmra.mrb[16].mxu1 %vm625_vm6, %v13830_v17 }
 0x3fd   : > { %10712 = vmatprep.mubr.msk.f32.mxu1 %vm625_vm6, %v13835_v5  ;;  %v4500_v5 = vrot.slane %v13316_v3, 2 }
 0x3ff   : > { %v13861_v30 = vsel %vm1375_vm8, %v4499_v9, %v4500_v5  ;;  %v13867_v36 = vsel %vm1375_vm8, %v4500_v5, %v4502_v51  ;;  %v15686_v5 = vld [vmem:[#allocation43_spill] sm:$0xff]  ;;  %v15689_v9 = vld [vmem:[#allocation48_spill] sm:$0xff]  ;;  %v15690_v51 = vld [vmem:[#allocation53_spill] sm:$0xff] }
 0x400   : > { %15680 = vst [vmem:[#allocation69_spill] sm:$0xff] %v13861_v30  ;;  %15681 = vst [vmem:[#allocation70_spill] sm:$0xff] %v13867_v36 }
 0x404   : > { %10713 = vmatmul.mubr.msk.f32.gmra.mrb[16].mxu1 %vm625_vm6, %v13843_v53 }
 0x405   : > { %10715 = vmatprep.mubr.msk.f32.mxu1 %vm625_vm6, %v13849_v50 }
 0x408   : > { %10716 = vmatmul.mubr.msk.f32.gmra.mrb[18].mxu1 %vm625_vm6, %v13856_v47 }
 0x409   : > { %10718 = vmatprep.mubr.msk.f32.mxu1 %vm625_vm6, %v13861_v30 }
 0x410   : > { %10719 = vmatmul.mubr.msk.f32.gmra.mrb[18].mxu1 %vm625_vm6, %v13867_v36 }
 0x411   : > { %10723 = vmatprep.mubr.msk.f32.mxu1 %vm625_vm6, %v13060_v4  ;;  %v15682_v4 = vrot.slane %v13424_v35, 7 }
 0x414   : > { %10724 = vmatmul.mubr.msk.f32.vlgmr.msra.gmra.mrb[4].mxu1 %vm625_vm6, %v13025_v39  ;;  %v3496_v39 = vrot.slane %v13424_v35, 1  ;;  %v15683_v35 = vld [vmem:[#allocation16_spill] sm:$0xff] }
 0x415   : > { %10772 = vmatpush3.msk.msra.mxu1 %vm701_vm0, %v13679_v45  ;;  %10726 = vmatprep.mubr.msk.f32.mxu1 %vm625_vm6, %v13038_v33  ;;  %v9402_v45 = vld [vmem:[%s15231_s3 + $0x18] sm:$0xf] }
 0x416   : > { %10821 = vmatprep.subr.msk.mxu1 %vm701_vm0, %v9368_v1  ;;  %v13941_v27 = vsel %vm471_vm3, %v3496_v39, %v15682_v4  ;;  %v15692_v39 = vld [vmem:[#allocation17_spill] sm:$0xff]  ;;  %v15693_v4 = vld [vmem:[#allocation20_spill] sm:$0xff]  ;;  %vm7671_vm3 = vcmask 25600  }
 0x41c   : > { %10727 = vmatmul.mubr.msk.f32.gmra.mrb[4].mxu1 %vm625_vm6, %v13041_v49 }
 0x41d   : > { %10729 = vmatprep.mubr.msk.f32.mxu1 %vm625_vm6, %v13127_v0 }
 0x420   : > { %10730 = vmatmul.mubr.msk.f32.gmra.mrb[6].mxu1 %vm625_vm6, %v13077_v14 }
 0x421   : > { %10732 = vmatprep.mubr.msk.f32.mxu1 %vm625_vm6, %v13155_v48 }
 0x428   : > { %10733 = vmatmul.mubr.msk.f32.gmra.mrb[6].mxu1 %vm625_vm6, %v13089_v40 }
 0x429   : > { %10735 = vmatprep.mubr.msk.f32.mxu1 %vm625_vm6, %v13193_v7 }
 0x42c   : > { %10736 = vmatmul.mubr.msk.f32.gmra.mrb[8].mxu1 %vm625_vm6, %v13099_v63 }
 0x42d   : > { %10738 = vmatprep.mubr.msk.f32.mxu1 %vm625_vm6, %v13226_v10 }
 0x434   : > { %10739 = vmatmul.mubr.msk.f32.gmra.mrb[8].mxu1 %vm625_vm6, %v13119_v44 }
 0x435   : > { %10741 = vmatprep.mubr.msk.f32.mxu1 %vm625_vm6, %v13268_v42 }
 0x438   : > { %10742 = vmatmul.mubr.msk.f32.gmra.mrb[10].mxu1 %vm625_vm6, %v13142_v62 }
 0x439   : > { %10744 = vmatprep.mubr.msk.f32.mxu1 %vm625_vm6, %v13298_v2 }
 0x440   : > { %10745 = vmatmul.mubr.msk.f32.gmra.mrb[10].mxu1 %vm625_vm6, %v13162_v41 }
 0x441   : > { %10747 = vmatprep.mubr.msk.f32.mxu1 %vm625_vm6, %v13328_v58 }
 0x444   : > { %10748 = vmatmul.mubr.msk.f32.gmra.mrb[12].mxu1 %vm625_vm6, %v13183_v46 }
 0x445   : > { %10750 = vmatprep.mubr.msk.f32.mxu1 %vm625_vm6, %v13365_v26 }
 0x44c   : > { %10751 = vmatmul.mubr.msk.f32.gmra.mrb[12].mxu1 %vm625_vm6, %v13213_v43 }
 0x44d   : > { %10753 = vmatprep.mubr.msk.f32.mxu1 %vm625_vm6, %v13389_v6 }
 0x450   : > { %10754 = vmatmul.mubr.msk.f32.gmra.mrb[14].mxu1 %vm625_vm6, %v13233_v8 }
 0x451   : > { %10756 = vmatprep.mubr.msk.f32.mxu1 %vm625_vm6, %v13411_v12 }
 0x458   : > { %10757 = vmatmul.mubr.msk.f32.gmra.mrb[14].mxu1 %vm625_vm6, %v13258_v24 }
 0x459   : > { %10759 = vmatprep.mubr.msk.f32.mxu1 %vm625_vm6, %v13420_v23 }
 0x45c   : > { %10760 = vmatmul.mubr.msk.f32.gmra.mrb[16].mxu1 %vm625_vm6, %v13287_v56 }
 0x45d   : > { %10762 = vmatprep.mubr.msk.f32.mxu1 %vm625_vm6, %v13434_v19 }
 0x464   : > { %10763 = vmatmul.mubr.msk.f32.gmra.mrb[16].mxu1 %vm625_vm6, %v13303_v28 }
 0x465   : > { %10765 = vmatprep.mubr.msk.f32.mxu1 %vm625_vm6, %v13446_v60 }
 0x468   : > { %10766 = vmatmul.mubr.msk.f32.gmra.mrb[18].mxu1 %vm625_vm6, %v13316_v3 }
 0x469   : > { %10768 = vmatprep.mubr.msk.f32.mxu1 %vm625_vm6, %v13941_v27 }
 0x470   : > { %10769 = vmatmul.mubr.msk.f32.gmra.mrb[18].mxu1 %vm625_vm6, %v13441_v32 }
 0x471   : > { %10773 = vmatprep.mubr.msk.f32.mxu1 %vm625_vm6, %v13476_v38  ;;  %v15684_v38 = vld [vmem:[#allocation39_spill] sm:$0xff] }
 0x474   : > { %10774 = vmatmul.mubr.msk.f32.vlgmr.msra.gmra.mrb[4].mxu1 %vm625_vm6, %v13486_v57  ;;  %v15685_v57 = vld [vmem:[#allocation41_spill] sm:$0xff] }
 0x475   : > { %10822 = vmatpush3.msk.msra.mxu1 %vm701_vm0, %v9368_v1  ;;  %10776 = vmatprep.mubr.msk.f32.mxu1 %vm625_vm6, %v13461_v61  ;;  %v15691_v1 = vld [vmem:[#allocation58_spill] sm:$0xff] }
 0x476   : > { %10871 = vmatprep.subr.msk.mxu1 %vm701_vm0, %v9402_v45 }
 0x47c   : > { %10777 = vmatmul.mubr.msk.f32.gmra.mrb[4].mxu1 %vm625_vm6, %v13466_v25 }
 0x47d   : > { %10779 = vmatprep.mubr.msk.f32.mxu1 %vm625_vm6, %v13497_v16 }
 0x480   : > { %10780 = vmatmul.mubr.msk.f32.gmra.mrb[6].mxu1 %vm625_vm6, %v13505_v22 }
 0x481   : > { %10782 = vmatprep.mubr.msk.f32.mxu1 %vm625_vm6, %v15683_v35 }
 0x488   : > { %10783 = vmatmul.mubr.msk.f32.gmra.mrb[6].mxu1 %vm625_vm6, %v15684_v38 }
 0x489   : > { %10785 = vmatprep.mubr.msk.f32.mxu1 %vm625_vm6, %v15685_v57 }
 0x48c   : > { %10786 = vmatmul.mubr.msk.f32.gmra.mrb[8].mxu1 %vm625_vm6, %v15686_v5  ;;  %v15694_v5 = vld [vmem:[#allocation21_spill] sm:$0xff] }
 0x48d   : > { %10788 = vmatprep.mubr.msk.f32.mxu1 %vm625_vm6, %v15687_v52  ;;  %v15695_v52 = vld [vmem:[#allocation22_spill] sm:$0xff] }
 0x494   : > { %10789 = vmatmul.mubr.msk.f32.gmra.mrb[8].mxu1 %vm625_vm6, %v15688_v13  ;;  %v15696_v13 = vld [vmem:[#allocation24_spill] sm:$0xff] }
 0x495   : > { %10791 = vmatprep.mubr.msk.f32.mxu1 %vm625_vm6, %v15689_v9  ;;  %v15697_v9 = vld [vmem:[#allocation23_spill] sm:$0xff] }
 0x498   : > { %10792 = vmatmul.mubr.msk.f32.gmra.mrb[10].mxu1 %vm625_vm6, %v15690_v51  ;;  %v15698_v51 = vld [vmem:[#allocation25_spill] sm:$0xff] }
 0x499   : > { %10794 = vmatprep.mubr.msk.f32.mxu1 %vm625_vm6, %v15691_v1  ;;  %v15699_v1 = vld [vmem:[#allocation26_spill] sm:$0xff] }
 0x4a0   : > { %10795 = vmatmul.mubr.msk.f32.gmra.mrb[10].mxu1 %vm625_vm6, %v15692_v39  ;;  %v15700_v39 = vld [vmem:[#allocation27_spill] sm:$0xff] }
 0x4a1   : > { %10797 = vmatprep.mubr.msk.f32.mxu1 %vm625_vm6, %v15693_v4  ;;  %v15701_v4 = vld [vmem:[#allocation28_spill] sm:$0xff] }
 0x4a4   : > { %10798 = vmatmul.mubr.msk.f32.gmra.mrb[12].mxu1 %vm625_vm6, %v15694_v5  ;;  %v15702_v5 = vld [vmem:[#allocation29_spill] sm:$0xff] }
 0x4a5   : > { %10800 = vmatprep.mubr.msk.f32.mxu1 %vm625_vm6, %v15695_v52  ;;  %v15703_v52 = vld [vmem:[#allocation30_spill] sm:$0xff] }
 0x4ac   : > { %10801 = vmatmul.mubr.msk.f32.gmra.mrb[12].mxu1 %vm625_vm6, %v15696_v13  ;;  %v5095_v13 = vrot.slane %v13441_v32, 1 }
 0x4ad   : > { %10803 = vmatprep.mubr.msk.f32.mxu1 %vm625_vm6, %v15697_v9  ;;  %v5094_v9 = vrot.slane %v13941_v27, 1 }
 0x4b0   : > { %10804 = vmatmul.mubr.msk.f32.gmra.mrb[14].mxu1 %vm625_vm6, %v15698_v51  ;;  %v15704_v51 = vld [vmem:[#allocation31_spill] sm:$0xff] }
 0x4b1   : > { %10806 = vmatprep.mubr.msk.f32.mxu1 %vm625_vm6, %v15699_v1  ;;  %v15705_v1 = vld [vmem:[#allocation32_spill] sm:$0xff] }
 0x4b8   : > { %10807 = vmatmul.mubr.msk.f32.gmra.mrb[14].mxu1 %vm625_vm6, %v15700_v39 }
 0x4b9   : > { %10809 = vmatprep.mubr.msk.f32.mxu1 %vm625_vm6, %v15701_v4  ;;  %v14015_v4 = vsel %vm977_vm1, %v5094_v9, %v5095_v13  ;;  %v15709_v9 = vld [vmem:[#allocation34_spill] sm:$0xff] }
 0x4ba   : > { %15706 = vst [vmem:[#allocation16_spill] sm:$0xff] %v14015_v4 }
 0x4bc   : > { %10810 = vmatmul.mubr.msk.f32.gmra.mrb[16].mxu1 %vm625_vm6, %v15702_v5 }
 0x4bd   : > { %10812 = vmatprep.mubr.msk.f32.mxu1 %vm625_vm6, %v15703_v52  ;;  %v15707_v52 = vld [vmem:[#allocation19_spill] sm:$0xff] }
 0x4be   : > { %v5097_v5 = vrot.slane %v15707_v52, 1 }
 0x4c0   : > { %v14021_v39 = vsel %vm977_vm1, %v5095_v13, %v5097_v5  ;;  %v15710_v5 = vld [vmem:[#allocation35_spill] sm:$0xff]  ;;  %v15711_v13 = vld [vmem:[#allocation36_spill] sm:$0xff]  ;;  %vm8256_vm1 = vcmask 1041409  }
 0x4c1   : > { %15708 = vst [vmem:[#allocation39_spill] sm:$0xff] %v14021_v39 }
 0x4c4   : > { %10813 = vmatmul.mubr.msk.f32.gmra.mrb[16].mxu1 %vm625_vm6, %v15704_v51 }
 0x4c5   : > { %10815 = vmatprep.mubr.msk.f32.mxu1 %vm625_vm6, %v15705_v1  ;;  %v15748_v1 = vld [vmem:[#allocation45_spill] sm:$0xff] }
 0x4c8   : > { %10816 = vmatmul.mubr.msk.f32.gmra.mrb[18].mxu1 %vm625_vm6, %v13662_v15  ;;  %v9436_v15 = vld [vmem:[%s15231_s3 + $0x1c] sm:$0xf] }
 0x4c9   : > { %10818 = vmatprep.mubr.msk.f32.mxu1 %vm625_vm6, %v14015_v4 }
 0x4d0   : > { %10819 = vmatmul.mubr.msk.f32.gmra.mrb[18].mxu1 %vm625_vm6, %v14021_v39 }
 0x4d1   : > { %10823 = vmatprep.mubr.msk.f32.mxu1 %vm625_vm6, %v13684_v55  ;;  %v15712_v55 = vld [vmem:[#allocation38_spill] sm:$0xff] }
 0x4d4   : > { %10824 = vmatmul.mubr.msk.f32.vlgmr.msra.gmra.mrb[4].mxu1 %vm625_vm6, %v13694_v31  ;;  %v15713_v31 = vld [vmem:[#allocation42_spill] sm:$0xff] }
 0x4d5   : > { %10872 = vmatpush3.msk.msra.mxu1 %vm701_vm0, %v9402_v45  ;;  %10826 = vmatprep.mubr.msk.f32.mxu1 %vm625_vm6, %v15709_v9  ;;  %v15714_v45 = vld [vmem:[#allocation50_spill] sm:$0xff] }
 0x4d6   : > { %10921 = vmatprep.subr.msk.mxu1 %vm701_vm0, %v9436_v15 }
 0x4dc   : > { %10827 = vmatmul.mubr.msk.f32.gmra.mrb[4].mxu1 %vm625_vm6, %v15710_v5 }
 0x4dd   : > { %10829 = vmatprep.mubr.msk.f32.mxu1 %vm625_vm6, %v15711_v13  ;;  %v15715_v13 = vld [vmem:[#allocation52_spill] sm:$0xff] }
 0x4e0   : > { %10830 = vmatmul.mubr.msk.f32.gmra.mrb[6].mxu1 %vm625_vm6, %v13713_v29 }
 0x4e1   : > { %10832 = vmatprep.mubr.msk.f32.mxu1 %vm625_vm6, %v15712_v55  ;;  %v15716_v55 = vld [vmem:[#allocation55_spill] sm:$0xff] }
 0x4e8   : > { %10833 = vmatmul.mubr.msk.f32.gmra.mrb[6].mxu1 %vm625_vm6, %v13726_v21 }
 0x4e9   : > { %10835 = vmatprep.mubr.msk.f32.mxu1 %vm625_vm6, %v15713_v31  ;;  %v15717_v31 = vld [vmem:[#allocation57_spill] sm:$0xff] }
 0x4ec   : > { %10836 = vmatmul.mubr.msk.f32.gmra.mrb[8].mxu1 %vm625_vm6, %v13739_v54 }
 0x4ed   : > { %10838 = vmatprep.mubr.msk.f32.mxu1 %vm625_vm6, %v15714_v45  ;;  %v15718_v45 = vld [vmem:[#allocation18_spill] sm:$0xff] }
 0x4f4   : > { %10839 = vmatmul.mubr.msk.f32.gmra.mrb[8].mxu1 %vm625_vm6, %v13752_v11 }
 0x4f5   : > { %10841 = vmatprep.mubr.msk.f32.mxu1 %vm625_vm6, %v15715_v13  ;;  %v15719_v13 = vld [vmem:[#allocation61_spill] sm:$0xff] }
 0x4f8   : > { %10842 = vmatmul.mubr.msk.f32.gmra.mrb[10].mxu1 %vm625_vm6, %v13765_v20 }
 0x4f9   : > { %10844 = vmatprep.mubr.msk.f32.mxu1 %vm625_vm6, %v15716_v55  ;;  %v15720_v55 = vld [vmem:[#allocation63_spill] sm:$0xff] }
 0x500   : > { %10845 = vmatmul.mubr.msk.f32.gmra.mrb[10].mxu1 %vm625_vm6, %v13778_v34 }
 0x501   : > { %10847 = vmatprep.mubr.msk.f32.mxu1 %vm625_vm6, %v15717_v31  ;;  %v15721_v31 = vld [vmem:[#allocation65_spill] sm:$0xff] }
 0x504   : > { %10848 = vmatmul.mubr.msk.f32.gmra.mrb[12].mxu1 %vm625_vm6, %v13791_v18 }
 0x505   : > { %10850 = vmatprep.mubr.msk.f32.mxu1 %vm625_vm6, %v15718_v45  ;;  %v15735_v45 = vld [vmem:[#allocation9_spill] sm:$0xff] }
 0x50c   : > { %10851 = vmatmul.mubr.msk.f32.gmra.mrb[12].mxu1 %vm625_vm6, %v13804_v59  ;;  %v5366_v59 = vrot.slane %v13441_v32, 2 }
 0x50d   : > { %10853 = vmatprep.mubr.msk.f32.mxu1 %vm625_vm6, %v15719_v13  ;;  %v5365_v13 = vrot.slane %v13941_v27, 2 }
 0x510   : > { %10854 = vmatmul.mubr.msk.f32.gmra.mrb[14].mxu1 %vm625_vm6, %v13817_v37 }
 0x511   : > { %10856 = vmatprep.mubr.msk.f32.mxu1 %vm625_vm6, %v15720_v55 }
 0x518   : > { %10857 = vmatmul.mubr.msk.f32.gmra.mrb[14].mxu1 %vm625_vm6, %v13830_v17 }
 0x519   : > { %10859 = vmatprep.mubr.msk.f32.mxu1 %vm625_vm6, %v15721_v31  ;;  %v14093_v31 = vsel %vm1375_vm8, %v5365_v13, %v5366_v59 }
 0x51a   : > { %15722 = vst [vmem:[#allocation41_spill] sm:$0xff] %v14093_v31 }
 0x51c   : > { %10860 = vmatmul.mubr.msk.f32.gmra.mrb[16].mxu1 %vm625_vm6, %v13843_v53 }
 0x51d   : > { %10862 = vmatprep.mubr.msk.f32.mxu1 %vm625_vm6, %v13849_v50  ;;  %v5368_v50 = vrot.slane %v15707_v52, 2 }
 0x51f   : > { %v14099_v53 = vsel %vm1375_vm8, %v5366_v59, %v5368_v50  ;;  %vm8258_vm8 = vcmask 1042434  }
 0x520   : > { %15723 = vst [vmem:[#allocation19_spill] sm:$0xff] %v14099_v53 }
 0x524   : > { %10863 = vmatmul.mubr.msk.f32.gmra.mrb[16].mxu1 %vm625_vm6, %v13856_v47 }
 0x525   : > { %10865 = vmatprep.mubr.msk.f32.mxu1 %vm625_vm6, %v13861_v30  ;;  %v15732_v30 = vld [vmem:[#allocation44_spill] sm:$0xff] }
 0x526   : > { %v7573_v55 = vcombine.high %v15732_v30, %v15732_v30 }
 0x528   : > { %10866 = vmatmul.mubr.msk.f32.gmra.mrb[18].mxu1 %vm625_vm6, %v13867_v36  ;;  %v14108_v36 = vld [vmem:[%s15231_s3 + $0x20] sm:$0xf] }
 0x529   : > { %10868 = vmatprep.mubr.msk.f32.mxu1 %vm625_vm6, %v14093_v31 }
 0x530   : > { %10869 = vmatmul.mubr.msk.f32.gmra.mrb[18].mxu1 %vm625_vm6, %v14099_v53 }
 0x531   : > { %10873 = vmatprep.mubr.msk.f32.mxu1 %vm625_vm6, %v13038_v33  ;;  %v11647_v33 = vmov 1983009808  }
 0x534   : > { %10874 = vmatmul.mubr.msk.f32.vlgmr.msra.gmra.mrb[4].mxu1 %vm625_vm6, %v13041_v49  ;;  %v6456_v49 = vunpack.c.l.s4 %v11647_v33 }
 0x535   : > { %10922 = vmatpush3.msk.msra.mxu1 %vm701_vm0, %v9436_v15  ;;  %10876 = vmatprep.mubr.msk.f32.mxu1 %vm625_vm6, %v13127_v0  ;;  %v15724_v0 = vld [vmem:[#allocation4_spill] sm:$0xff] }
 0x536   : > { %10971 = vmatprep.subr.msk.mxu1 %vm701_vm0, %v14108_v36 }
 0x53c   : > { %10877 = vmatmul.mubr.msk.f32.gmra.mrb[4].mxu1 %vm625_vm6, %v13077_v14  ;;  %v6458_v14 = vlaneseq }
 0x53d   : > { %10879 = vmatprep.mubr.msk.f32.mxu1 %vm625_vm6, %v13155_v48  ;;  %v7369_v48 = vcombine.high %v15724_v0, %v15724_v0 }
 0x540   : > { %10880 = vmatmul.mubr.msk.f32.gmra.mrb[6].mxu1 %vm625_vm6, %v13089_v40  ;;  %v6457_v40 = vunpack.c.0.s8 %v6456_v49 }
 0x541   : > { %10882 = vmatprep.mubr.msk.f32.mxu1 %vm625_vm6, %v13193_v7 }
 0x548   : > { %10883 = vmatmul.mubr.msk.f32.gmra.mrb[6].mxu1 %vm625_vm6, %v13099_v63  ;;  %v6459_v63 = vshrl.u32 %v6458_v14, 7 }
 0x549   : > { %10885 = vmatprep.mubr.msk.f32.mxu1 %vm625_vm6, %v13226_v10 }
 0x54c   : > { %10886 = vmatmul.mubr.msk.f32.gmra.mrb[8].mxu1 %vm625_vm6, %v13119_v44  ;;  %v14141_v44 = vsub.s32 %v6457_v40, %v6459_v63  ;;  %v15726_v63 = vld [vmem:[#allocation5_spill] sm:$0xff] }
 0x54d   : > { %10888 = vmatprep.mubr.msk.f32.mxu1 %vm625_vm6, %v13268_v42 }
 0x54e   : > { %v7580_v47 = vrot.slane %v15732_v30, %v14141_v44 }
 0x550   : > { %v7588_v29 = vcombine.high %v7580_v47, %v7580_v47 }
 0x554   : > { %10889 = vmatmul.mubr.msk.f32.gmra.mrb[8].mxu1 %vm625_vm6, %v13142_v62  ;;  %v7376_v62 = vrot.slane %v15724_v0, %v14141_v44  ;;  %v14182_v0 = vrot.slane %v15726_v63, %v14141_v44 }
 0x555   : > { %10891 = vmatprep.mubr.msk.f32.mxu1 %vm625_vm6, %v13298_v2  ;;  %v7383_v2 = vrot.slane %v7369_v48, %v14141_v44 }
 0x556   : > { %v7728_v7 = vsel %vm7671_vm3, %v7376_v62, 0.0 }
 0x557   : > { %v7742_v52 = vsel %vm7671_vm3, %v7383_v2, 0.0 }
 0x558   : > { %10892 = vmatmul.mubr.msk.f32.gmra.mrb[10].mxu1 %vm625_vm6, %v13162_v41  ;;  %v7384_v41 = vcombine.high %v7376_v62, %v7376_v62  ;;  %v7743_v14 = vrot.slane %v7742_v52, 4  ;;  %v15727_v62 = vld [vmem:[#allocation6_spill] sm:$0xff] }
 0x559   : > { %10894 = vmatprep.mubr.msk.f32.mxu1 %vm625_vm6, %v13328_v58  ;;  %v7729_v58 = vrot.slane %v7728_v7, 4  ;;  %v7410_v48 = vrot.slane %v15727_v62, %v14141_v44 }
 0x55b   : > { %v7730_v59 = vadd.f32 %v7729_v58, %v7728_v7  ;;  %v7784_v58 = vsel %vm7671_vm3, %v7410_v48, 0.0 }
 0x560   : > { %10895 = vmatmul.mubr.msk.f32.gmra.mrb[10].mxu1 %vm625_vm6, %v13183_v46  ;;  %v15725_v46 = vld [vmem:[#allocation2_spill] sm:$0xff] }
 0x561   : > { %10897 = vmatprep.mubr.msk.f32.mxu1 %vm625_vm6, %v13365_v26  ;;  %v7342_v10 = vrot.slane %v15725_v46, %v14141_v44  ;;  %v7335_v42 = vcombine.high %v15725_v46, %v15725_v46  ;;  %v7403_v46 = vcombine.high %v15727_v62, %v15727_v62 }
 0x563   : > { %v7350_v26 = vcombine.high %v7342_v10, %v7342_v10  ;;  %v14166_v15 = vrot.slane %v7335_v42, %v14141_v44  ;;  %v14193_v42 = vadd.f32 %v7743_v14, %v7742_v52 }
 0x564   : > { %10898 = vmatmul.mubr.msk.f32.gmra.mrb[12].mxu1 %vm625_vm6, %v13213_v43  ;;  %v7735_v43 = vsel %vm7671_vm3, %v7384_v41, 0.0 }
 0x565   : > { %10900 = vmatprep.mubr.msk.f32.mxu1 %vm625_vm6, %v13389_v6  ;;  %v7672_v6 = vsel %vm7671_vm3, %v7342_v10, 0.0  ;;  %v7736_v50 = vrot.slane %v7735_v43, 4  ;;  %v7679_v33 = vsel %vm7671_vm3, %v7350_v26, 0.0  ;;  %v14176_v49 = vsel %vm7671_vm3, %v14166_v15, 0.0  ;;  %v15728_v10 = vld [vmem:[#allocation3_spill] sm:$0xff] }
 0x566   : > { %v7673_v13 = vrot.slane %v7672_v6, 4  ;;  %v14210_v52 = vrot.slane %v15728_v10, %v14141_v44 }
 0x567   : > { %v7737_v40 = vadd.f32 %v7736_v50, %v7735_v43  ;;  %v7418_v50 = vcombine.high %v7410_v48, %v7410_v48  ;;  %v7785_v48 = vrot.slane %v7784_v58, 4 }
 0x568   : > { %v14186_v41 = vadd.f32 %v7673_v13, %v7672_v6  ;;  %v14203_v6 = vsel %vm7671_vm3, %v14182_v0, 0.0  ;;  %v15731_v13 = vld [vmem:[#allocation12_spill] sm:$0xff] }
 0x569   : > { %v7738_v26 = vrot.slane %v7737_v40, 2  ;;  %v14233_v53 = vsel %vm7671_vm3, %v7418_v50, 0.0  ;;  %v7512_v31 = vrot.slane %v15731_v13, %v14141_v44  ;;  %v7505_v21 = vcombine.high %v15731_v13, %v15731_v13 }
 0x56b   : > { %v14230_v62 = vadd.f32 %v7738_v26, %v7737_v40  ;;  %v14245_v40 = vadd.f32 %v7785_v48, %v7784_v58  ;;  %v15733_v26 = vld [vmem:[#allocation7_spill] sm:$0xff]  ;;  %v7520_v18 = vcombine.high %v7512_v31, %v7512_v31  ;;  %v7952_v34 = vsel %vm7671_vm3, %v7512_v31, 0.0 }
 0x56c   : > { %10901 = vmatmul.mubr.msk.f32.gmra.mrb[12].mxu1 %vm625_vm6, %v13233_v8  ;;  %v7385_v8 = vcombine.high %v7383_v2, %v7383_v2  ;;  %v14249_v50 = vrot.slane %v15733_v26, %v14141_v44  ;;  %v7953_v31 = vrot.slane %v7952_v34, 4 }
 0x56d   : > { %10903 = vmatprep.mubr.msk.f32.mxu1 %vm625_vm6, %v13411_v12  ;;  %v7731_v12 = vrot.slane %v7730_v59, 2  ;;  %v14297_v13 = vsel %vm7671_vm3, %v7520_v18, 0.0 }
 0x56e   : > { %v14196_v2 = vsel %vm7671_vm3, %v7385_v8, 0.0  ;;  %v15729_v8 = vld [vmem:[#allocation8_spill] sm:$0xff]  ;;  %15738 = vst [vmem:[#allocation2_spill] sm:$0xff] %v14297_v13 }
 0x56f   : > { %v14199_v43 = vadd.f32 %v7731_v12, %v7730_v59  ;;  %v7444_v14 = vrot.slane %v15729_v8, %v14141_v44 }
 0x570   : > { %10904 = vmatmul.mubr.msk.f32.gmra.mrb[14].mxu1 %vm625_vm6, %v13258_v24  ;;  %v7680_v24 = vrot.slane %v7679_v33, 4 }
 0x571   : > { %10906 = vmatprep.mubr.msk.f32.mxu1 %vm625_vm6, %v13420_v23  ;;  %v15730_v23 = vld [vmem:[#allocation10_spill] sm:$0xff] }
 0x572   : > { %v14206_v7 = vadd.f32 %v7680_v24, %v7679_v33  ;;  %v7478_v59 = vrot.slane %v15730_v23, %v14141_v44  ;;  %v7452_v33 = vcombine.high %v7444_v14, %v7444_v14  ;;  %v7840_v24 = vsel %vm7671_vm3, %v7444_v14, 0.0 }
 0x573   : > { %v7841_v37 = vrot.slane %v7840_v24, 4  ;;  %v7471_v30 = vcombine.high %v15730_v23, %v15730_v23 }
 0x574   : > { %v7486_v14 = vcombine.high %v7478_v59, %v7478_v59  ;;  %v7896_v17 = vsel %vm7671_vm3, %v7478_v59, 0.0  ;;  %v14270_v59 = vsel %vm7671_vm3, %v7452_v33, 0.0  ;;  %v14282_v33 = vrot.slane %v7573_v55, %v14141_v44 }
 0x575   : > { %v7897_v20 = vrot.slane %v7896_v17, 4  ;;  %v14284_v5 = vadd.f32 %v7841_v37, %v7840_v24  ;;  %v7682_v51 = vrot.slane %v14206_v7, 2 }
 0x576   : > { %v14277_v54 = vsel %vm7671_vm3, %v7486_v14, 0.0  ;;  %15736 = vst [vmem:[#allocation4_spill] sm:$0xff] %v14282_v33  ;;  %v15737_v14 = vld [vmem:[#allocation11_spill] sm:$0xff] }
 0x577   : > { %v14294_v39 = vrot.slane %v15737_v14, %v14141_v44 }
 0x578   : > { %10907 = vmatmul.mubr.msk.f32.gmra.mrb[14].mxu1 %vm625_vm6, %v13287_v56  ;;  %v7437_v56 = vcombine.high %v15729_v8, %v15729_v8  ;;  %v15734_v8 = vld [vmem:[#allocation14_spill] sm:$0xff] }
 0x579   : > { %10909 = vmatprep.mubr.msk.f32.mxu1 %vm625_vm6, %v13434_v19  ;;  %v14243_v19 = vrot.slane %v7403_v46, %v14141_v44  ;;  %v7546_v12 = vrot.slane %v15734_v8, %v14141_v44  ;;  %v8064_v46 = vsel %vm7671_vm3, %v7580_v47, 0.0  ;;  %v7539_v9 = vcombine.high %v15734_v8, %v15734_v8 }
 0x57a   : > { %v14263_v48 = vrot.slane %v7437_v56, %v14141_v44  ;;  %v8065_v56 = vrot.slane %v8064_v46, 4  ;;  %v14299_v47 = vadd.f32 %v7897_v20, %v7896_v17  ;;  %v14310_v8 = vrot.slane %v7505_v21, %v14141_v44 }
 0x57b   : > { %v7554_v11 = vcombine.high %v7546_v12, %v7546_v12  ;;  %v8008_v58 = vsel %vm7671_vm3, %v7546_v12, 0.0  ;;  %v14290_v12 = vrot.slane %v7471_v30, %v14141_v44  ;;  %v15741_v30 = vld [vmem:[#allocation13_spill] sm:$0xff]  ;;  %v14317_v20 = vsel %vm7671_vm3, %v7588_v29, 0.0 }
 0x57c   : > { %10910 = vmatmul.mubr.msk.f32.gmra.mrb[16].mxu1 %vm625_vm6, %v13303_v28  ;;  %v14267_v28 = vrot.slane %v15735_v45, %v14141_v44  ;;  %v8009_v55 = vrot.slane %v8008_v58, 4  ;;  %v14305_v23 = vadd.f32 %v8065_v56, %v8064_v46  ;;  %v14314_v18 = vrot.slane %v15741_v30, %v14141_v44  ;;  %v15745_v56 = vld [vmem:[#allocation15_spill] sm:$0xff] }
 0x57d   : > { %10912 = vmatprep.mubr.msk.f32.mxu1 %vm625_vm6, %v13446_v60  ;;  %v14303_v24 = vsel %vm7671_vm3, %v7554_v11, 0.0  ;;  %v14321_v17 = vsel %vm7671_vm3, %v14282_v33, 0.0  ;;  %v14325_v11 = vadd.f32 %v7953_v31, %v7952_v34  ;;  %v14329_v21 = vrot.slane %v7539_v9, %v14141_v44 }
 0x57e   : > { %15739 = vst [vmem:[#allocation5_spill] sm:$0xff] %v14303_v24  ;;  %15740 = vst [vmem:[#allocation6_spill] sm:$0xff] %v14305_v23  ;;  %v14333_v37 = vrot.slane %v15745_v56, %v14141_v44  ;;  %v14335_v29 = vadd.f32 %v8009_v55, %v8008_v58  ;;  %v14342_v34 = vrot.slane %v15748_v1, %v14141_v44  ;;  %v8184_v58 = vld [vmem:[%s15233_s5] sm:$0xf] }
 0x57f   : > { %15742 = vst [vmem:[#allocation3_spill] sm:$0xff] %v14321_v17  ;;  %15743 = vst [vmem:[#allocation8_spill] sm:$0xff] %v14325_v11  ;;  %11021 = vmatprep.subr.msk.mxu0 %vm701_vm0, %v8184_v58  ;;  %v15750_v55 = vcombine.high %v15728_v10, %v15728_v10  ;;  %v7367_v46 = vcombine.high %v14210_v52, %v14210_v52  ;;  %v15753_v31 = vcombine.high %v14166_v15, %v14166_v15 }
 0x580   : > { %15744 = vst [vmem:[#allocation10_spill] sm:$0xff] %v14329_v21  ;;  %15746 = vst [vmem:[#allocation12_spill] sm:$0xff] %v14333_v37  ;;  %11022 = vmatpush3.msk.msra.mxu0 %vm701_vm0, %v8184_v58 }
 0x581   : > { %15747 = vst [vmem:[#allocation44_spill] sm:$0xff] %v14335_v29  ;;  %15749 = vst [vmem:[#allocation7_spill] sm:$0xff] %v14342_v34  ;;  %v7693_v10 = vsel %vm7671_vm3, %v15753_v31, 0.0  ;;  %v7707_v34 = vsel %vm7671_vm3, %v7367_v46, 0.0 }
 0x582   : > { %v7708_v24 = vrot.slane %v7707_v34, 4 }
 0x584   : > { %10913 = vmatmul.mubr.msk.f32.gmra.mrb[16].mxu1 %vm625_vm6, %v13316_v3  ;;  %v7709_v13 = vadd.f32 %v7708_v24, %v7707_v34 }
 0x585   : > { %10915 = vmatprep.mubr.msk.f32.mxu1 %vm625_vm6, %v13941_v27  ;;  %v7366_v27 = vrot.slane %v15750_v55, %v14141_v44  ;;  %v7700_v55 = vsel %vm7671_vm3, %v14210_v52, 0.0 }
 0x586   : > { %v7701_v58 = vrot.slane %v7700_v55, 4 }
 0x587   : > { %v7368_v33 = vcombine.high %v7366_v27, %v7366_v27 }
 0x588   : > { %10916 = vmatmul.mubr.msk.f32.gmra.mrb[18].mxu1 %vm625_vm6, %v13441_v32  ;;  %v15751_v32 = vrot.slane %v14186_v41, 2  ;;  %v7702_v29 = vadd.f32 %v7701_v58, %v7700_v55 }
 0x589   : > { %10918 = vmatprep.mubr.msk.f32.mxu1 %vm625_vm6, %v13446_v60  ;;  %v15752_v60 = vrot.slane %v14176_v49, 4  ;;  %v7721_v52 = vsel %vm7671_vm3, %v7368_v33, 0.0 }
 0x58a   : > { %v7676_v9 = vadd.f32 %v15751_v32, %v14186_v41  ;;  %v7683_v41 = vadd.f32 %v7682_v51, %v14206_v7  ;;  %v7694_v32 = vrot.slane %v7693_v10, 4  ;;  %v7722_v51 = vrot.slane %v7721_v52, 4 }
 0x58b   : > { %v7688_v4 = vadd.f32 %v15752_v60, %v14176_v49  ;;  %v7714_v49 = vsel %vm7671_vm3, %v7366_v27, 0.0  ;;  %v7703_v46 = vrot.slane %v7702_v29, 2 }
 0x58c   : > { %v7677_v17 = vrot.slane %v7676_v9, 1  ;;  %v7684_v1 = vrot.slane %v7683_v41, 1  ;;  %v7695_v15 = vadd.f32 %v7694_v32, %v7693_v10  ;;  %v7715_v37 = vrot.slane %v7714_v49, 4 }
 0x58d   : > { %v7689_v23 = vrot.slane %v7688_v4, 2  ;;  %v7704_v33 = vadd.f32 %v7703_v46, %v7702_v29 }
 0x58e   : > { %v7678_v60 = vadd.f32 %v7677_v17, %v7676_v9  ;;  %v7685_v56 = vadd.f32 %v7684_v1, %v7683_v41  ;;  %v7696_v21 = vrot.slane %v7695_v15, 2  ;;  %v7716_v11 = vadd.f32 %v7715_v37, %v7714_v49 }
 0x58f   : > { %v7690_v31 = vadd.f32 %v7689_v23, %v7688_v4  ;;  %v7710_v4 = vrot.slane %v7709_v13, 2  ;;  %v7723_v23 = vadd.f32 %v7722_v51, %v7721_v52  ;;  %v7705_v37 = vrot.slane %v7704_v33, 1 }
 0x590   : > { %10919 = vmatmul.mubr.msk.f32.gmra.mrb[18].mxu1 %vm625_vm6, %v13316_v3  ;;  %v8120_v27 = vmul.f32 0.25, %v7678_v60  ;;  %v7697_v17 = vadd.f32 %v7696_v21, %v7695_v15  ;;  %v8121_v9 = vmul.f32 0.25, %v7685_v56  ;;  %v7717_v1 = vrot.slane %v7716_v11, 2 }
 0x591   : > { %v7691_v7 = vrot.slane %v7690_v31, 1  ;;  %10923 = vmatprep.mubr.msk.f32.mxu1 %vm625_vm6, %v13461_v61  ;;  %v7711_v34 = vadd.f32 %v7710_v4, %v7709_v13  ;;  %v7724_v55 = vrot.slane %v7723_v23, 2  ;;  %v7706_v13 = vadd.f32 %v7705_v37, %v7704_v33 }
 0x592   : > { %v7698_v24 = vrot.slane %v7697_v17, 1  ;;  %v8257_v3 = vsel %vm8256_vm1, %v8121_v9, %v8120_v27  ;;  %v7718_v41 = vadd.f32 %v7717_v1, %v7716_v11  ;;  %v15757_v1 = vrot.slane %v14196_v2, 4 }
 0x593   : > { %v7692_v10 = vadd.f32 %v7691_v7, %v7690_v31  ;;  %v7712_v21 = vrot.slane %v7711_v34, 1  ;;  %v7725_v56 = vadd.f32 %v7724_v55, %v7723_v23  ;;  %v8124_v15 = vmul.f32 0.25, %v7706_v13 }
 0x594   : > { %10924 = vmatmul.mubr.msk.f32.vlgmr.msra.gmra.mrb[4].mxu1 %vm625_vm6, %v13466_v25  ;;  %v7699_v61 = vadd.f32 %v7698_v24, %v7697_v17  ;;  %v7719_v29 = vrot.slane %v7718_v41, 1  ;;  %v15755_v7 = vrot.slane %v14199_v43, 1  ;;  %v7740_v23 = vrot.slane %v14230_v62, 1 }
 0x595   : > { %v8122_v32 = vmul.f32 0.25, %v7692_v10  ;;  %10972 = vmatpush3.msk.msra.mxu1 %vm701_vm0, %v14108_v36  ;;  %10926 = vmatprep.mubr.msk.f32.mxu1 %vm625_vm6, %v13497_v16  ;;  %v7713_v25 = vadd.f32 %v7712_v21, %v7711_v34  ;;  %v7726_v49 = vrot.slane %v7725_v56, 1  ;;  %v15754_v16 = vcombine.high %v15726_v63, %v15726_v63 }
 0x596   : > { %v8123_v11 = vmul.f32 0.25, %v7699_v61  ;;  %v7720_v60 = vadd.f32 %v7719_v29, %v7718_v41  ;;  %v7734_v46 = vadd.f32 %v15755_v7, %v14199_v43  ;;  %v15756_v63 = vrot.slane %v14193_v42, 2 }
 0x597   : > { %v8259_v58 = vsel %vm8258_vm8, %v8122_v32, %v8257_v3  ;;  %v7400_v36 = vrot.slane %v15754_v16, %v14141_v44  ;;  %v7727_v31 = vadd.f32 %v7726_v49, %v7725_v56  ;;  %v8125_v52 = vmul.f32 0.25, %v7713_v25 }
 0x598   : > { %v8261_v51 = vsel %vm8260_vm10, %v8123_v11, %v8259_v58  ;;  %v8126_v27 = vmul.f32 0.25, %v7720_v60  ;;  %v7746_v33 = vadd.f32 %v15756_v63, %v14193_v42  ;;  %v7751_v24 = vadd.f32 %v15757_v1, %v14196_v2 }
 0x599   : > { %v8263_v17 = vsel %vm8262_vm11, %v8124_v15, %v8261_v51  ;;  %v7402_v4 = vcombine.high %v7400_v36, %v7400_v36  ;;  %v8127_v9 = vmul.f32 0.25, %v7727_v31  ;;  %v7741_v34 = vadd.f32 %v7740_v23, %v14230_v62 }
 0x59a   : > { %v8265_v10 = vsel %vm8264_vm12, %v8125_v52, %v8263_v17  ;;  %v15758_v55 = vrot.slane %v14203_v6, 4  ;;  %v15759_v37 = vcombine.high %v14182_v0, %v14182_v0  ;;  %v7747_v41 = vrot.slane %v7746_v33, 1 }
 0x59b   : > { %v8267_v43 = vsel %vm8266_vm13, %v8126_v27, %v8265_v10  ;;  %v7770_v61 = vsel %vm7671_vm3, %v7400_v36, 0.0  ;;  %v8128_v21 = vmul.f32 0.25, %v7734_v46  ;;  %v8129_v11 = vmul.f32 0.25, %v7741_v34 }
 0x59c   : > { %10927 = vmatmul.mubr.msk.f32.gmra.mrb[4].mxu1 %vm625_vm6, %v13505_v22  ;;  %v7758_v3 = vadd.f32 %v15758_v55, %v14203_v6  ;;  %v7763_v42 = vsel %vm7671_vm3, %v15759_v37, 0.0  ;;  %v8269_v2 = vsel %vm8268_vm14, %v8127_v9, %v8267_v43  ;;  %v7752_v22 = vrot.slane %v7751_v24, 2 }
 0x59d   : > { %10929 = vmatprep.mubr.msk.f32.mxu1 %vm625_vm6, %v15683_v35  ;;  %v7764_v32 = vrot.slane %v7763_v42, 4  ;;  %11023 = vmatprep.mubr.msk.f32.mxu0 %vm625_vm6, %v8269_v2  ;;  %v7777_v6 = vsel %vm7671_vm3, %v7402_v4, 0.0  ;;  %v7748_v56 = vadd.f32 %v7747_v41, %v7746_v33  ;;  %v7771_v29 = vrot.slane %v7770_v61, 4  ;;  %v15762_v2 = vld [vmem:[#allocation43_spill] sm:$0xff] }
 0x59e   : > { %v7759_v62 = vrot.slane %v7758_v3, 2  ;;  %v7753_v0 = vadd.f32 %v7752_v22, %v7751_v24  ;;  %v15760_v35 = vrot.slane %v14317_v20, 4  ;;  %v7778_v49 = vrot.slane %v7777_v6, 4 }
 0x59f   : > { %v7765_v13 = vadd.f32 %v7764_v32, %v7763_v42  ;;  %v7772_v16 = vadd.f32 %v7771_v29, %v7770_v61  ;;  %v8130_v36 = vmul.f32 0.25, %v7748_v56  ;;  %v8270_v51 = vsel %vm8256_vm1, %v8129_v11, %v8128_v21  ;;  %v15763_v61 = vld [vmem:[#allocation46_spill] sm:$0xff] }
 0x5a0   : > { %v14430_v58 = vadd.f32 %v15760_v35, %v14317_v20  ;;  %10930 = vmatmul.mubr.msk.f32.gmra.mrb[6].mxu1 %vm625_vm6, %v15684_v38  ;;  %v7760_v25 = vadd.f32 %v7759_v62, %v7758_v3  ;;  %v7754_v60 = vrot.slane %v7753_v0, 1  ;;  %v7779_v52 = vadd.f32 %v7778_v49, %v7777_v6 }
 0x5a1   : > { %10932 = vmatprep.mubr.msk.f32.mxu1 %vm625_vm6, %v15685_v57  ;;  %v7766_v15 = vrot.slane %v7765_v13, 2  ;;  %v7419_v20 = vcombine.high %v14243_v19, %v14243_v19  ;;  %v7773_v38 = vrot.slane %v7772_v16, 2  ;;  %v8271_v27 = vsel %vm8258_vm8, %v8130_v36, %v8270_v51 }
 0x5a2   : > { %v7761_v31 = vrot.slane %v7760_v25, 1  ;;  %v7755_v7 = vadd.f32 %v7754_v60, %v7753_v0  ;;  %v7780_v4 = vrot.slane %v7779_v52, 2  ;;  %v7420_v57 = vcombine.high %v15733_v26, %v15733_v26  ;;  %v15764_v60 = vld [vmem:[#allocation47_spill] sm:$0xff] }
 0x5a3   : > { %v7767_v46 = vadd.f32 %v7766_v15, %v7765_v13  ;;  %v7435_v23 = vcombine.high %v14249_v50, %v14249_v50  ;;  %v7774_v10 = vadd.f32 %v7773_v38, %v7772_v16  ;;  %v7787_v33 = vrot.slane %v14245_v40, 2 }
 0x5a4   : > { %v7762_v17 = vadd.f32 %v7761_v31, %v7760_v25  ;;  %v8131_v63 = vmul.f32 0.25, %v7755_v7  ;;  %v7781_v1 = vadd.f32 %v7780_v4, %v7779_v52  ;;  %v7434_v43 = vrot.slane %v7420_v57, %v14141_v44 }
 0x5a5   : > { %v7768_v9 = vrot.slane %v7767_v46, 1  ;;  %v15761_v34 = vrot.slane %v14233_v53, 4  ;;  %v7775_v37 = vrot.slane %v7774_v10, 1  ;;  %v7788_v42 = vadd.f32 %v7787_v33, %v14245_v40 }
 0x5a6   : > { %v8132_v24 = vmul.f32 0.25, %v7762_v17  ;;  %v8272_v26 = vsel %vm8260_vm10, %v8131_v63, %v8271_v27  ;;  %v7782_v41 = vrot.slane %v7781_v1, 1  ;;  %v7436_v32 = vcombine.high %v7434_v43, %v7434_v43 }
 0x5a7   : > { %v7793_v55 = vadd.f32 %v15761_v34, %v14233_v53  ;;  %v7769_v3 = vadd.f32 %v7768_v9, %v7767_v46  ;;  %v7776_v6 = vadd.f32 %v7775_v37, %v7774_v10  ;;  %v7789_v53 = vrot.slane %v7788_v42, 1 }
 0x5a8   : > { %10933 = vmatmul.mubr.msk.f32.gmra.mrb[6].mxu1 %vm625_vm6, %v15762_v2  ;;  %v8273_v22 = vsel %vm8262_vm11, %v8132_v24, %v8272_v26  ;;  %v7798_v56 = vsel %vm7671_vm3, %v14243_v19, 0.0  ;;  %v7783_v0 = vadd.f32 %v7782_v41, %v7781_v1  ;;  %v7805_v29 = vsel %vm7671_vm3, %v7419_v20, 0.0  ;;  %v15765_v19 = vld [vmem:[#allocation48_spill] sm:$0xff] }
 0x5a9   : > { %v7794_v62 = vrot.slane %v7793_v55, 2  ;;  %10935 = vmatprep.mubr.msk.f32.mxu1 %vm625_vm6, %v15763_v61  ;;  %v8133_v21 = vmul.f32 0.25, %v7769_v3  ;;  %v7799_v40 = vrot.slane %v7798_v56, 4  ;;  %v8134_v35 = vmul.f32 0.25, %v7776_v6 }
 0x5aa   : > { %v7790_v49 = vadd.f32 %v7789_v53, %v7788_v42  ;;  %v7806_v11 = vrot.slane %v7805_v29, 4  ;;  %v8135_v15 = vmul.f32 0.25, %v7783_v0  ;;  %v7812_v31 = vsel %vm7671_vm3, %v14249_v50, 0.0  ;;  %v15767_v53 = vld [vmem:[#allocation58_spill] sm:$0xff] }
 0x5ab   : > { %v7795_v13 = vadd.f32 %v7794_v62, %v7793_v55  ;;  %v8274_v25 = vsel %vm8264_vm12, %v8133_v21, %v8273_v22  ;;  %v7800_v36 = vadd.f32 %v7799_v40, %v7798_v56  ;;  %v7813_v20 = vrot.slane %v7812_v31, 4 }
 0x5ac   : > { %10936 = vmatmul.mubr.msk.f32.gmra.mrb[8].mxu1 %vm625_vm6, %v15764_v60  ;;  %v8275_v52 = vsel %vm8266_vm13, %v8134_v35, %v8274_v25  ;;  %v7807_v51 = vadd.f32 %v7806_v11, %v7805_v29  ;;  %v7819_v7 = vsel %vm7671_vm3, %v7435_v23, 0.0  ;;  %v7826_v50 = vsel %vm7671_vm3, %v7434_v43, 0.0 }
 0x5ad   : > { %v7796_v16 = vrot.slane %v7795_v13, 1  ;;  %10938 = vmatprep.mubr.msk.f32.mxu1 %vm625_vm6, %v15765_v19  ;;  %v8276_v46 = vsel %vm8268_vm14, %v8135_v15, %v8275_v52  ;;  %v7801_v27 = vrot.slane %v7800_v36, 2  ;;  %v7820_v17 = vrot.slane %v7819_v7, 4 }
 0x5ae   : > { %11024 = vmatmul.mubr.msk.f32.vlgmr.msra.gmra.mrb[32].mxu0 %vm625_vm6, %v8276_v46  ;;  %v7808_v4 = vrot.slane %v7807_v51, 2  ;;  %v7814_v57 = vadd.f32 %v7813_v20, %v7812_v31  ;;  %v7833_v9 = vsel %vm7671_vm3, %v7436_v32, 0.0  ;;  %v7827_v33 = vrot.slane %v7826_v50, 4  ;;  %v15766_v32 = vld [vmem:[#allocation53_spill] sm:$0xff] }
 0x5af   : > { %v7797_v38 = vadd.f32 %v7796_v16, %v7795_v13  ;;  %v7802_v10 = vadd.f32 %v7801_v27, %v7800_v36  ;;  %v7821_v63 = vadd.f32 %v7820_v17, %v7819_v7  ;;  %v7834_v1 = vrot.slane %v7833_v9, 4  ;;  %v15768_v36 = vld [vmem:[#allocation17_spill] sm:$0xff] }
 0x5b0   : > { %v7809_v24 = vadd.f32 %v7808_v4, %v7807_v51  ;;  %v7815_v34 = vrot.slane %v7814_v57, 2  ;;  %v8136_v23 = vmul.f32 0.25, %v7790_v49  ;;  %v7828_v26 = vadd.f32 %v7827_v33, %v7826_v50  ;;  %v15769_v51 = vld [vmem:[#allocation20_spill] sm:$0xff] }
 0x5b1   : > { %v8137_v55 = vmul.f32 0.25, %v7797_v38  ;;  %v7803_v3 = vrot.slane %v7802_v10, 1  ;;  %v7822_v37 = vrot.slane %v7821_v63, 2  ;;  %v7835_v42 = vadd.f32 %v7834_v1, %v7833_v9 }
 0x5b2   : > { %v7810_v2 = vrot.slane %v7809_v24, 1  ;;  %v7816_v41 = vadd.f32 %v7815_v34, %v7814_v57  ;;  %v7453_v43 = vcombine.high %v14263_v48, %v14263_v48  ;;  %v7829_v6 = vrot.slane %v7828_v26, 2 }
 0x5b3   : > { %v8277_v22 = vsel %vm8256_vm1, %v8137_v55, %v8136_v23  ;;  %v7804_v62 = vadd.f32 %v7803_v3, %v7802_v10  ;;  %v7823_v61 = vadd.f32 %v7822_v37, %v7821_v63  ;;  %v7836_v21 = vrot.slane %v7835_v42, 2 }
 0x5b4   : > { %10939 = vmatmul.mubr.msk.f32.gmra.mrb[8].mxu1 %vm625_vm6, %v15766_v32  ;;  %v7811_v56 = vadd.f32 %v7810_v2, %v7809_v24  ;;  %v7817_v0 = vrot.slane %v7816_v41, 1  ;;  %v7454_v13 = vcombine.high %v15735_v45, %v15735_v45  ;;  %v7469_v40 = vcombine.high %v14267_v28, %v14267_v28  ;;  %v15771_v32 = vld [vmem:[#allocation21_spill] sm:$0xff] }
 0x5b5   : > { %10941 = vmatprep.mubr.msk.f32.mxu1 %vm625_vm6, %v15767_v53  ;;  %v7824_v29 = vrot.slane %v7823_v61, 1  ;;  %v7830_v35 = vadd.f32 %v7829_v6, %v7828_v26  ;;  %v7837_v25 = vadd.f32 %v7836_v21, %v7835_v42  ;;  %v8138_v49 = vmul.f32 0.25, %v7804_v62  ;;  %v15772_v21 = vld [vmem:[#allocation22_spill] sm:$0xff] }
 0x5b6   : > { %v7818_v11 = vadd.f32 %v7817_v0, %v7816_v41  ;;  %v8139_v60 = vmul.f32 0.25, %v7811_v56  ;;  %v7468_v15 = vrot.slane %v7454_v13, %v14141_v44  ;;  %v7843_v16 = vrot.slane %v14284_v5, 2 }
 0x5b7   : > { %v7825_v31 = vadd.f32 %v7824_v29, %v7823_v61  ;;  %v7831_v19 = vrot.slane %v7830_v35, 1  ;;  %v7838_v52 = vrot.slane %v7837_v25, 1  ;;  %v8278_v45 = vsel %vm8258_vm8, %v8138_v49, %v8277_v22 }
 0x5b8   : > { %10942 = vmatmul.mubr.msk.f32.gmra.mrb[10].mxu1 %vm625_vm6, %v15768_v36  ;;  %v8140_v20 = vmul.f32 0.25, %v7818_v11  ;;  %v8279_v7 = vsel %vm8260_vm10, %v8139_v60, %v8278_v45  ;;  %v7470_v46 = vcombine.high %v7468_v15, %v7468_v15  ;;  %v7844_v38 = vadd.f32 %v7843_v16, %v14284_v5  ;;  %v15773_v36 = vld [vmem:[#allocation24_spill] sm:$0xff]  ;;  %v15774_v45 = vld [vmem:[#allocation23_spill] sm:$0xff] }
 0x5b9   : > { %10944 = vmatprep.mubr.msk.f32.mxu1 %vm625_vm6, %v15769_v51  ;;  %v7832_v27 = vadd.f32 %v7831_v19, %v7830_v35  ;;  %v7839_v17 = vadd.f32 %v7838_v52, %v7837_v25  ;;  %v8141_v4 = vmul.f32 0.25, %v7825_v31  ;;  %v15770_v57 = vrot.slane %v14270_v59, 4 }
 0x5ba   : > { %v8280_v9 = vsel %vm8262_vm11, %v8140_v20, %v8279_v7  ;;  %v7845_v10 = vrot.slane %v7844_v38, 1  ;;  %v7854_v63 = vsel %vm7671_vm3, %v14263_v48, 0.0  ;;  %v7861_v33 = vsel %vm7671_vm3, %v7453_v43, 0.0 }
 0x5bb   : > { %v7849_v50 = vadd.f32 %v15770_v57, %v14270_v59  ;;  %v8142_v1 = vmul.f32 0.25, %v7832_v27  ;;  %v8143_v24 = vmul.f32 0.25, %v7839_v17  ;;  %v8281_v34 = vsel %vm8264_vm12, %v8141_v4, %v8280_v9 }
 0x5bc   : > { %v7846_v23 = vadd.f32 %v7845_v10, %v7844_v38  ;;  %v7855_v55 = vrot.slane %v7854_v63, 4  ;;  %v7862_v3 = vrot.slane %v7861_v33, 4  ;;  %v7868_v37 = vsel %vm7671_vm3, %v14267_v28, 0.0 }
 0x5bd   : > { %v7850_v5 = vrot.slane %v7849_v50, 2  ;;  %v8282_v59 = vsel %vm8266_vm13, %v8142_v1, %v8281_v34  ;;  %v7869_v42 = vrot.slane %v7868_v37, 4  ;;  %v7875_v2 = vsel %vm7671_vm3, %v7469_v40, 0.0 }
 0x5be   : > { %v8283_v48 = vsel %vm8268_vm14, %v8143_v24, %v8282_v59  ;;  %v7856_v41 = vadd.f32 %v7855_v55, %v7854_v63  ;;  %v7863_v22 = vadd.f32 %v7862_v3, %v7861_v33  ;;  %v7876_v43 = vrot.slane %v7875_v2, 4 }
 0x5bf   : > { %v7851_v26 = vadd.f32 %v7850_v5, %v7849_v50  ;;  %11026 = vmatprep.mubr.msk.f32.mxu0 %vm625_vm6, %v8283_v48  ;;  %v7870_v61 = vadd.f32 %v7869_v42, %v7868_v37  ;;  %v7882_v28 = vsel %vm7671_vm3, %v7468_v15, 0.0  ;;  %v7889_v6 = vsel %vm7671_vm3, %v7470_v46, 0.0 }
 0x5c0   : > { %10945 = vmatmul.mubr.msk.f32.gmra.mrb[10].mxu1 %vm625_vm6, %v15771_v32  ;;  %v7857_v53 = vrot.slane %v7856_v41, 2  ;;  %v7864_v56 = vrot.slane %v7863_v22, 2  ;;  %v7877_v0 = vadd.f32 %v7876_v43, %v7875_v2  ;;  %v7883_v13 = vrot.slane %v7882_v28, 4 }
 0x5c1   : > { %v7852_v62 = vrot.slane %v7851_v26, 1  ;;  %10947 = vmatprep.mubr.msk.f32.mxu1 %vm625_vm6, %v15772_v21  ;;  %v7871_v29 = vrot.slane %v7870_v61, 2  ;;  %v7890_v35 = vrot.slane %v7889_v6, 4  ;;  %v8144_v25 = vmul.f32 0.25, %v7846_v23 }
 0x5c2   : > { %v7858_v49 = vadd.f32 %v7857_v53, %v7856_v41  ;;  %v7865_v11 = vadd.f32 %v7864_v56, %v7863_v22  ;;  %v7878_v60 = vrot.slane %v7877_v0, 2  ;;  %v7884_v16 = vadd.f32 %v7883_v13, %v7882_v28  ;;  %v15776_v22 = vld [vmem:[#allocation25_spill] sm:$0xff]  ;;  %v15777_v28 = vld [vmem:[#allocation26_spill] sm:$0xff] }
 0x5c3   : > { %v7853_v40 = vadd.f32 %v7852_v62, %v7851_v26  ;;  %v7872_v15 = vadd.f32 %v7871_v29, %v7870_v61  ;;  %v7891_v31 = vadd.f32 %v7890_v35, %v7889_v6  ;;  %v7487_v52 = vcombine.high %v14290_v12, %v14290_v12 }
 0x5c4   : > { %10948 = vmatmul.mubr.msk.f32.gmra.mrb[12].mxu1 %vm625_vm6, %v15773_v36  ;;  %v7859_v51 = vrot.slane %v7858_v49, 1  ;;  %v7866_v20 = vrot.slane %v7865_v11, 1  ;;  %v7879_v7 = vadd.f32 %v7878_v60, %v7877_v0  ;;  %v7885_v46 = vrot.slane %v7884_v16, 2  ;;  %v15779_v36 = vld [vmem:[#allocation28_spill] sm:$0xff] }
 0x5c5   : > { %v8145_v19 = vmul.f32 0.25, %v7853_v40  ;;  %10950 = vmatprep.mubr.msk.f32.mxu1 %vm625_vm6, %v15774_v45  ;;  %v7873_v38 = vrot.slane %v7872_v15, 1  ;;  %v7892_v27 = vrot.slane %v7891_v31, 2  ;;  %v7488_v4 = vcombine.high %v15737_v14, %v15737_v14 }
 0x5c6   : > { %v7860_v57 = vadd.f32 %v7859_v51, %v7858_v49  ;;  %v7867_v50 = vadd.f32 %v7866_v20, %v7865_v11  ;;  %v7880_v9 = vrot.slane %v7879_v7, 1  ;;  %v7886_v10 = vadd.f32 %v7885_v46, %v7884_v16 }
 0x5c7   : > { %v8284_v17 = vsel %vm8256_vm1, %v8145_v19, %v8144_v25  ;;  %v7874_v63 = vadd.f32 %v7873_v38, %v7872_v15  ;;  %v7893_v33 = vadd.f32 %v7892_v27, %v7891_v31  ;;  %v7502_v1 = vrot.slane %v7488_v4, %v14141_v44 }
 0x5c8   : > { %v7503_v24 = vcombine.high %v14294_v39, %v14294_v39  ;;  %v7881_v34 = vadd.f32 %v7880_v9, %v7879_v7  ;;  %v7887_v5 = vrot.slane %v7886_v10, 1  ;;  %v8146_v23 = vmul.f32 0.25, %v7860_v57 }
 0x5c9   : > { %v8147_v55 = vmul.f32 0.25, %v7867_v50  ;;  %v7894_v3 = vrot.slane %v7893_v33, 1  ;;  %v8148_v37 = vmul.f32 0.25, %v7874_v63  ;;  %v7504_v59 = vcombine.high %v7502_v1, %v7502_v1 }
 0x5ca   : > { %v7899_v14 = vrot.slane %v14299_v47, 2  ;;  %v7888_v26 = vadd.f32 %v7887_v5, %v7886_v10  ;;  %v8149_v42 = vmul.f32 0.25, %v7881_v34  ;;  %v8285_v2 = vsel %vm8258_vm8, %v8146_v23, %v8284_v17 }
 0x5cb   : > { %v15775_v48 = vrot.slane %v14277_v54, 4  ;;  %v7895_v43 = vadd.f32 %v7894_v3, %v7893_v33  ;;  %v8286_v32 = vsel %vm8260_vm10, %v8147_v55, %v8285_v2  ;;  %v7910_v61 = vsel %vm7671_vm3, %v14290_v12, 0.0  ;;  %v15778_v12 = vld [vmem:[#allocation27_spill] sm:$0xff] }
 0x5cc   : > { %10951 = vmatmul.mubr.msk.f32.gmra.mrb[12].mxu1 %vm625_vm6, %v15776_v22  ;;  %v7900_v62 = vadd.f32 %v7899_v14, %v14299_v47  ;;  %v8150_v6 = vmul.f32 0.25, %v7888_v26  ;;  %v8287_v21 = vsel %vm8262_vm11, %v8148_v37, %v8286_v32  ;;  %v7911_v56 = vrot.slane %v7910_v61, 4 }
 0x5cd   : > { %v7905_v41 = vadd.f32 %v15775_v48, %v14277_v54  ;;  %10953 = vmatprep.mubr.msk.f32.mxu1 %vm625_vm6, %v15777_v28  ;;  %v8151_v54 = vmul.f32 0.25, %v7895_v43  ;;  %v8288_v0 = vsel %vm8264_vm12, %v8149_v42, %v8287_v21  ;;  %v7917_v40 = vsel %vm7671_vm3, %v7487_v52, 0.0  ;;  %v15781_v48 = vld [vmem:[#allocation30_spill] sm:$0xff] }
 0x5ce   : > { %v7901_v13 = vrot.slane %v7900_v62, 1  ;;  %v8289_v29 = vsel %vm8266_vm13, %v8150_v6, %v8288_v0  ;;  %v7912_v35 = vadd.f32 %v7911_v56, %v7910_v61  ;;  %v7918_v25 = vrot.slane %v7917_v40, 4  ;;  %v15782_v56 = vld [vmem:[#allocation8_spill] sm:$0xff]  ;;  %v15783_v0 = vld [vmem:[#allocation31_spill] sm:$0xff] }
 0x5cf   : > { %v7906_v53 = vrot.slane %v7905_v41, 2  ;;  %v8290_v49 = vsel %vm8268_vm14, %v8151_v54, %v8289_v29  ;;  %v7924_v60 = vsel %vm7671_vm3, %v14294_v39, 0.0  ;;  %v7931_v16 = vsel %vm7671_vm3, %v7503_v24, 0.0 }
 0x5d0   : > { %10954 = vmatmul.mubr.msk.f32.gmra.mrb[14].mxu1 %vm625_vm6, %v15778_v12  ;;  %v7902_v11 = vadd.f32 %v7901_v13, %v7900_v62  ;;  %11027 = vmatmul.mubr.msk.f32.gmra.mrb[34].mxu0 %vm625_vm6, %v8290_v49  ;;  %v7913_v31 = vrot.slane %v7912_v35, 2  ;;  %v7919_v19 = vadd.f32 %v7918_v25, %v7917_v40  ;;  %v7925_v52 = vrot.slane %v7924_v60, 4  ;;  %v15786_v12 = vld [vmem:[#allocation32_spill] sm:$0xff] }
 0x5d1   : > { %v7907_v47 = vadd.f32 %v7906_v53, %v7905_v41  ;;  %10956 = vmatprep.mubr.msk.f32.mxu1 %vm625_vm6, %v15779_v36  ;;  %v7932_v45 = vrot.slane %v7931_v16, 4  ;;  %v7938_v51 = vsel %vm7671_vm3, %v7502_v1, 0.0  ;;  %v7945_v20 = vsel %vm7671_vm3, %v7504_v59, 0.0  ;;  %v15780_v59 = vld [vmem:[#allocation29_spill] sm:$0xff] }
 0x5d2   : > { %v8152_v7 = vmul.f32 0.25, %v7902_v11  ;;  %v7914_v38 = vadd.f32 %v7913_v31, %v7912_v35  ;;  %v7920_v39 = vrot.slane %v7919_v19, 2  ;;  %v7926_v27 = vadd.f32 %v7925_v52, %v7924_v60 }
 0x5d3   : > { %v7908_v15 = vrot.slane %v7907_v47, 1  ;;  %v7933_v17 = vadd.f32 %v7932_v45, %v7931_v16  ;;  %v7939_v4 = vrot.slane %v7938_v51, 4  ;;  %v7946_v57 = vrot.slane %v7945_v20, 4 }
 0x5d4   : > { %v7521_v50 = vcombine.high %v14310_v8, %v14310_v8  ;;  %v7915_v9 = vrot.slane %v7914_v38, 1  ;;  %v7921_v10 = vadd.f32 %v7920_v39, %v7919_v19  ;;  %v7927_v63 = vrot.slane %v7926_v27, 2 }
 0x5d5   : > { %v7909_v46 = vadd.f32 %v7908_v15, %v7907_v47  ;;  %v7934_v24 = vrot.slane %v7933_v17, 2  ;;  %v7940_v34 = vadd.f32 %v7939_v4, %v7938_v51  ;;  %v7947_v1 = vadd.f32 %v7946_v57, %v7945_v20  ;;  %v15784_v47 = vld [vmem:[#allocation2_spill] sm:$0xff] }
 0x5d6   : > { %v7522_v5 = vcombine.high %v15741_v30, %v15741_v30  ;;  %v7916_v23 = vadd.f32 %v7915_v9, %v7914_v38  ;;  %v7922_v55 = vrot.slane %v7921_v10, 1  ;;  %v7928_v3 = vadd.f32 %v7927_v63, %v7926_v27 }
 0x5d7   : > { %v8153_v33 = vmul.f32 0.25, %v7909_v46  ;;  %v7935_v14 = vadd.f32 %v7934_v24, %v7933_v17  ;;  %v7941_v26 = vrot.slane %v7940_v34, 2  ;;  %v7948_v42 = vrot.slane %v7947_v1, 2 }
 0x5d8   : > { %10957 = vmatmul.mubr.msk.f32.gmra.mrb[14].mxu1 %vm625_vm6, %v15780_v59  ;;  %v7536_v2 = vrot.slane %v7522_v5, %v14141_v44  ;;  %v7923_v41 = vadd.f32 %v7922_v55, %v7921_v10  ;;  %v7929_v22 = vrot.slane %v7928_v3, 1  ;;  %v8154_v43 = vmul.f32 0.25, %v7916_v23 }
 0x5d9   : > { %v8291_v37 = vsel %vm8256_vm1, %v8153_v33, %v8152_v7  ;;  %10959 = vmatprep.mubr.msk.f32.mxu1 %vm625_vm6, %v15781_v48  ;;  %v7537_v30 = vcombine.high %v14314_v18, %v14314_v18  ;;  %v7936_v32 = vrot.slane %v7935_v14, 1  ;;  %v7942_v62 = vadd.f32 %v7941_v26, %v7940_v34 }
 0x5da   : > { %v7949_v61 = vadd.f32 %v7948_v42, %v7947_v1  ;;  %v7538_v28 = vcombine.high %v7536_v2, %v7536_v2  ;;  %v7930_v6 = vadd.f32 %v7929_v22, %v7928_v3  ;;  %v8155_v21 = vmul.f32 0.25, %v7923_v41  ;;  %v15787_v1 = vld [vmem:[#allocation33_spill] sm:$0xff]  ;;  %v15788_v3 = vld [vmem:[#allocation16_spill] sm:$0xff] }
 0x5db   : > { %v8292_v53 = vsel %vm8258_vm8, %v8154_v43, %v8291_v37  ;;  %v7955_v54 = vrot.slane %v15782_v56, 2  ;;  %v7937_v13 = vadd.f32 %v7936_v32, %v7935_v14  ;;  %v7943_v40 = vrot.slane %v7942_v62, 1 }
 0x5dc   : > { %10960 = vmatmul.mubr.msk.f32.gmra.mrb[16].mxu1 %vm625_vm6, %v15783_v0  ;;  %v7950_v29 = vrot.slane %v7949_v61, 1  ;;  %v15785_v35 = vrot.slane %v15784_v47, 4  ;;  %v8156_v49 = vmul.f32 0.25, %v7930_v6  ;;  %v8293_v11 = vsel %vm8260_vm10, %v8155_v21, %v8292_v53  ;;  %v15790_v21 = vld [vmem:[#allocation10_spill] sm:$0xff] }
 0x5dd   : > { %10962 = vmatprep.mubr.msk.f32.mxu1 %vm625_vm6, %v15786_v12  ;;  %v7956_v60 = vadd.f32 %v7955_v54, %v15782_v56  ;;  %v7966_v16 = vsel %vm7671_vm3, %v14310_v8, 0.0  ;;  %v7944_v36 = vadd.f32 %v7943_v40, %v7942_v62  ;;  %v8157_v31 = vmul.f32 0.25, %v7937_v13 }
 0x5de   : > { %v7961_v25 = vadd.f32 %v15785_v35, %v15784_v47  ;;  %v7951_v15 = vadd.f32 %v7950_v29, %v7949_v61  ;;  %v8294_v52 = vsel %vm8262_vm11, %v8156_v49, %v8293_v11  ;;  %v7967_v51 = vrot.slane %v7966_v16, 4  ;;  %v15789_v61 = vld [vmem:[#allocation39_spill] sm:$0xff] }
 0x5df   : > { %v7957_v45 = vrot.slane %v7956_v60, 1  ;;  %v7973_v20 = vsel %vm7671_vm3, %v7521_v50, 0.0  ;;  %v8158_v7 = vmul.f32 0.25, %v7944_v36  ;;  %v8295_v38 = vsel %vm8264_vm12, %v8157_v31, %v8294_v52  ;;  %v15791_v47 = vld [vmem:[#allocation15_spill] sm:$0xff] }
 0x5e0   : > { %v7962_v19 = vrot.slane %v7961_v25, 2  ;;  %v8159_v46 = vmul.f32 0.25, %v7951_v15  ;;  %v7968_v17 = vadd.f32 %v7967_v51, %v7966_v16  ;;  %v7974_v4 = vrot.slane %v7973_v20, 4 }
 0x5e1   : > { %v7958_v27 = vadd.f32 %v7957_v45, %v7956_v60  ;;  %v7980_v8 = vsel %vm7671_vm3, %v14314_v18, 0.0  ;;  %v8296_v57 = vsel %vm8266_vm13, %v8158_v7, %v8295_v38  ;;  %v7987_v63 = vsel %vm7671_vm3, %v7537_v30, 0.0 }
 0x5e2   : > { %v7963_v39 = vadd.f32 %v7962_v19, %v7961_v25  ;;  %v7981_v10 = vrot.slane %v7980_v8, 4  ;;  %v8297_v33 = vsel %vm8268_vm14, %v8159_v46, %v8296_v57  ;;  %v7969_v50 = vrot.slane %v7968_v17, 2  ;;  %v15792_v25 = vld [vmem:[#allocation12_spill] sm:$0xff]  ;;  %v15794_v57 = vld [vmem:[#allocation5_spill] sm:$0xff] }
 0x5e3   : > { %v7975_v24 = vadd.f32 %v7974_v4, %v7973_v20  ;;  %v7988_v34 = vrot.slane %v7987_v63, 4  ;;  %11029 = vmatprep.mubr.msk.f32.mxu0 %vm625_vm6, %v8297_v33  ;;  %v7994_v18 = vsel %vm7671_vm3, %v7536_v2, 0.0  ;;  %v8001_v55 = vsel %vm7671_vm3, %v7538_v28, 0.0  ;;  %v15793_v19 = vld [vmem:[#allocation44_spill] sm:$0xff] }
 0x5e4   : > { %v7964_v9 = vrot.slane %v7963_v39, 1  ;;  %10963 = vmatmul.mubr.msk.f32.gmra.mrb[16].mxu1 %vm625_vm6, %v15787_v1  ;;  %v7982_v23 = vadd.f32 %v7981_v10, %v7980_v8  ;;  %v7970_v37 = vadd.f32 %v7969_v50, %v7968_v17  ;;  %v7995_v26 = vrot.slane %v7994_v18, 4 }
 0x5e5   : > { %10965 = vmatprep.mubr.msk.f32.mxu1 %vm625_vm6, %v15788_v3  ;;  %v7976_v59 = vrot.slane %v7975_v24, 2  ;;  %v7989_v14 = vadd.f32 %v7988_v34, %v7987_v63  ;;  %v8002_v48 = vrot.slane %v8001_v55, 4  ;;  %v8160_v41 = vmul.f32 0.25, %v7958_v27  ;;  %v15796_v34 = vld [vmem:[#allocation34_spill] sm:$0xff] }
 0x5e6   : > { %v7965_v5 = vadd.f32 %v7964_v9, %v7963_v39  ;;  %v7983_v42 = vrot.slane %v7982_v23, 2  ;;  %v7971_v43 = vrot.slane %v7970_v37, 1  ;;  %v7996_v62 = vadd.f32 %v7995_v26, %v7994_v18 }
 0x5e7   : > { %v7977_v30 = vadd.f32 %v7976_v59, %v7975_v24  ;;  %v7990_v32 = vrot.slane %v7989_v14, 2  ;;  %v8003_v28 = vadd.f32 %v8002_v48, %v8001_v55  ;;  %v7555_v53 = vcombine.high %v15790_v21, %v15790_v21 }
 0x5e8   : > { %v8161_v22 = vmul.f32 0.25, %v7965_v5  ;;  %10966 = vmatmul.mubr.msk.f32.gmra.mrb[18].mxu1 %vm625_vm6, %v15789_v61  ;;  %v7984_v2 = vadd.f32 %v7983_v42, %v7982_v23  ;;  %v7972_v56 = vadd.f32 %v7971_v43, %v7970_v37  ;;  %v7997_v13 = vrot.slane %v7996_v62, 2 }
 0x5e9   : > { %10968 = vmatprep.mubr.msk.f32.mxu1 %vm625_vm6, %v15786_v12  ;;  %v7978_v54 = vrot.slane %v7977_v30, 1  ;;  %v7991_v0 = vadd.f32 %v7990_v32, %v7989_v14  ;;  %v8004_v29 = vrot.slane %v8003_v28, 2  ;;  %v7556_v35 = vcombine.high %v15791_v47, %v15791_v47 }
 0x5ea   : > { %v8298_v6 = vsel %vm8256_vm1, %v8161_v22, %v8160_v41  ;;  %v7985_v40 = vrot.slane %v7984_v2, 1  ;;  %v7571_v49 = vcombine.high %v15792_v25, %v15792_v25  ;;  %v7998_v16 = vadd.f32 %v7997_v13, %v7996_v62  ;;  %v15797_v41 = vld [vmem:[#allocation35_spill] sm:$0xff]  ;;  %v15798_v62 = vld [vmem:[#allocation36_spill] sm:$0xff] }
 0x5eb   : > { %v7979_v11 = vadd.f32 %v7978_v54, %v7977_v30  ;;  %v7992_v60 = vrot.slane %v7991_v0, 1  ;;  %v8162_v36 = vmul.f32 0.25, %v7972_v56  ;;  %v8005_v31 = vadd.f32 %v8004_v29, %v8003_v28 }
 0x5ec   : > { %v7986_v15 = vadd.f32 %v7985_v40, %v7984_v2  ;;  %v7570_v12 = vrot.slane %v7556_v35, %v14141_v44  ;;  %v8011_v52 = vrot.slane %v15793_v19, 2  ;;  %v7999_v51 = vrot.slane %v7998_v16, 1 }
 0x5ed   : > { %v7993_v45 = vadd.f32 %v7992_v60, %v7991_v0  ;;  %v8163_v20 = vmul.f32 0.25, %v7979_v11  ;;  %v8299_v7 = vsel %vm8258_vm8, %v8162_v36, %v8298_v6  ;;  %v8006_v46 = vrot.slane %v8005_v31, 1 }
 0x5ee   : > { %v8164_v38 = vmul.f32 0.25, %v7986_v15  ;;  %v7572_v39 = vcombine.high %v7570_v12, %v7570_v12  ;;  %v8012_v27 = vadd.f32 %v8011_v52, %v15793_v19  ;;  %v8000_v17 = vadd.f32 %v7999_v51, %v7998_v16 }
 0x5ef   : > { %v8165_v4 = vmul.f32 0.25, %v7993_v45  ;;  %v8300_v8 = vsel %vm8260_vm10, %v8163_v20, %v8299_v7  ;;  %v15795_v9 = vrot.slane %v15794_v57, 4  ;;  %v8007_v63 = vadd.f32 %v8006_v46, %v8005_v31  ;;  %v15801_v45 = vld [vmem:[#allocation7_spill] sm:$0xff] }
 0x5f0   : > { %10969 = vmatmul.mubr.msk.f32.gmra.mrb[18].mxu1 %vm625_vm6, %v15787_v1  ;;  %v8301_v33 = vsel %vm8262_vm11, %v8164_v38, %v8300_v8  ;;  %v8013_v50 = vrot.slane %v8012_v27, 1  ;;  %v8022_v24 = vsel %vm7671_vm3, %v15790_v21, 0.0  ;;  %v8166_v5 = vmul.f32 0.25, %v8000_v17 }
 0x5f1   : > { %v8017_v10 = vadd.f32 %v15795_v9, %v15794_v57  ;;  %10973 = vmatprep.mubr.msk.f32.mxu1 %vm625_vm6, %v15796_v34  ;;  %v8302_v23 = vsel %vm8264_vm12, %v8165_v4, %v8301_v33  ;;  %v8023_v55 = vrot.slane %v8022_v24, 4  ;;  %v8167_v3 = vmul.f32 0.25, %v8007_v63  ;;  %v15803_v57 = vld [vmem:[#allocation38_spill] sm:$0xff] }
 0x5f2   : > { %v8014_v37 = vadd.f32 %v8013_v50, %v8012_v27  ;;  %v8029_v59 = vsel %vm7671_vm3, %v7555_v53, 0.0  ;;  %v8036_v1 = vsel %vm7671_vm3, %v15792_v25, 0.0  ;;  %v8303_v14 = vsel %vm8266_vm13, %v8166_v5, %v8302_v23  ;;  %v15804_v33 = vld [vmem:[#allocation6_spill] sm:$0xff] }
 0x5f3   : > { %v8018_v18 = vrot.slane %v8017_v10, 2  ;;  %v8024_v42 = vadd.f32 %v8023_v55, %v8022_v24  ;;  %v8030_v48 = vrot.slane %v8029_v59, 4  ;;  %v8304_v22 = vsel %vm8268_vm14, %v8167_v3, %v8303_v14 }
 0x5f4   : > { %10974 = vmatmul.mubr.msk.f32.vlgmr.msra.gmra.mrb[4].mxu1 %vm625_vm6, %v15797_v41  ;;  %v8037_v43 = vrot.slane %v8036_v1, 4  ;;  %v8043_v30 = vsel %vm7671_vm3, %v7571_v49, 0.0  ;;  %v8050_v32 = vsel %vm7671_vm3, %v7570_v12, 0.0  ;;  %11030 = vmatmul.mubr.msk.f32.gmra.mrb[36].mxu0 %vm625_vm6, %v8304_v22  ;;  %v8057_v56 = vsel %vm7671_vm3, %v7572_v39, 0.0  ;;  %v15799_v49 = vld [vmem:[#allocation45_spill] sm:$0xff]  ;;  %v15807_v41 = vld [vmem:[#allocation42_spill] sm:$0xff] }
 0x5f5   : > { %v8019_v26 = vadd.f32 %v8018_v18, %v8017_v10  ;;  %10976 = vmatprep.mubr.msk.f32.mxu1 %vm625_vm6, %v15798_v62  ;;  %v8025_v2 = vrot.slane %v8024_v42, 2  ;;  %v8031_v28 = vadd.f32 %v8030_v48, %v8029_v59  ;;  %v8044_v6 = vrot.slane %v8043_v30, 4  ;;  %v15802_v39 = vld [vmem:[#allocation37_spill] sm:$0xff] }
 0x5f6   : > { %v8038_v21 = vadd.f32 %v8037_v43, %v8036_v1  ;;  %v8051_v53 = vrot.slane %v8050_v32, 4  ;;  %v8168_v54 = vmul.f32 0.25, %v8014_v37  ;;  %v8058_v25 = vrot.slane %v8057_v56, 4  ;;  %v15806_v1 = vld [vmem:[#allocation40_spill] sm:$0xff] }
 0x5f7   : > { %v8020_v61 = vrot.slane %v8019_v26, 1  ;;  %v8026_v13 = vadd.f32 %v8025_v2, %v8024_v42  ;;  %v8032_v40 = vrot.slane %v8031_v28, 2  ;;  %v8045_v29 = vadd.f32 %v8044_v6, %v8043_v30 }
 0x5f8   : > { %v8039_v47 = vrot.slane %v8038_v21, 2  ;;  %v8052_v35 = vadd.f32 %v8051_v53, %v8050_v32  ;;  %v15800_v11 = vcombine.high %v15799_v49, %v15799_v49  ;;  %v8059_v52 = vadd.f32 %v8058_v25, %v8057_v56  ;;  %v15808_v32 = vld [vmem:[#allocation3_spill] sm:$0xff] }
 0x5f9   : > { %v8021_v0 = vadd.f32 %v8020_v61, %v8019_v26  ;;  %v8027_v16 = vrot.slane %v8026_v13, 1  ;;  %v8033_v36 = vadd.f32 %v8032_v40, %v8031_v28  ;;  %v8046_v15 = vrot.slane %v8045_v29, 2 }
 0x5fa   : > { %v14636_v60 = vrot.slane %v15800_v11, %v14141_v44  ;;  %v8040_v12 = vadd.f32 %v8039_v47, %v8038_v21  ;;  %v8053_v19 = vrot.slane %v8052_v35, 2  ;;  %v7605_v51 = vcombine.high %v15801_v45, %v15801_v45 }
 0x5fb   : > { %v8169_v31 = vmul.f32 0.25, %v8021_v0  ;;  %v8028_v20 = vadd.f32 %v8027_v16, %v8026_v13  ;;  %v8034_v7 = vrot.slane %v8033_v36, 1  ;;  %v8047_v46 = vadd.f32 %v8046_v15, %v8045_v29 }
 0x5fc   : > { %10977 = vmatmul.mubr.msk.f32.gmra.mrb[4].mxu1 %vm625_vm6, %v15802_v39  ;;  %v8041_v27 = vrot.slane %v8040_v12, 1  ;;  %v8054_v17 = vadd.f32 %v8053_v19, %v8052_v35  ;;  %v8060_v4 = vrot.slane %v8059_v52, 2  ;;  %v7606_v8 = vcombine.high %v14636_v60, %v14636_v60 }
 0x5fd   : > { %v8305_v38 = vsel %vm8256_vm1, %v8169_v31, %v8168_v54  ;;  %10979 = vmatprep.mubr.msk.f32.mxu1 %vm625_vm6, %v15803_v57  ;;  %v8035_v9 = vadd.f32 %v8034_v7, %v8033_v36  ;;  %v8048_v10 = vrot.slane %v8047_v46, 1  ;;  %v8170_v63 = vmul.f32 0.25, %v8028_v20  ;;  %v15812_v7 = vld [vmem:[#allocation49_spill] sm:$0xff] }
 0x5fe   : > { %v15805_v50 = vrot.slane %v15804_v33, 2  ;;  %v8042_v34 = vadd.f32 %v8041_v27, %v8040_v12  ;;  %v8055_v5 = vrot.slane %v8054_v17, 1  ;;  %v8061_v23 = vadd.f32 %v8060_v4, %v8059_v52 }
 0x5ff   : > { %v8074_v18 = vrot.slane %v14430_v58, 2  ;;  %v8049_v55 = vadd.f32 %v8048_v10, %v8047_v46  ;;  %v8171_v3 = vmul.f32 0.25, %v8035_v9  ;;  %v8306_v37 = vsel %vm8258_vm8, %v8170_v63, %v8305_v38 }
 0x600   : > { %v8068_v24 = vadd.f32 %v15805_v50, %v15804_v33  ;;  %10980 = vmatmul.mubr.msk.f32.gmra.mrb[6].mxu1 %vm625_vm6, %v15806_v1  ;;  %v8056_v14 = vadd.f32 %v8055_v5, %v8054_v17  ;;  %v8062_v26 = vrot.slane %v8061_v23, 1  ;;  %v8172_v42 = vmul.f32 0.25, %v8042_v34 }
 0x601   : > { %v8075_v48 = vadd.f32 %v8074_v18, %v14430_v58  ;;  %10982 = vmatprep.mubr.msk.f32.mxu1 %vm625_vm6, %v15807_v41  ;;  %v8173_v22 = vmul.f32 0.25, %v8049_v55  ;;  %v8307_v43 = vsel %vm8260_vm10, %v8171_v3, %v8306_v37  ;;  %v15809_v62 = vrot.slane %v15808_v32, 4  ;;  %v15810_v58 = vld [vmem:[#allocation4_spill] sm:$0xff] }
 0x602   : > { %v8069_v59 = vrot.slane %v8068_v24, 1  ;;  %v8063_v2 = vadd.f32 %v8062_v26, %v8061_v23  ;;  %v8174_v28 = vmul.f32 0.25, %v8056_v14  ;;  %v8308_v6 = vsel %vm8262_vm11, %v8172_v42, %v8307_v43  ;;  %v15815_v55 = vld [vmem:[#allocation52_spill] sm:$0xff] }
 0x603   : > { %v8080_v61 = vadd.f32 %v15809_v62, %v15808_v32  ;;  %v8076_v21 = vrot.slane %v8075_v48, 1  ;;  %v8309_v53 = vsel %vm8264_vm12, %v8173_v22, %v8308_v6  ;;  %v15811_v54 = vcombine.high %v15810_v58, %v15810_v58  ;;  %v15816_v6 = vld [vmem:[#allocation54_spill] sm:$0xff] }
 0x604   : > { %v8070_v30 = vadd.f32 %v8069_v59, %v8068_v24  ;;  %v8092_v13 = vsel %vm7671_vm3, %v15801_v45, 0.0  ;;  %v8175_v40 = vmul.f32 0.25, %v8063_v2  ;;  %v8310_v29 = vsel %vm8266_vm13, %v8174_v28, %v8309_v53  ;;  %v15814_v24 = vld [vmem:[#allocation51_spill] sm:$0xff] }
 0x605   : > { %v8081_v56 = vrot.slane %v8080_v61, 2  ;;  %v8085_v0 = vsel %vm7671_vm3, %v15811_v54, 0.0  ;;  %v8077_v47 = vadd.f32 %v8076_v21, %v8075_v48  ;;  %v8093_v49 = vrot.slane %v8092_v13, 4 }
 0x606   : > { %v8086_v35 = vrot.slane %v8085_v0, 4  ;;  %v8099_v11 = vsel %vm7671_vm3, %v7605_v51, 0.0  ;;  %v8106_v16 = vsel %vm7671_vm3, %v14636_v60, 0.0  ;;  %v8311_v36 = vsel %vm8268_vm14, %v8175_v40, %v8310_v29  ;;  %v15813_v60 = vld [vmem:[#allocation50_spill] sm:$0xff]  ;;  %v15820_v40 = vld [vmem:[#allocation59_spill] sm:$0xff] }
 0x607   : > { %v8082_v25 = vadd.f32 %v8081_v56, %v8080_v61  ;;  %v8100_v31 = vrot.slane %v8099_v11, 4  ;;  %v8107_v12 = vrot.slane %v8106_v16, 4  ;;  %11032 = vmatprep.mubr.msk.f32.mxu0 %vm625_vm6, %v8311_v36  ;;  %v8094_v52 = vadd.f32 %v8093_v49, %v8092_v13  ;;  %v15817_v56 = vld [vmem:[#allocation55_spill] sm:$0xff]  ;;  %v15819_v13 = vld [vmem:[#allocation57_spill] sm:$0xff]  ;;  %v15821_v29 = vld [vmem:[#allocation18_spill] sm:$0xff] }
 0x608   : > { %v8087_v15 = vadd.f32 %v8086_v35, %v8085_v0  ;;  %v8113_v45 = vsel %vm7671_vm3, %v7606_v8, 0.0  ;;  %v8176_v20 = vmul.f32 0.25, %v8070_v30  ;;  %10983 = vmatmul.mubr.msk.f32.gmra.mrb[6].mxu1 %vm625_vm6, %v15812_v7  ;;  %v8177_v4 = vmul.f32 0.25, %v8077_v47  ;;  %v15818_v0 = vld [vmem:[#allocation56_spill] sm:$0xff]  ;;  %v15823_v35 = vld [vmem:[#allocation61_spill] sm:$0xff]  ;;  %v15825_v49 = vld [vmem:[#allocation63_spill] sm:$0xff] }
 0x609   : > { %v8083_v19 = vrot.slane %v8082_v25, 1  ;;  %v8101_v51 = vadd.f32 %v8100_v31, %v8099_v11  ;;  %v8108_v38 = vadd.f32 %v8107_v12, %v8106_v16  ;;  %v8114_v39 = vrot.slane %v8113_v45, 4  ;;  %10985 = vmatprep.mubr.msk.f32.mxu1 %vm625_vm6, %v15813_v60  ;;  %v15822_v47 = vld [vmem:[#allocation60_spill] sm:$0xff]  ;;  %v15827_v16 = vld [vmem:[#allocation65_spill] sm:$0xff]  ;;  %v15828_v36 = vld [vmem:[#allocation66_spill] sm:$0xff] }
 0x60a   : > { %v8088_v46 = vrot.slane %v8087_v15, 2  ;;  %v8095_v17 = vrot.slane %v8094_v52, 2  ;;  %v8312_v50 = vsel %vm8256_vm1, %v8177_v4, %v8176_v20  ;;  %v15826_v11 = vld [vmem:[#allocation64_spill] sm:$0xff]  ;;  %v15831_v12 = vld [vmem:[#allocation69_spill] sm:$0xff]  ;;  %vm6790_vm0 = vcmask 58368  }
 0x60b   : > { %v8084_v27 = vadd.f32 %v8083_v19, %v8082_v25  ;;  %v8102_v9 = vrot.slane %v8101_v51, 2  ;;  %v8109_v10 = vrot.slane %v8108_v38, 2  ;;  %v8115_v63 = vadd.f32 %v8114_v39, %v8113_v45  ;;  %v15824_v25 = vld [vmem:[#allocation62_spill] sm:$0xff]  ;;  %v15830_v31 = vld [vmem:[#allocation68_spill] sm:$0xff]  ;;  %v15834_v45 = vld [vmem:[#allocation19_spill] sm:$0xff] }
 0x60c   : > { %v8089_v57 = vadd.f32 %v8088_v46, %v8087_v15  ;;  %v8096_v33 = vadd.f32 %v8095_v17, %v8094_v52  ;;  %10986 = vmatmul.mubr.msk.f32.gmra.mrb[8].mxu1 %vm625_vm6, %v15814_v24  ;;  %v15829_v15 = vld [vmem:[#allocation67_spill] sm:$0xff]  ;;  %v15832_v19 = vld [vmem:[#allocation70_spill] sm:$0xff]  ;;  %v15833_v52 = vld [vmem:[#allocation41_spill] sm:$0xff] }
 0x60d   : > { %v8178_v8 = vmul.f32 0.25, %v8084_v27  ;;  %v8103_v5 = vadd.f32 %v8102_v9, %v8101_v51  ;;  %v8110_v23 = vadd.f32 %v8109_v10, %v8108_v38  ;;  %v8116_v18 = vrot.slane %v8115_v63, 2  ;;  %10988 = vmatprep.mubr.msk.f32.mxu1 %vm625_vm6, %v15815_v55  ;;  %v9198_v38 = vld [vmem:[%s15232_s4] ss:$0 sm:$0xff] }
 0x60e   : > { %v8090_v34 = vrot.slane %v8089_v57, 1  ;;  %v8097_v3 = vrot.slane %v8096_v33, 1  ;;  %v9504_v39 = vld [vmem:[%s15234_s6] ss:$0 sm:$0xff]  ;;  %v14742_v27 = vadd.f32 %v9198_v38, %v9198_v38 }
 0x60f   : > { %v8104_v59 = vrot.slane %v8103_v5, 1  ;;  %v8111_v1 = vrot.slane %v8110_v23, 1  ;;  %v8117_v14 = vadd.f32 %v8116_v18, %v8115_v63  ;;  %v8313_v42 = vsel %vm8258_vm8, %v8178_v8, %v8312_v50 }
 0x610   : > { %v8091_v37 = vadd.f32 %v8090_v34, %v8089_v57  ;;  %v8098_v26 = vadd.f32 %v8097_v3, %v8096_v33 }
 0x611   : > { %v8105_v48 = vadd.f32 %v8104_v59, %v8103_v5  ;;  %v8112_v41 = vadd.f32 %v8111_v1, %v8110_v23  ;;  %v8118_v22 = vrot.slane %v8117_v14, 1 }
 0x612   : > { %v8179_v43 = vmul.f32 0.25, %v8091_v37  ;;  %v8180_v30 = vmul.f32 0.25, %v8098_v26 }
 0x613   : > { %v8119_v32 = vadd.f32 %v8118_v22, %v8117_v14  ;;  %v8181_v62 = vmul.f32 0.25, %v8105_v48  ;;  %v8182_v61 = vmul.f32 0.25, %v8112_v41 }
 0x614   : > { %v8314_v2 = vsel %vm8260_vm10, %v8179_v43, %v8313_v42  ;;  %10989 = vmatmul.mubr.msk.f32.gmra.mrb[8].mxu1 %vm625_vm6, %v15816_v6 }
 0x615   : > { %v8315_v28 = vsel %vm8262_vm11, %v8180_v30, %v8314_v2  ;;  %v8183_v21 = vmul.f32 0.25, %v8119_v32  ;;  %10991 = vmatprep.mubr.msk.f32.mxu1 %vm625_vm6, %v15817_v56 }
 0x616   : > { %v8316_v53 = vsel %vm8264_vm12, %v8181_v62, %v8315_v28 }
 0x617   : > { %v8317_v58 = vsel %vm8266_vm13, %v8182_v61, %v8316_v53 }
 0x618   : > { %v8318_v54 = vsel %vm8268_vm14, %v8183_v21, %v8317_v58  ;;  %10992 = vmatmul.mubr.msk.f32.gmra.mrb[10].mxu1 %vm625_vm6, %v15818_v0 }
 0x619   : > { %11033 = vmatmul.mubr.msk.f32.gmra.mrb[38].mxu0 %vm625_vm6, %v8318_v54  ;;  %10994 = vmatprep.mubr.msk.f32.mxu1 %vm625_vm6, %v15819_v13 }
 0x620   : > { %10995 = vmatmul.mubr.msk.f32.gmra.mrb[10].mxu1 %vm625_vm6, %v15820_v40 }
 0x621   : > { %10997 = vmatprep.mubr.msk.f32.mxu1 %vm625_vm6, %v15821_v29 }
 0x624   : > { %10998 = vmatmul.mubr.msk.f32.gmra.mrb[12].mxu1 %vm625_vm6, %v15822_v47 }
 0x625   : > { %11000 = vmatprep.mubr.msk.f32.mxu1 %vm625_vm6, %v15823_v35 }
 0x62c   : > { %11001 = vmatmul.mubr.msk.f32.gmra.mrb[12].mxu1 %vm625_vm6, %v15824_v25 }
 0x62d   : > { %11003 = vmatprep.mubr.msk.f32.mxu1 %vm625_vm6, %v15825_v49 }
 0x630   : > { %11004 = vmatmul.mubr.msk.f32.gmra.mrb[14].mxu1 %vm625_vm6, %v15826_v11 }
 0x631   : > { %11006 = vmatprep.mubr.msk.f32.mxu1 %vm625_vm6, %v15827_v16 }
 0x638   : > { %11007 = vmatmul.mubr.msk.f32.gmra.mrb[14].mxu1 %vm625_vm6, %v15828_v36 }
 0x639   : > { %11009 = vmatprep.mubr.msk.f32.mxu1 %vm625_vm6, %v15829_v15 }
 0x63c   : > { %11010 = vmatmul.mubr.msk.f32.gmra.mrb[16].mxu1 %vm625_vm6, %v15830_v31 }
 0x63d   : > { %11012 = vmatprep.mubr.msk.f32.mxu1 %vm625_vm6, %v15831_v12 }
 0x644   : > { %11013 = vmatmul.mubr.msk.f32.gmra.mrb[16].mxu1 %vm625_vm6, %v15832_v19 }
 0x645   : > { %11015 = vmatprep.mubr.msk.f32.mxu1 %vm625_vm6, %v15833_v52 }
 0x648   : > { %11016 = vmatmul.mubr.msk.f32.gmra.mrb[18].mxu1 %vm625_vm6, %v15834_v45 }
 0x649   : > { %11018 = vmatprep.mubr.msk.f32.mxu1 %vm625_vm6, %v15831_v12 }
 0x650   : > { %11019 = vmatmul.mubr.msk.f32.gmra.mrb[18].mxu1 %vm625_vm6, %v15832_v19  ;;  %vm8819_vm6 = vcmask 64512  }
 0x681   : > { %v11025_v20 = vpop.f32.mrb[32].mxu0 }
 0x682   : > { %v8404_v7 = vpop.f32.mrb[33].mxu0  ;;  %v14740_v60 = vadd.f32 %v11025_v20, %v9504_v39 }
 0x683   : > { %v14744_v17 = vadd.f32 %v9504_v39, %v8404_v7 }
 0x684   : > { %v8458_v4 = vrot.slane %v14740_v60, 1  ;;  %v8459_v57 = vrot.slane %v14740_v60, 2  ;;  %v8460_v9 = vrot.slane %v14740_v60, 3  ;;  %v8461_v10 = vrot.slane %v14740_v60, 4 }
 0x685   : > { %v8462_v63 = vrot.slane %v14740_v60, 5  ;;  %v8463_v33 = vrot.slane %v14740_v60, 6  ;;  %v8464_v50 = vrot.slane %v14740_v60, 7  ;;  %v8451_v24 = vrot.slane %v14744_v17, 1 }
 0x686   : > { %v8452_v34 = vrot.slane %v14744_v17, 2  ;;  %v8453_v5 = vrot.slane %v14744_v17, 3  ;;  %v8454_v23 = vrot.slane %v14744_v17, 4  ;;  %v8455_v18 = vrot.slane %v14744_v17, 5 }
 0x687   : > { %v8456_v55 = vrot.slane %v14744_v17, 6 }
 0x6a3   : > { %v11028_v46 = vpop.f32.mrb[34].mxu0 }
 0x6a4   : > { %v8414_v51 = vpop.f32.mrb[35].mxu0  ;;  %v14752_v8 = vadd.f32 %v11028_v46, %v9504_v39 }
 0x6a5   : > { %v14761_v3 = vadd.f32 %v9504_v39, %v8414_v51 }
 0x6c7   : > { %v14784_v47 = vpop.f32.mrb[36].mxu0 }
 0x6c8   : > { %v14788_v16 = vpop.f32.mrb[37].mxu0 }
 0x6cf   : > { %v10978_v37 = vpop.f32.mrb[4].mxu1 }
 0x6d0   : > { %v11074_v42 = vadd.f32 %v14742_v27, %v10978_v37  ;;  %v6241_v48 = vpop.f32.mrb[5].mxu1 }
 0x6d1   : > { %v11076_v30 = vadd.f32 %v14742_v27, %v6241_v48 }
 0x6d2   : > { %v6471_v2 = vcombine.high %v11074_v42, %v11074_v42  ;;  %v6478_v28 = vrot.slane %v11074_v42, %v14141_v44 }
 0x6d3   : > { %v6454_v53 = vcombine.high %v11076_v30, %v11076_v30  ;;  %v6461_v56 = vrot.slane %v11076_v30, %v14141_v44 }
 0x6d4   : > { %v6485_v0 = vrot.slane %v6471_v2, %v14141_v44  ;;  %v6486_v13 = vcombine.high %v6478_v28, %v6478_v28  ;;  %v6819_v40 = vsel %vm6790_vm0, %v6478_v28, 0.0 }
 0x6d5   : > { %v6820_v35 = vrot.slane %v6819_v40, 4  ;;  %v6468_v25 = vrot.slane %v6454_v53, %v14141_v44  ;;  %v6469_v49 = vcombine.high %v6461_v56, %v6461_v56  ;;  %v6791_v11 = vsel %vm6790_vm0, %v6461_v56, 0.0 }
 0x6d6   : > { %v6487_v36 = vcombine.high %v6485_v0, %v6485_v0  ;;  %v6826_v15 = vsel %vm6790_vm0, %v6486_v13, 0.0  ;;  %v6833_v31 = vsel %vm6790_vm0, %v6485_v0, 0.0  ;;  %v6792_v12 = vrot.slane %v6791_v11, 4 }
 0x6d7   : > { %v6821_v19 = vadd.f32 %v6820_v35, %v6819_v40  ;;  %v6827_v52 = vrot.slane %v6826_v15, 4  ;;  %v6834_v45 = vrot.slane %v6833_v31, 4  ;;  %v6470_v20 = vcombine.high %v6468_v25, %v6468_v25 }
 0x6d8   : > { %v6840_v7 = vsel %vm6790_vm0, %v6487_v36, 0.0  ;;  %v6793_v46 = vadd.f32 %v6792_v12, %v6791_v11  ;;  %v6798_v51 = vsel %vm6790_vm0, %v6469_v49, 0.0  ;;  %v6805_v38 = vsel %vm6790_vm0, %v6468_v25, 0.0 }
 0x6d9   : > { %v6822_v39 = vrot.slane %v6821_v19, 2  ;;  %v6828_v37 = vadd.f32 %v6827_v52, %v6826_v15  ;;  %v6835_v42 = vadd.f32 %v6834_v45, %v6833_v31  ;;  %v6841_v48 = vrot.slane %v6840_v7, 4 }
 0x6da   : > { %v6794_v30 = vrot.slane %v6793_v46, 2  ;;  %v6799_v2 = vrot.slane %v6798_v51, 4  ;;  %v6806_v28 = vrot.slane %v6805_v38, 4  ;;  %v6812_v53 = vsel %vm6790_vm0, %v6470_v20, 0.0 }
 0x6db   : > { %v6823_v56 = vadd.f32 %v6822_v39, %v6821_v19  ;;  %v6829_v0 = vrot.slane %v6828_v37, 2  ;;  %v6836_v13 = vrot.slane %v6835_v42, 2  ;;  %v6842_v40 = vadd.f32 %v6841_v48, %v6840_v7  ;;  %v10984_v35 = vpop.f32.mrb[6].mxu1 }
 0x6dc   : > { %v6795_v36 = vadd.f32 %v6794_v30, %v6793_v46  ;;  %v6800_v11 = vadd.f32 %v6799_v2, %v6798_v51  ;;  %v6807_v12 = vadd.f32 %v6806_v28, %v6805_v38  ;;  %v6813_v49 = vrot.slane %v6812_v53, 4  ;;  %v6261_v29 = vpop.f32.mrb[7].mxu1 }
 0x6dd   : > { %v6824_v25 = vrot.slane %v6823_v56, 1  ;;  %v6830_v54 = vadd.f32 %v6829_v0, %v6828_v37  ;;  %v6837_v15 = vadd.f32 %v6836_v13, %v6835_v42  ;;  %v6843_v31 = vrot.slane %v6842_v40, 2 }
 0x6de   : > { %v6796_v52 = vrot.slane %v6795_v36, 1  ;;  %v6801_v45 = vrot.slane %v6800_v11, 2  ;;  %v6808_v26 = vrot.slane %v6807_v12, 2  ;;  %v6814_v58 = vadd.f32 %v6813_v49, %v6812_v53 }
 0x6df   : > { %v6825_v21 = vadd.f32 %v6824_v25, %v6823_v56  ;;  %v6831_v20 = vrot.slane %v6830_v54, 1  ;;  %v6838_v19 = vrot.slane %v6837_v15, 1  ;;  %v6844_v39 = vadd.f32 %v6843_v31, %v6842_v40 }
 0x6e0   : > { %v6797_v6 = vadd.f32 %v6796_v52, %v6795_v36  ;;  %v6802_v7 = vadd.f32 %v6801_v45, %v6800_v11  ;;  %v6809_v48 = vadd.f32 %v6808_v26, %v6807_v12  ;;  %v6815_v46 = vrot.slane %v6814_v58, 2 }
 0x6e1   : > { %v6832_v51 = vadd.f32 %v6831_v20, %v6830_v54  ;;  %v6839_v38 = vadd.f32 %v6838_v19, %v6837_v15  ;;  %v6845_v30 = vrot.slane %v6844_v39, 1  ;;  %v14796_v2 = vmul.f32 0.25, %v6825_v21 }
 0x6e2   : > { %v6803_v37 = vrot.slane %v6802_v7, 1  ;;  %v6810_v42 = vrot.slane %v6809_v48, 1  ;;  %v6816_v28 = vadd.f32 %v6815_v46, %v6814_v58  ;;  %v7239_v0 = vmul.f32 0.25, %v6797_v6 }
 0x6e3   : > { %v6846_v13 = vadd.f32 %v6845_v30, %v6844_v39  ;;  %v14798_v61 = vmul.f32 0.25, %v6832_v51  ;;  %v14800_v53 = vmul.f32 0.25, %v6839_v38  ;;  %v11078_v56 = vadd.f32 %v14742_v27, %v10984_v35 }
 0x6e4   : > { %v6804_v40 = vadd.f32 %v6803_v37, %v6802_v7  ;;  %v6811_v36 = vadd.f32 %v6810_v42, %v6809_v48  ;;  %v6817_v26 = vrot.slane %v6816_v28, 1  ;;  %v11080_v54 = vadd.f32 %v14742_v27, %v6261_v29 }
 0x6e5   : > { %v14804_v11 = vmul.f32 0.25, %v6846_v13  ;;  %v6505_v21 = vcombine.high %v11078_v56, %v11078_v56  ;;  %v6512_v12 = vrot.slane %v11078_v56, %v14141_v44  ;;  %v14808_v58 = vadd.f32 %v14744_v17, %v7239_v0 }
 0x6e6   : > { %v6818_v6 = vadd.f32 %v6817_v26, %v6816_v28  ;;  %v7240_v49 = vmul.f32 0.25, %v6804_v40  ;;  %v14810_v25 = vmul.f32 0.25, %v6811_v36  ;;  %v6488_v15 = vcombine.high %v11080_v54, %v11080_v54 }
 0x6e7   : > { %v6519_v35 = vrot.slane %v6505_v21, %v14141_v44  ;;  %v6520_v31 = vcombine.high %v6512_v12, %v6512_v12  ;;  %v6875_v52 = vsel %vm6790_vm0, %v6512_v12, 0.0  ;;  %v6495_v29 = vrot.slane %v11080_v54, %v14141_v44  ;;  %v14815_v45 = vpop.f32.mrb[8].mxu1 }
 0x6e8   : > { %v14817_v20 = vmul.f32 0.25, %v6818_v6  ;;  %v6876_v19 = vrot.slane %v6875_v52, 4  ;;  %v6502_v39 = vrot.slane %v6488_v15, %v14141_v44  ;;  %v14822_v7 = vadd.f32 %v8451_v24, %v7240_v49  ;;  %v14824_v48 = vpop.f32.mrb[9].mxu1 }
 0x6e9   : > { %v6521_v46 = vcombine.high %v6519_v35, %v6519_v35  ;;  %v6882_v51 = vsel %vm6790_vm0, %v6520_v31, 0.0  ;;  %v6889_v38 = vsel %vm6790_vm0, %v6519_v35, 0.0  ;;  %v6503_v30 = vcombine.high %v6495_v29, %v6495_v29 }
 0x6ea   : > { %v6877_v37 = vadd.f32 %v6876_v19, %v6875_v52  ;;  %v6883_v42 = vrot.slane %v6882_v51, 4  ;;  %v6890_v28 = vrot.slane %v6889_v38, 4  ;;  %v6504_v0 = vcombine.high %v6502_v39, %v6502_v39 }
 0x6eb   : > { %v6896_v13 = vsel %vm6790_vm0, %v6521_v46, 0.0  ;;  %v6847_v56 = vsel %vm6790_vm0, %v6495_v29, 0.0  ;;  %v6854_v40 = vsel %vm6790_vm0, %v6503_v30, 0.0  ;;  %v6861_v24 = vsel %vm6790_vm0, %v6502_v39, 0.0 }
 0x6ec   : > { %v6878_v36 = vrot.slane %v6877_v37, 2  ;;  %v6884_v26 = vadd.f32 %v6883_v42, %v6882_v51  ;;  %v6891_v54 = vadd.f32 %v6890_v28, %v6889_v38  ;;  %v6897_v21 = vrot.slane %v6896_v13, 4 }
 0x6ed   : > { %v6848_v12 = vrot.slane %v6847_v56, 4  ;;  %v6855_v6 = vrot.slane %v6854_v40, 4  ;;  %v6862_v49 = vrot.slane %v6861_v24, 4  ;;  %v6868_v15 = vsel %vm6790_vm0, %v6504_v0, 0.0 }
 0x6ee   : > { %v6879_v35 = vadd.f32 %v6878_v36, %v6877_v37  ;;  %v6885_v31 = vrot.slane %v6884_v26, 2  ;;  %v6892_v52 = vrot.slane %v6891_v54, 2  ;;  %v6898_v19 = vadd.f32 %v6897_v21, %v6896_v13 }
 0x6ef   : > { %v6849_v46 = vadd.f32 %v6848_v12, %v6847_v56  ;;  %v6856_v14 = vadd.f32 %v6855_v6, %v6854_v40  ;;  %v6863_v29 = vadd.f32 %v6862_v49, %v6861_v24  ;;  %v6869_v1 = vrot.slane %v6868_v15, 4 }
 0x6f0   : > { %v6880_v30 = vrot.slane %v6879_v35, 1  ;;  %v6886_v62 = vadd.f32 %v6885_v31, %v6884_v26  ;;  %v6893_v39 = vadd.f32 %v6892_v52, %v6891_v54  ;;  %v6899_v32 = vrot.slane %v6898_v19, 2 }
 0x6f1   : > { %v6850_v51 = vrot.slane %v6849_v46, 2  ;;  %v6857_v38 = vrot.slane %v6856_v14, 2  ;;  %v6864_v42 = vrot.slane %v6863_v29, 2  ;;  %v6870_v28 = vadd.f32 %v6869_v1, %v6868_v15 }
 0x6f2   : > { %v6881_v43 = vadd.f32 %v6880_v30, %v6879_v35  ;;  %v6887_v22 = vrot.slane %v6886_v62, 1  ;;  %v6894_v41 = vrot.slane %v6893_v39, 1  ;;  %v6900_v0 = vadd.f32 %v6899_v32, %v6898_v19 }
 0x6f3   : > { %v6851_v37 = vadd.f32 %v6850_v51, %v6849_v46  ;;  %v6858_v36 = vadd.f32 %v6857_v38, %v6856_v14  ;;  %v6865_v59 = vadd.f32 %v6864_v42, %v6863_v29  ;;  %v6871_v13 = vrot.slane %v6870_v28, 2  ;;  %v14833_v56 = vpop.f32.mrb[10].mxu1 }
 0x6f4   : > { %v6888_v40 = vadd.f32 %v6887_v22, %v6886_v62  ;;  %v6895_v24 = vadd.f32 %v6894_v41, %v6893_v39  ;;  %v6901_v21 = vrot.slane %v6900_v0, 1  ;;  %v7251_v26 = vmul.f32 0.25, %v6881_v43  ;;  %v6301_v54 = vpop.f32.mrb[11].mxu1 }
 0x6f5   : > { %v6852_v12 = vrot.slane %v6851_v37, 1  ;;  %v6859_v6 = vrot.slane %v6858_v36, 1  ;;  %v6866_v49 = vrot.slane %v6865_v59, 1  ;;  %v6872_v31 = vadd.f32 %v6871_v13, %v6870_v28 }
 0x6f6   : > { %v6902_v1 = vadd.f32 %v6901_v21, %v6900_v0  ;;  %v7252_v15 = vmul.f32 0.25, %v6888_v40  ;;  %v7253_v35 = vmul.f32 0.25, %v6895_v24  ;;  %v8583_v32 = vadd.f32 %v8461_v10, %v7251_v26 }
 0x6f7   : > { %v6853_v14 = vadd.f32 %v6852_v12, %v6851_v37  ;;  %v6860_v52 = vadd.f32 %v6859_v6, %v6858_v36  ;;  %v6867_v19 = vadd.f32 %v6866_v49, %v6865_v59  ;;  %v6873_v46 = vrot.slane %v6872_v31, 1 }
 0x6f8   : > { %v7254_v29 = vmul.f32 0.25, %v6902_v1  ;;  %v8584_v41 = vadd.f32 %v8462_v63, %v7252_v15  ;;  %v8585_v22 = vadd.f32 %v8463_v33, %v7253_v35  ;;  %v8719_v43 = vrot.slane %v8583_v32, 4 }
 0x6f9   : > { %v6874_v62 = vadd.f32 %v6873_v46, %v6872_v31  ;;  %v7247_v30 = vmul.f32 0.25, %v6853_v14  ;;  %v7248_v39 = vmul.f32 0.25, %v6860_v52  ;;  %v7249_v51 = vmul.f32 0.25, %v6867_v19 }
 0x6fa   : > { %v8586_v38 = vadd.f32 %v8464_v50, %v7254_v29  ;;  %v8721_v10 = vrot.slane %v8584_v41, 3  ;;  %v8723_v42 = vrot.slane %v8585_v22, 2  ;;  %v8573_v59 = vadd.f32 %v8452_v34, %v14810_v25 }
 0x6fb   : > { %v7250_v28 = vmul.f32 0.25, %v6874_v62  ;;  %v8579_v63 = vadd.f32 %v14740_v60, %v7247_v30  ;;  %v8580_v33 = vadd.f32 %v8458_v4, %v7248_v39  ;;  %v8581_v0 = vadd.f32 %v8459_v57, %v7249_v51 }
 0x6fc   : > { %v8725_v37 = vrot.slane %v8586_v38, 1  ;;  %v8574_v50 = vadd.f32 %v8453_v5, %v14817_v20  ;;  %v8575_v36 = vadd.f32 %v8454_v23, %v14796_v2  ;;  %v8576_v34 = vadd.f32 %v8455_v18, %v14798_v61 }
 0x6fd   : > { %v8582_v4 = vadd.f32 %v8460_v9, %v7250_v28  ;;  %v8713_v25 = vrot.slane %v8580_v33, 7  ;;  %v8715_v13 = vrot.slane %v8581_v0, 6  ;;  %v8577_v57 = vadd.f32 %v8456_v55, %v14800_v53 }
 0x6fe   : > { %v15835_v5 = vrot.slane %v14744_v17, 7  ;;  %v8699_v23 = vrot.slane %v14822_v7, 7  ;;  %v8701_v2 = vrot.slane %v8573_v59, 6  ;;  %v8703_v40 = vrot.slane %v8574_v50, 5 }
 0x6ff   : > { %v8714_v18 = vsel %vm8256_vm1, %v8713_v25, %v8579_v63  ;;  %v8717_v61 = vrot.slane %v8582_v4, 5  ;;  %v8705_v60 = vrot.slane %v8575_v36, 4  ;;  %v8707_v9 = vrot.slane %v8576_v34, 3  ;;  %v14870_v24 = vpop.f32.mrb[12].mxu1 }
 0x700   : > { %v8578_v20 = vadd.f32 %v15835_v5, %v14804_v11  ;;  %v8716_v21 = vsel %vm8258_vm8, %v8715_v13, %v8714_v18  ;;  %v8700_v55 = vsel %vm8256_vm1, %v8699_v23, %v14808_v58  ;;  %v8709_v53 = vrot.slane %v8577_v57, 2  ;;  %v14875_v26 = vpop.f32.mrb[13].mxu1  ;;  %v14877_v11 = vpop.f32.mrb[38].mxu0 }
 0x701   : > { %v8718_v7 = vsel %vm8260_vm10, %v8717_v61, %v8716_v21  ;;  %v8702_v12 = vsel %vm8258_vm8, %v8701_v2, %v8700_v55  ;;  %v11082_v6 = vadd.f32 %v14742_v27, %v14815_v45  ;;  %v11084_v49 = vadd.f32 %v14742_v27, %v14824_v48  ;;  %v14886_v31 = vpop.f32.mrb[39].mxu0 }
 0x702   : > { %v8711_v17 = vrot.slane %v8578_v20, 1  ;;  %v8720_v58 = vsel %vm8262_vm11, %v8719_v43, %v8718_v7  ;;  %v8704_v1 = vsel %vm8260_vm10, %v8703_v40, %v8702_v12  ;;  %v14892_v15 = vadd.f32 %v14742_v27, %v14833_v56 }
 0x703   : > { %v14895_v35 = vadd.f32 %v14742_v27, %v6301_v54  ;;  %v8722_v32 = vsel %vm8264_vm12, %v8721_v10, %v8720_v58  ;;  %v8706_v45 = vsel %vm8262_vm11, %v8705_v60, %v8704_v1  ;;  %v6539_v14 = vcombine.high %v11082_v6, %v11082_v6 }
 0x704   : > { %v6546_v48 = vrot.slane %v11082_v6, %v14141_v44  ;;  %v8724_v56 = vsel %vm8266_vm13, %v8723_v42, %v8722_v32  ;;  %v8708_v52 = vsel %vm8264_vm12, %v8707_v9, %v8706_v45  ;;  %v6522_v54 = vcombine.high %v11084_v49, %v11084_v49 }
 0x705   : > { %v6529_v19 = vrot.slane %v11084_v49, %v14141_v44  ;;  %v8726_v46 = vsel %vm8268_vm14, %v8725_v37, %v8724_v56  ;;  %v8710_v29 = vsel %vm8266_vm13, %v8709_v53, %v8708_v52  ;;  %v6553_v41 = vrot.slane %v6539_v14, %v14141_v44 }
 0x706   : > { %v6554_v22 = vcombine.high %v6546_v48, %v6546_v48  ;;  %8821 = vst.msk [vmem:[%s14903_s11 + $0x8] sm:$0xff] %vm8819_vm6, %v8726_v46  ;;  %v8712_v43 = vsel %vm8268_vm14, %v8711_v17, %v8710_v29  ;;  %v6931_v62 = vsel %vm6790_vm0, %v6546_v48, 0.0  ;;  %v6536_v30 = vrot.slane %v6522_v54, %v14141_v44 }
 0x707   : > { %v6537_v39 = vcombine.high %v6529_v19, %v6529_v19  ;;  %8820 = vst.msk [vmem:[%s14903_s11] sm:$0xff] %vm8819_vm6, %v8712_v43  ;;  %v6555_v51 = vcombine.high %v6553_v41, %v6553_v41  ;;  %v6932_v38 = vrot.slane %v6931_v62, 4  ;;  %v6945_v42 = vsel %vm6790_vm0, %v6553_v41, 0.0 }
 0x708   : > { %v6938_v10 = vsel %vm6790_vm0, %v6554_v22, 0.0  ;;  %v6946_v28 = vrot.slane %v6945_v42, 4  ;;  %v6538_v63 = vcombine.high %v6536_v30, %v6536_v30  ;;  %v6903_v33 = vsel %vm6790_vm0, %v6529_v19, 0.0 }
 0x709   : > { %v6939_v59 = vrot.slane %v6938_v10, 4  ;;  %v6933_v0 = vadd.f32 %v6932_v38, %v6931_v62  ;;  %v6952_v37 = vsel %vm6790_vm0, %v6555_v51, 0.0  ;;  %v6904_v50 = vrot.slane %v6903_v33, 4 }
 0x70a   : > { %v6910_v36 = vsel %vm6790_vm0, %v6537_v39, 0.0  ;;  %v6947_v4 = vadd.f32 %v6946_v28, %v6945_v42  ;;  %v6953_v25 = vrot.slane %v6952_v37, 4  ;;  %v6917_v20 = vsel %vm6790_vm0, %v6536_v30, 0.0 }
 0x70b   : > { %v6940_v34 = vadd.f32 %v6939_v59, %v6938_v10  ;;  %v6911_v13 = vrot.slane %v6910_v36, 4  ;;  %v6934_v57 = vrot.slane %v6933_v0, 2  ;;  %v6905_v5 = vadd.f32 %v6904_v50, %v6903_v33  ;;  %v14925_v2 = vpop.f32.mrb[14].mxu1 }
 0x70c   : > { %v6924_v23 = vsel %vm6790_vm0, %v6538_v63, 0.0  ;;  %v6948_v18 = vrot.slane %v6947_v4, 2  ;;  %v6954_v61 = vadd.f32 %v6953_v25, %v6952_v37  ;;  %v14927_v9 = vpop.f32.mrb[15].mxu1  ;;  %v6918_v53 = vrot.slane %v6917_v20, 4 }
 0x70d   : > { %v6941_v40 = vrot.slane %v6940_v34, 2  ;;  %v6912_v60 = vadd.f32 %v6911_v13, %v6910_v36  ;;  %v6935_v21 = vadd.f32 %v6934_v57, %v6933_v0  ;;  %v6906_v55 = vrot.slane %v6905_v5, 2 }
 0x70e   : > { %v6925_v17 = vrot.slane %v6924_v23, 4  ;;  %v6949_v12 = vadd.f32 %v6948_v18, %v6947_v4  ;;  %v6955_v6 = vrot.slane %v6954_v61, 2  ;;  %v6919_v32 = vadd.f32 %v6918_v53, %v6917_v20 }
 0x70f   : > { %v6942_v7 = vadd.f32 %v6941_v40, %v6940_v34  ;;  %v6913_v49 = vrot.slane %v6912_v60, 2  ;;  %v6936_v58 = vrot.slane %v6935_v21, 1  ;;  %v6907_v1 = vadd.f32 %v6906_v55, %v6905_v5 }
 0x710   : > { %v6926_v45 = vadd.f32 %v6925_v17, %v6924_v23  ;;  %v6950_v48 = vrot.slane %v6949_v12, 1  ;;  %v6956_v56 = vadd.f32 %v6955_v6, %v6954_v61  ;;  %v6920_v46 = vrot.slane %v6919_v32, 2 }
 0x711   : > { %v6943_v14 = vrot.slane %v6942_v7, 1  ;;  %v6914_v52 = vadd.f32 %v6913_v49, %v6912_v60  ;;  %v6937_v54 = vadd.f32 %v6936_v58, %v6935_v21  ;;  %v6908_v19 = vrot.slane %v6907_v1, 1 }
 0x712   : > { %v6927_v29 = vrot.slane %v6926_v45, 2  ;;  %v6951_v22 = vadd.f32 %v6950_v48, %v6949_v12  ;;  %v6957_v43 = vrot.slane %v6956_v56, 1  ;;  %v6921_v51 = vadd.f32 %v6920_v46, %v6919_v32 }
 0x713   : > { %v6944_v41 = vadd.f32 %v6943_v14, %v6942_v7  ;;  %v6915_v62 = vrot.slane %v6914_v52, 1  ;;  %v14929_v30 = vmul.f32 0.25, %v6937_v54  ;;  %v6909_v39 = vadd.f32 %v6908_v19, %v6907_v1 }
 0x714   : > { %v6928_v38 = vadd.f32 %v6927_v29, %v6926_v45  ;;  %v6958_v10 = vadd.f32 %v6957_v43, %v6956_v56  ;;  %v14933_v59 = vmul.f32 0.25, %v6951_v22  ;;  %v6922_v63 = vrot.slane %v6921_v51, 1 }
 0x715   : > { %v14931_v42 = vmul.f32 0.25, %v6944_v41  ;;  %v6916_v28 = vadd.f32 %v6915_v62, %v6914_v52  ;;  %v7255_v0 = vmul.f32 0.25, %v6909_v39  ;;  %v6573_v37 = vcombine.high %v14892_v15, %v14892_v15 }
 0x716   : > { %v6929_v33 = vrot.slane %v6928_v38, 1  ;;  %v14937_v50 = vmul.f32 0.25, %v6958_v10  ;;  %v6580_v34 = vrot.slane %v14892_v15, %v14141_v44  ;;  %v6556_v4 = vcombine.high %v14895_v35, %v14895_v35 }
 0x717   : > { %v14939_v36 = vmul.f32 0.25, %v6916_v28  ;;  %v6923_v25 = vadd.f32 %v6922_v63, %v6921_v51  ;;  %v6587_v57 = vrot.slane %v6573_v37, %v14141_v44  ;;  %v6563_v5 = vrot.slane %v14895_v35, %v14141_v44  ;;  %v14948_v20 = vpop.f32.mrb[16].mxu1 }
 0x718   : > { %v6930_v13 = vadd.f32 %v6929_v33, %v6928_v38  ;;  %v6588_v23 = vcombine.high %v6580_v34, %v6580_v34  ;;  %v6987_v40 = vsel %vm6790_vm0, %v6580_v34, 0.0  ;;  %v6570_v18 = vrot.slane %v6556_v4, %v14141_v44  ;;  %v14955_v15 = vpop.f32.mrb[17].mxu1 }
 0x719   : > { %v14953_v61 = vadd.f32 %v14761_v3, %v7255_v0  ;;  %v14957_v60 = vmul.f32 0.25, %v6923_v25  ;;  %v6589_v55 = vcombine.high %v6587_v57, %v6587_v57  ;;  %v6988_v53 = vrot.slane %v6987_v40, 4 }
 0x71a   : > { %v14959_v21 = vmul.f32 0.25, %v6930_v13  ;;  %v6994_v35 = vsel %vm6790_vm0, %v6588_v23, 0.0  ;;  %v7001_v17 = vsel %vm6790_vm0, %v6587_v57, 0.0  ;;  %v6571_v7 = vcombine.high %v6563_v5, %v6563_v5 }
 0x71b   : > { %v6572_v12 = vcombine.high %v6570_v18, %v6570_v18  ;;  %v6989_v6 = vadd.f32 %v6988_v53, %v6987_v40  ;;  %v6995_v49 = vrot.slane %v6994_v35, 4  ;;  %v7002_v58 = vrot.slane %v7001_v17, 4 }
 0x71c   : > { %v7008_v1 = vsel %vm6790_vm0, %v6589_v55, 0.0  ;;  %v6959_v45 = vsel %vm6790_vm0, %v6563_v5, 0.0  ;;  %v6966_v14 = vsel %vm6790_vm0, %v6571_v7, 0.0  ;;  %v6973_v48 = vsel %vm6790_vm0, %v6570_v18, 0.0 }
 0x71d   : > { %v7009_v32 = vrot.slane %v7008_v1, 4  ;;  %v6990_v56 = vrot.slane %v6989_v6, 2  ;;  %v6996_v52 = vadd.f32 %v6995_v49, %v6994_v35  ;;  %v7003_v54 = vadd.f32 %v7002_v58, %v7001_v17 }
 0x71e   : > { %v6960_v19 = vrot.slane %v6959_v45, 4  ;;  %v6967_v29 = vrot.slane %v6966_v14, 4  ;;  %v6974_v41 = vrot.slane %v6973_v48, 4  ;;  %v6980_v22 = vsel %vm6790_vm0, %v6572_v12, 0.0 }
 0x71f   : > { %v7010_v46 = vadd.f32 %v7009_v32, %v7008_v1  ;;  %v6991_v43 = vadd.f32 %v6990_v56, %v6989_v6  ;;  %v6997_v62 = vrot.slane %v6996_v52, 2  ;;  %v7004_v39 = vrot.slane %v7003_v54, 2 }
 0x720   : > { %v6961_v51 = vadd.f32 %v6960_v19, %v6959_v45  ;;  %v6968_v10 = vadd.f32 %v6967_v29, %v6966_v14  ;;  %v6975_v28 = vadd.f32 %v6974_v41, %v6973_v48  ;;  %v6981_v63 = vrot.slane %v6980_v22, 4 }
 0x721   : > { %v7011_v38 = vrot.slane %v7010_v46, 2  ;;  %v6992_v33 = vrot.slane %v6991_v43, 1  ;;  %v6998_v0 = vadd.f32 %v6997_v62, %v6996_v52  ;;  %v7005_v37 = vadd.f32 %v7004_v39, %v7003_v54 }
 0x722   : > { %v6962_v34 = vrot.slane %v6961_v51, 2  ;;  %v6969_v25 = vrot.slane %v6968_v10, 2  ;;  %v6976_v13 = vrot.slane %v6975_v28, 2  ;;  %v6982_v57 = vadd.f32 %v6981_v63, %v6980_v22 }
 0x723   : > { %v7012_v4 = vadd.f32 %v7011_v38, %v7010_v46  ;;  %v6993_v5 = vadd.f32 %v6992_v33, %v6991_v43  ;;  %v6999_v23 = vrot.slane %v6998_v0, 1  ;;  %v7006_v40 = vrot.slane %v7005_v37, 1  ;;  %v14968_v55 = vpop.f32.mrb[18].mxu1 }
 0x724   : > { %v6963_v18 = vadd.f32 %v6962_v34, %v6961_v51  ;;  %v6970_v35 = vadd.f32 %v6969_v25, %v6968_v10  ;;  %v6977_v17 = vadd.f32 %v6976_v13, %v6975_v28  ;;  %v6983_v7 = vrot.slane %v6982_v57, 2  ;;  %v14970_v12 = vpop.f32.mrb[19].mxu1 }
 0x725   : > { %v7013_v53 = vrot.slane %v7012_v4, 1  ;;  %v7000_v6 = vadd.f32 %v6999_v23, %v6998_v0  ;;  %v7007_v49 = vadd.f32 %v7006_v40, %v7005_v37  ;;  %v7267_v58 = vmul.f32 0.25, %v6993_v5 }
 0x726   : > { %v6964_v1 = vrot.slane %v6963_v18, 1  ;;  %v6971_v45 = vrot.slane %v6970_v35, 1  ;;  %v6978_v14 = vrot.slane %v6977_v17, 1  ;;  %v6984_v48 = vadd.f32 %v6983_v7, %v6982_v57 }
 0x727   : > { %v7014_v32 = vadd.f32 %v7013_v53, %v7012_v4  ;;  %v7268_v56 = vmul.f32 0.25, %v7000_v6  ;;  %v7269_v52 = vmul.f32 0.25, %v7007_v49  ;;  %v15836_v19 = vrot.slane %v14752_v8, 4 }
 0x728   : > { %v6965_v54 = vadd.f32 %v6964_v1, %v6963_v18  ;;  %v6972_v41 = vadd.f32 %v6971_v45, %v6970_v35  ;;  %v6979_v22 = vadd.f32 %v6978_v14, %v6977_v17  ;;  %v6985_v43 = vrot.slane %v6984_v48, 1 }
 0x729   : > { %v8599_v46 = vadd.f32 %v15836_v19, %v7267_v58  ;;  %v7270_v29 = vmul.f32 0.25, %v7014_v32  ;;  %v15837_v39 = vrot.slane %v14752_v8, 5  ;;  %v15838_v38 = vrot.slane %v14752_v8, 6 }
 0x72a   : > { %v7263_v62 = vmul.f32 0.25, %v6965_v54  ;;  %v6986_v63 = vadd.f32 %v6985_v43, %v6984_v48  ;;  %v7264_v33 = vmul.f32 0.25, %v6972_v41  ;;  %v7265_v0 = vmul.f32 0.25, %v6979_v22 }
 0x72b   : > { %v8600_v51 = vadd.f32 %v15837_v39, %v7268_v56  ;;  %v8601_v10 = vadd.f32 %v15838_v38, %v7269_v52  ;;  %v8747_v28 = vrot.slane %v8599_v46, 4  ;;  %v15839_v37 = vrot.slane %v14752_v8, 7 }
 0x72c   : > { %v8595_v4 = vadd.f32 %v14752_v8, %v7263_v62  ;;  %v15840_v57 = vrot.slane %v14761_v3, 1  ;;  %v7266_v23 = vmul.f32 0.25, %v6986_v63  ;;  %v15841_v40 = vrot.slane %v14752_v8, 1 }
 0x72d   : > { %v8602_v34 = vadd.f32 %v15839_v37, %v7270_v29  ;;  %v8749_v25 = vrot.slane %v8600_v51, 3  ;;  %v8751_v13 = vrot.slane %v8601_v10, 2  ;;  %v15842_v53 = vrot.slane %v14752_v8, 2 }
 0x72e   : > { %v8588_v5 = vadd.f32 %v15840_v57, %v14939_v36  ;;  %v8596_v18 = vadd.f32 %v15841_v40, %v7264_v33  ;;  %v15843_v7 = vrot.slane %v14761_v3, 2  ;;  %v15844_v49 = vrot.slane %v14761_v3, 3 }
 0x72f   : > { %v8597_v35 = vadd.f32 %v15842_v53, %v7265_v0  ;;  %v8753_v17 = vrot.slane %v8602_v34, 1  ;;  %v15845_v1 = vrot.slane %v14761_v3, 4  ;;  %v15846_v32 = vrot.slane %v14761_v3, 5 }
 0x730   : > { %v8589_v6 = vadd.f32 %v15843_v7, %v14957_v60  ;;  %v8590_v58 = vadd.f32 %v15844_v49, %v14959_v21  ;;  %v15847_v14 = vrot.slane %v14752_v8, 3  ;;  %v8741_v56 = vrot.slane %v8596_v18, 7 }
 0x731   : > { %v8591_v36 = vadd.f32 %v15845_v1, %v14929_v30  ;;  %v8592_v45 = vadd.f32 %v15846_v32, %v14931_v42  ;;  %v8743_v52 = vrot.slane %v8597_v35, 6  ;;  %v15848_v60 = vrot.slane %v14761_v3, 6 }
 0x732   : > { %v8598_v48 = vadd.f32 %v15847_v14, %v7266_v23  ;;  %v15849_v21 = vrot.slane %v14761_v3, 7  ;;  %v8727_v46 = vrot.slane %v8588_v5, 7  ;;  %v8729_v29 = vrot.slane %v8589_v6, 6 }
 0x733   : > { %v8593_v54 = vadd.f32 %v15848_v60, %v14933_v59  ;;  %v8731_v30 = vrot.slane %v8590_v58, 5  ;;  %v8742_v41 = vsel %vm8256_vm1, %v8741_v56, %v8595_v4  ;;  %v8733_v42 = vrot.slane %v8591_v36, 4 }
 0x734   : > { %v8594_v19 = vadd.f32 %v15849_v21, %v14937_v50  ;;  %v8745_v22 = vrot.slane %v8598_v48, 5  ;;  %v8735_v43 = vrot.slane %v8592_v45, 3  ;;  %v8744_v8 = vsel %vm8258_vm8, %v8743_v52, %v8742_v41 }
 0x735   : > { %v8728_v62 = vsel %vm8256_vm1, %v8727_v46, %v14953_v61  ;;  %v8737_v39 = vrot.slane %v8593_v54, 2  ;;  %v11090_v50 = vadd.f32 %v14742_v27, %v14870_v24  ;;  %v11092_v38 = vadd.f32 %v14742_v27, %v14875_v26 }
 0x736   : > { %v8739_v51 = vrot.slane %v8594_v19, 1  ;;  %v8746_v59 = vsel %vm8260_vm10, %v8745_v22, %v8744_v8  ;;  %v8730_v3 = vsel %vm8258_vm8, %v8729_v29, %v8728_v62  ;;  %v15022_v61 = vadd.f32 %v14742_v27, %v14925_v2 }
 0x737   : > { %v8748_v10 = vsel %vm8262_vm11, %v8747_v28, %v8746_v59  ;;  %v8732_v63 = vsel %vm8260_vm10, %v8731_v30, %v8730_v3  ;;  %v15026_v33 = vadd.f32 %v14742_v27, %v14927_v9  ;;  %v6607_v37 = vcombine.high %v11090_v50, %v11090_v50 }
 0x738   : > { %v8750_v0 = vsel %vm8264_vm12, %v8749_v25, %v8748_v10  ;;  %v8734_v24 = vsel %vm8262_vm11, %v8733_v42, %v8732_v63  ;;  %v6614_v26 = vrot.slane %v11090_v50, %v14141_v44  ;;  %v6590_v4 = vcombine.high %v11092_v38, %v11092_v38 }
 0x739   : > { %v8752_v28 = vsel %vm8266_vm13, %v8751_v13, %v8750_v0  ;;  %v8736_v34 = vsel %vm8264_vm12, %v8735_v43, %v8734_v24  ;;  %v6597_v2 = vrot.slane %v11092_v38, %v14141_v44  ;;  %v6621_v5 = vrot.slane %v6607_v37, %v14141_v44 }
 0x73a   : > { %v8754_v57 = vsel %vm8268_vm14, %v8753_v17, %v8752_v28  ;;  %v8738_v9 = vsel %vm8266_vm13, %v8737_v39, %v8736_v34  ;;  %v6622_v25 = vcombine.high %v6614_v26, %v6614_v26  ;;  %v7043_v40 = vsel %vm6790_vm0, %v6614_v26, 0.0 }
 0x73b   : > { %8823 = vst.msk [vmem:[%s14903_s11 + $0x18] sm:$0xff] %vm8819_vm6, %v8754_v57  ;;  %v8740_v23 = vsel %vm8268_vm14, %v8739_v51, %v8738_v9  ;;  %v6604_v13 = vrot.slane %v6590_v4, %v14141_v44  ;;  %v6605_v18 = vcombine.high %v6597_v2, %v6597_v2  ;;  %v6623_v53 = vcombine.high %v6621_v5, %v6621_v5 }
 0x73c   : > { %8822 = vst.msk [vmem:[%s14903_s11 + $0x10] sm:$0xff] %vm8819_vm6, %v8740_v23  ;;  %v7044_v35 = vrot.slane %v7043_v40, 4  ;;  %v7050_v17 = vsel %vm6790_vm0, %v6622_v25, 0.0  ;;  %v7057_v7 = vsel %vm6790_vm0, %v6621_v5, 0.0  ;;  %v7015_v1 = vsel %vm6790_vm0, %v6597_v2, 0.0 }
 0x73d   : > { %v7051_v6 = vrot.slane %v7050_v17, 4  ;;  %v7058_v49 = vrot.slane %v7057_v7, 4  ;;  %v6606_v58 = vcombine.high %v6604_v13, %v6604_v13  ;;  %v7064_v32 = vsel %vm6790_vm0, %v6623_v53, 0.0 }
 0x73e   : > { %v7045_v36 = vadd.f32 %v7044_v35, %v7043_v40  ;;  %v7016_v45 = vrot.slane %v7015_v1, 4  ;;  %v7022_v14 = vsel %vm6790_vm0, %v6605_v18, 0.0  ;;  %v7065_v52 = vrot.slane %v7064_v32, 4 }
 0x73f   : > { %v7052_v48 = vadd.f32 %v7051_v6, %v7050_v17  ;;  %v7059_v56 = vadd.f32 %v7058_v49, %v7057_v7  ;;  %v7023_v60 = vrot.slane %v7022_v14, 4  ;;  %v7029_v19 = vsel %vm6790_vm0, %v6604_v13, 0.0 }
 0x740   : > { %v7046_v54 = vrot.slane %v7045_v36, 2  ;;  %v7017_v21 = vadd.f32 %v7016_v45, %v7015_v1  ;;  %v7036_v46 = vsel %vm6790_vm0, %v6606_v58, 0.0  ;;  %v7066_v41 = vadd.f32 %v7065_v52, %v7064_v32 }
 0x741   : > { %v7053_v29 = vrot.slane %v7052_v48, 2  ;;  %v7060_v30 = vrot.slane %v7059_v56, 2  ;;  %v7024_v22 = vadd.f32 %v7023_v60, %v7022_v14  ;;  %v7030_v8 = vrot.slane %v7029_v19, 4 }
 0x742   : > { %v7047_v42 = vadd.f32 %v7046_v54, %v7045_v36  ;;  %v7018_v43 = vrot.slane %v7017_v21, 2  ;;  %v7037_v62 = vrot.slane %v7036_v46, 4  ;;  %v7067_v59 = vrot.slane %v7066_v41, 2 }
 0x743   : > { %v7054_v39 = vadd.f32 %v7053_v29, %v7052_v48  ;;  %v7061_v51 = vadd.f32 %v7060_v30, %v7059_v56  ;;  %v7025_v3 = vrot.slane %v7024_v22, 2  ;;  %v7031_v10 = vadd.f32 %v7030_v8, %v7029_v19 }
 0x744   : > { %v7048_v50 = vrot.slane %v7047_v42, 1  ;;  %v7019_v38 = vadd.f32 %v7018_v43, %v7017_v21  ;;  %v7038_v63 = vadd.f32 %v7037_v62, %v7036_v46  ;;  %v7068_v37 = vadd.f32 %v7067_v59, %v7066_v41  ;;  %v15077_v46 = vld [vmem:[%s15234_s6] ss:$0 sm:$0xff] }
 0x745   : > { %v7055_v0 = vrot.slane %v7054_v39, 1  ;;  %v7062_v24 = vrot.slane %v7061_v51, 1  ;;  %v7026_v26 = vadd.f32 %v7025_v3, %v7024_v22  ;;  %v7032_v4 = vrot.slane %v7031_v10, 2 }
 0x746   : > { %v7049_v28 = vadd.f32 %v7048_v50, %v7047_v42  ;;  %v7020_v34 = vrot.slane %v7019_v38, 1  ;;  %v7039_v2 = vrot.slane %v7038_v63, 2  ;;  %v7069_v5 = vrot.slane %v7068_v37, 1 }
 0x747   : > { %v7056_v57 = vadd.f32 %v7055_v0, %v7054_v39  ;;  %v7063_v9 = vadd.f32 %v7062_v24, %v7061_v51  ;;  %v7027_v25 = vrot.slane %v7026_v26, 1  ;;  %v7033_v13 = vadd.f32 %v7032_v4, %v7031_v10 }
 0x748   : > { %v15051_v23 = vmul.f32 0.25, %v7049_v28  ;;  %v7021_v40 = vadd.f32 %v7020_v34, %v7019_v38  ;;  %v7040_v18 = vadd.f32 %v7039_v2, %v7038_v63  ;;  %v7070_v53 = vadd.f32 %v7069_v5, %v7068_v37 }
 0x749   : > { %v15053_v35 = vmul.f32 0.25, %v7056_v57  ;;  %v15055_v17 = vmul.f32 0.25, %v7063_v9  ;;  %v7028_v7 = vadd.f32 %v7027_v25, %v7026_v26  ;;  %v7034_v6 = vrot.slane %v7033_v13, 1 }
 0x74a   : > { %v7041_v49 = vrot.slane %v7040_v18, 1  ;;  %v15057_v58 = vmul.f32 0.25, %v7021_v40  ;;  %v6641_v1 = vcombine.high %v15022_v61, %v15022_v61  ;;  %v15061_v36 = vmul.f32 0.25, %v7070_v53 }
 0x74b   : > { %v15063_v32 = vmul.f32 0.25, %v7028_v7  ;;  %v6648_v45 = vrot.slane %v15022_v61, %v14141_v44  ;;  %v6624_v14 = vcombine.high %v15026_v33, %v15026_v33  ;;  %v7035_v48 = vadd.f32 %v7034_v6, %v7033_v13 }
 0x74c   : > { %v7042_v56 = vadd.f32 %v7041_v49, %v7040_v18  ;;  %v6655_v52 = vrot.slane %v6641_v1, %v14141_v44  ;;  %v6631_v60 = vrot.slane %v15026_v33, %v14141_v44  ;;  %v15081_v61 = vadd.f32 %v15077_v46, %v14784_v47 }
 0x74d   : > { %v6656_v54 = vcombine.high %v6648_v45, %v6648_v45  ;;  %v7099_v21 = vsel %vm6790_vm0, %v6648_v45, 0.0  ;;  %v6638_v19 = vrot.slane %v6624_v14, %v14141_v44  ;;  %v15083_v29 = vmul.f32 0.25, %v7035_v48 }
 0x74e   : > { %v15085_v30 = vmul.f32 0.25, %v7042_v56  ;;  %v6657_v41 = vcombine.high %v6655_v52, %v6655_v52  ;;  %v7100_v33 = vrot.slane %v7099_v21, 4  ;;  %v7113_v42 = vsel %vm6790_vm0, %v6655_v52, 0.0 }
 0x74f   : > { %v7106_v22 = vsel %vm6790_vm0, %v6656_v54, 0.0  ;;  %v6639_v43 = vcombine.high %v6631_v60, %v6631_v60  ;;  %v6640_v8 = vcombine.high %v6638_v19, %v6638_v19  ;;  %v7114_v51 = vrot.slane %v7113_v42, 4 }
 0x750   : > { %v7101_v62 = vadd.f32 %v7100_v33, %v7099_v21  ;;  %v7107_v39 = vrot.slane %v7106_v22, 4  ;;  %v7120_v59 = vsel %vm6790_vm0, %v6657_v41, 0.0  ;;  %v7071_v47 = vsel %vm6790_vm0, %v6631_v60, 0.0 }
 0x751   : > { %v7121_v3 = vrot.slane %v7120_v59, 4  ;;  %v7078_v50 = vsel %vm6790_vm0, %v6639_v43, 0.0  ;;  %v7085_v38 = vsel %vm6790_vm0, %v6638_v19, 0.0  ;;  %v7115_v0 = vadd.f32 %v7114_v51, %v7113_v42 }
 0x752   : > { %v7102_v10 = vrot.slane %v7101_v62, 2  ;;  %v7108_v63 = vadd.f32 %v7107_v39, %v7106_v22  ;;  %v7072_v24 = vrot.slane %v7071_v47, 4  ;;  %v7079_v26 = vrot.slane %v7078_v50, 4 }
 0x753   : > { %v7122_v37 = vadd.f32 %v7121_v3, %v7120_v59  ;;  %v7086_v28 = vrot.slane %v7085_v38, 4  ;;  %v7092_v34 = vsel %vm6790_vm0, %v6640_v8, 0.0  ;;  %v7116_v57 = vrot.slane %v7115_v0, 2 }
 0x754   : > { %v7103_v4 = vadd.f32 %v7102_v10, %v7101_v62  ;;  %v7109_v2 = vrot.slane %v7108_v63, 2  ;;  %v7073_v9 = vadd.f32 %v7072_v24, %v7071_v47  ;;  %v7080_v25 = vadd.f32 %v7079_v26, %v7078_v50 }
 0x755   : > { %v7123_v5 = vrot.slane %v7122_v37, 2  ;;  %v7087_v40 = vadd.f32 %v7086_v28, %v7085_v38  ;;  %v7093_v13 = vrot.slane %v7092_v34, 4  ;;  %v7117_v7 = vadd.f32 %v7116_v57, %v7115_v0 }
 0x756   : > { %v7104_v18 = vrot.slane %v7103_v4, 1  ;;  %v7110_v53 = vadd.f32 %v7109_v2, %v7108_v63  ;;  %v7074_v6 = vrot.slane %v7073_v9, 2  ;;  %v7081_v1 = vrot.slane %v7080_v25, 2 }
 0x757   : > { %v7124_v49 = vadd.f32 %v7123_v5, %v7122_v37  ;;  %v7088_v45 = vrot.slane %v7087_v40, 2  ;;  %v7094_v14 = vadd.f32 %v7093_v13, %v7092_v34  ;;  %v7118_v52 = vrot.slane %v7117_v7, 1 }
 0x758   : > { %v7105_v48 = vadd.f32 %v7104_v18, %v7103_v4  ;;  %v7111_v56 = vrot.slane %v7110_v53, 1  ;;  %v7075_v60 = vadd.f32 %v7074_v6, %v7073_v9  ;;  %v7082_v21 = vadd.f32 %v7081_v1, %v7080_v25 }
 0x759   : > { %v7125_v54 = vrot.slane %v7124_v49, 1  ;;  %v7089_v19 = vadd.f32 %v7088_v45, %v7087_v40  ;;  %v7095_v41 = vrot.slane %v7094_v14, 2  ;;  %v7119_v22 = vadd.f32 %v7118_v52, %v7117_v7 }
 0x75a   : > { %v7112_v33 = vadd.f32 %v7111_v56, %v7110_v53  ;;  %v7283_v42 = vmul.f32 0.25, %v7105_v48  ;;  %v7076_v43 = vrot.slane %v7075_v60, 1  ;;  %v7083_v62 = vrot.slane %v7082_v21, 1 }
 0x75b   : > { %v7126_v8 = vadd.f32 %v7125_v54, %v7124_v49  ;;  %v7090_v39 = vrot.slane %v7089_v19, 1  ;;  %v7096_v51 = vadd.f32 %v7095_v41, %v7094_v14  ;;  %v7285_v3 = vmul.f32 0.25, %v7119_v22 }
 0x75c   : > { %v7284_v59 = vmul.f32 0.25, %v7112_v33  ;;  %v7077_v47 = vadd.f32 %v7076_v43, %v7075_v60  ;;  %v8486_v50 = vrot.slane %v15081_v61, 1  ;;  %v7084_v10 = vadd.f32 %v7083_v62, %v7082_v21 }
 0x75d   : > { %v7286_v38 = vmul.f32 0.25, %v7126_v8  ;;  %v7091_v63 = vadd.f32 %v7090_v39, %v7089_v19  ;;  %v7097_v0 = vrot.slane %v7096_v51, 1  ;;  %v8487_v37 = vrot.slane %v15081_v61, 2 }
 0x75e   : > { %v7279_v24 = vmul.f32 0.25, %v7077_v47  ;;  %v8488_v26 = vrot.slane %v15081_v61, 3  ;;  %v8489_v28 = vrot.slane %v15081_v61, 4  ;;  %v7280_v4 = vmul.f32 0.25, %v7084_v10 }
 0x75f   : > { %v7098_v34 = vadd.f32 %v7097_v0, %v7096_v51  ;;  %v7281_v2 = vmul.f32 0.25, %v7091_v63  ;;  %v8490_v57 = vrot.slane %v15081_v61, 5  ;;  %v8491_v9 = vrot.slane %v15081_v61, 6 }
 0x760   : > { %v8492_v5 = vrot.slane %v15081_v61, 7  ;;  %v8611_v25 = vadd.f32 %v15081_v61, %v7279_v24  ;;  %v8615_v40 = vadd.f32 %v8489_v28, %v7283_v42  ;;  %v8612_v18 = vadd.f32 %v8486_v50, %v7280_v4 }
 0x761   : > { %v7282_v13 = vmul.f32 0.25, %v7098_v34  ;;  %v8613_v53 = vadd.f32 %v8487_v37, %v7281_v2  ;;  %v8616_v7 = vadd.f32 %v8490_v57, %v7284_v59  ;;  %v8617_v6 = vadd.f32 %v8491_v9, %v7285_v3 }
 0x762   : > { %v8618_v49 = vadd.f32 %v8492_v5, %v7286_v38  ;;  %v8775_v1 = vrot.slane %v8615_v40, 4  ;;  %v8425_v45 = vadd.f32 %v15077_v46, %v14788_v16  ;;  %v8769_v48 = vrot.slane %v8612_v18, 7 }
 0x763   : > { %v8614_v14 = vadd.f32 %v8488_v26, %v7282_v13  ;;  %v8771_v56 = vrot.slane %v8613_v53, 6  ;;  %v8777_v52 = vrot.slane %v8616_v7, 3  ;;  %v8779_v60 = vrot.slane %v8617_v6, 2 }
 0x764   : > { %v8781_v54 = vrot.slane %v8618_v49, 1  ;;  %v8479_v21 = vrot.slane %v8425_v45, 1  ;;  %v8480_v19 = vrot.slane %v8425_v45, 2  ;;  %v8770_v61 = vsel %vm8256_vm1, %v8769_v48, %v8611_v25 }
 0x765   : > { %v8773_v41 = vrot.slane %v8614_v14, 5  ;;  %v8481_v33 = vrot.slane %v8425_v45, 3  ;;  %v8482_v22 = vrot.slane %v8425_v45, 4  ;;  %v8772_v42 = vsel %vm8258_vm8, %v8771_v56, %v8770_v61 }
 0x766   : > { %v8483_v43 = vrot.slane %v8425_v45, 5  ;;  %v8484_v8 = vrot.slane %v8425_v45, 6  ;;  %v8485_v62 = vrot.slane %v8425_v45, 7  ;;  %v8603_v39 = vadd.f32 %v8425_v45, %v15057_v58 }
 0x767   : > { %v8774_v16 = vsel %vm8260_vm10, %v8773_v41, %v8772_v42  ;;  %v8604_v51 = vadd.f32 %v8479_v21, %v15063_v32  ;;  %v8605_v59 = vadd.f32 %v8480_v19, %v15083_v29  ;;  %v8606_v47 = vadd.f32 %v8481_v33, %v15085_v30 }
 0x768   : > { %v8776_v3 = vsel %vm8262_vm11, %v8775_v1, %v8774_v16  ;;  %v8607_v50 = vadd.f32 %v8482_v22, %v15051_v23  ;;  %v8608_v38 = vadd.f32 %v8483_v43, %v15053_v35  ;;  %v8609_v63 = vadd.f32 %v8484_v8, %v15055_v17 }
 0x769   : > { %v8778_v10 = vsel %vm8264_vm12, %v8777_v52, %v8776_v3  ;;  %v8610_v0 = vadd.f32 %v8485_v62, %v15061_v36  ;;  %v8755_v58 = vrot.slane %v8604_v51, 7  ;;  %v8757_v32 = vrot.slane %v8605_v59, 6 }
 0x76a   : > { %v8780_v24 = vsel %vm8266_vm13, %v8779_v60, %v8778_v10  ;;  %v8759_v37 = vrot.slane %v8606_v47, 5  ;;  %v8761_v35 = vrot.slane %v8607_v50, 4  ;;  %v11098_v30 = vadd.f32 %v14742_v27, %v14948_v20 }
 0x76b   : > { %v8782_v29 = vsel %vm8268_vm14, %v8781_v54, %v8780_v24  ;;  %v8756_v26 = vsel %vm8256_vm1, %v8755_v58, %v8603_v39  ;;  %v11100_v17 = vadd.f32 %v14742_v27, %v14955_v15  ;;  %v8763_v28 = vrot.slane %v8608_v38, 3 }
 0x76c   : > { %8825 = vst.msk [vmem:[%s14903_s11 + $0x28] sm:$0xff] %vm8819_vm6, %v8782_v29  ;;  %v8758_v23 = vsel %vm8258_vm8, %v8757_v32, %v8756_v26  ;;  %v8765_v34 = vrot.slane %v8609_v63, 2  ;;  %v15130_v4 = vadd.f32 %v14742_v27, %v14968_v55  ;;  %v6675_v57 = vcombine.high %v11098_v30, %v11098_v30 }
 0x76d   : > { %v8760_v36 = vsel %vm8260_vm10, %v8759_v37, %v8758_v23  ;;  %v6682_v9 = vrot.slane %v11098_v30, %v14141_v44  ;;  %v6658_v5 = vcombine.high %v11100_v17, %v11100_v17  ;;  %v8767_v25 = vrot.slane %v8610_v0, 1 }
 0x76e   : > { %v8762_v2 = vsel %vm8262_vm11, %v8761_v35, %v8760_v36  ;;  %v6665_v15 = vrot.slane %v11100_v17, %v14141_v44  ;;  %v6709_v40 = vcombine.high %v15130_v4, %v15130_v4  ;;  %v6689_v55 = vrot.slane %v6675_v57, %v14141_v44 }
 0x76f   : > { %v8764_v20 = vsel %vm8264_vm12, %v8763_v28, %v8762_v2  ;;  %v6690_v18 = vcombine.high %v6682_v9, %v6682_v9  ;;  %v7155_v53 = vsel %vm6790_vm0, %v6682_v9, 0.0  ;;  %v6672_v49 = vrot.slane %v6658_v5, %v14141_v44 }
 0x770   : > { %v8766_v13 = vsel %vm8266_vm13, %v8765_v34, %v8764_v20  ;;  %v7156_v6 = vrot.slane %v7155_v53, 4  ;;  %v6673_v1 = vcombine.high %v6665_v15, %v6665_v15  ;;  %v6691_v45 = vcombine.high %v6689_v55, %v6689_v55 }
 0x771   : > { %v8768_v7 = vsel %vm8268_vm14, %v8767_v25, %v8766_v13  ;;  %v7162_v14 = vsel %vm6790_vm0, %v6690_v18, 0.0  ;;  %v7169_v48 = vsel %vm6790_vm0, %v6689_v55, 0.0  ;;  %v7127_v56 = vsel %vm6790_vm0, %v6665_v15, 0.0 }
 0x772   : > { %8824 = vst.msk [vmem:[%s14903_s11 + $0x20] sm:$0xff] %vm8819_vm6, %v8768_v7  ;;  %v7157_v52 = vadd.f32 %v7156_v6, %v7155_v53  ;;  %v7163_v60 = vrot.slane %v7162_v14, 4  ;;  %v7170_v54 = vrot.slane %v7169_v48, 4  ;;  %v6674_v21 = vcombine.high %v6672_v49, %v6672_v49 }
 0x773   : > { %v7176_v19 = vsel %vm6790_vm0, %v6691_v45, 0.0  ;;  %v7128_v61 = vrot.slane %v7127_v56, 4  ;;  %v7134_v41 = vsel %vm6790_vm0, %v6673_v1, 0.0  ;;  %v7141_v33 = vsel %vm6790_vm0, %v6672_v49, 0.0 }
 0x774   : > { %v7158_v22 = vrot.slane %v7157_v52, 2  ;;  %v7164_v42 = vadd.f32 %v7163_v60, %v7162_v14  ;;  %v7171_v43 = vadd.f32 %v7170_v54, %v7169_v48  ;;  %v7177_v8 = vrot.slane %v7176_v19, 4 }
 0x775   : > { %v7129_v62 = vadd.f32 %v7128_v61, %v7127_v56  ;;  %v7135_v16 = vrot.slane %v7134_v41, 4  ;;  %v7142_v39 = vrot.slane %v7141_v33, 4  ;;  %v7148_v51 = vsel %vm6790_vm0, %v6674_v21, 0.0 }
 0x776   : > { %v7159_v59 = vadd.f32 %v7158_v22, %v7157_v52  ;;  %v7165_v3 = vrot.slane %v7164_v42, 2  ;;  %v7172_v47 = vrot.slane %v7171_v43, 2  ;;  %v7178_v50 = vadd.f32 %v7177_v8, %v7176_v19 }
 0x777   : > { %v7130_v38 = vrot.slane %v7129_v62, 2  ;;  %v7136_v10 = vadd.f32 %v7135_v16, %v7134_v41  ;;  %v7143_v63 = vadd.f32 %v7142_v39, %v7141_v33  ;;  %v7149_v0 = vrot.slane %v7148_v51, 4 }
 0x778   : > { %v7160_v58 = vrot.slane %v7159_v59, 1  ;;  %v7166_v24 = vadd.f32 %v7165_v3, %v7164_v42  ;;  %v7173_v32 = vadd.f32 %v7172_v47, %v7171_v43  ;;  %v7179_v37 = vrot.slane %v7178_v50, 2 }
 0x779   : > { %v7131_v29 = vadd.f32 %v7130_v38, %v7129_v62  ;;  %v7137_v26 = vrot.slane %v7136_v10, 2  ;;  %v7144_v23 = vrot.slane %v7143_v63, 2  ;;  %v7150_v35 = vadd.f32 %v7149_v0, %v7148_v51 }
 0x77a   : > { %v7161_v30 = vadd.f32 %v7160_v58, %v7159_v59  ;;  %v7167_v17 = vrot.slane %v7166_v24, 1  ;;  %v7174_v36 = vrot.slane %v7173_v32, 1  ;;  %v7180_v28 = vadd.f32 %v7179_v37, %v7178_v50 }
 0x77b   : > { %v7132_v34 = vrot.slane %v7131_v29, 1  ;;  %v7138_v2 = vadd.f32 %v7137_v26, %v7136_v10  ;;  %v7145_v57 = vadd.f32 %v7144_v23, %v7143_v63  ;;  %v7151_v9 = vrot.slane %v7150_v35, 2 }
 0x77c   : > { %v7181_v5 = vrot.slane %v7180_v28, 1  ;;  %v6716_v20 = vrot.slane %v15130_v4, %v14141_v44  ;;  %v7168_v25 = vadd.f32 %v7167_v17, %v7166_v24  ;;  %v7175_v15 = vadd.f32 %v7174_v36, %v7173_v32 }
 0x77d   : > { %v7139_v13 = vrot.slane %v7138_v2, 1  ;;  %v7152_v55 = vadd.f32 %v7151_v9, %v7150_v35  ;;  %v6723_v18 = vrot.slane %v6709_v40, %v14141_v44  ;;  %v11104_v53 = vadd.f32 %v14742_v27, %v14970_v12 }
 0x77e   : > { %v15159_v7 = vadd.f32 %v15077_v46, %v14877_v11  ;;  %v15161_v6 = vadd.f32 %v7181_v5, %v7180_v28  ;;  %v15163_v49 = vmul.f32 0.25, %v7161_v30  ;;  %v15165_v1 = vadd.f32 %v7132_v34, %v7131_v29 }
 0x77f   : > { %v7146_v4 = vrot.slane %v7145_v57, 1  ;;  %v7153_v45 = vrot.slane %v7152_v55, 1  ;;  %v6724_v14 = vcombine.high %v6716_v20, %v6716_v20  ;;  %v6725_v48 = vcombine.high %v6723_v18, %v6723_v18 }
 0x780   : > { %v7211_v56 = vsel %vm6790_vm0, %v6716_v20, 0.0  ;;  %v15168_v40 = vmul.f32 0.25, %v7168_v25  ;;  %v15170_v52 = vmul.f32 0.25, %v7175_v15  ;;  %v15172_v27 = vadd.f32 %v7139_v13, %v7138_v2 }
 0x781   : > { %v7212_v11 = vrot.slane %v7211_v56, 4  ;;  %v7218_v12 = vsel %vm6790_vm0, %v6724_v14, 0.0  ;;  %v7225_v60 = vsel %vm6790_vm0, %v6723_v18, 0.0  ;;  %v7232_v54 = vsel %vm6790_vm0, %v6725_v48, 0.0 }
 0x782   : > { %v6692_v21 = vcombine.high %v11104_v53, %v11104_v53  ;;  %v15177_v19 = vadd.f32 %v7146_v4, %v7145_v57  ;;  %v7219_v41 = vrot.slane %v7218_v12, 4  ;;  %v7226_v33 = vrot.slane %v7225_v60, 4 }
 0x783   : > { %v7213_v61 = vadd.f32 %v7212_v11, %v7211_v56  ;;  %v15179_v22 = vadd.f32 %v7153_v45, %v7152_v55  ;;  %v7233_v42 = vrot.slane %v7232_v54, 4  ;;  %v6699_v43 = vrot.slane %v11104_v53, %v14141_v44 }
 0x784   : > { %v6706_v8 = vrot.slane %v6692_v21, %v14141_v44  ;;  %v7220_v16 = vadd.f32 %v7219_v41, %v7218_v12  ;;  %v7227_v39 = vadd.f32 %v7226_v33, %v7225_v60  ;;  %v8500_v51 = vrot.slane %v15159_v7, 1 }
 0x785   : > { %v7214_v62 = vrot.slane %v7213_v61, 2  ;;  %v7234_v59 = vadd.f32 %v7233_v42, %v7232_v54  ;;  %v6707_v3 = vcombine.high %v6699_v43, %v6699_v43  ;;  %v7183_v50 = vsel %vm6790_vm0, %v6699_v43, 0.0 }
 0x786   : > { %v6708_v47 = vcombine.high %v6706_v8, %v6706_v8  ;;  %v7221_v10 = vrot.slane %v7220_v16, 2  ;;  %v7228_v63 = vrot.slane %v7227_v39, 2  ;;  %v7184_v0 = vrot.slane %v7183_v50, 4 }
 0x787   : > { %v7215_v38 = vadd.f32 %v7214_v62, %v7213_v61  ;;  %v7235_v58 = vrot.slane %v7234_v59, 2  ;;  %v7190_v24 = vsel %vm6790_vm0, %v6707_v3, 0.0  ;;  %v7197_v32 = vsel %vm6790_vm0, %v6706_v8, 0.0 }
 0x788   : > { %v7204_v44 = vsel %vm6790_vm0, %v6708_v47, 0.0  ;;  %v7222_v29 = vadd.f32 %v7221_v10, %v7220_v16  ;;  %v7229_v26 = vadd.f32 %v7228_v63, %v7227_v39  ;;  %v7185_v23 = vadd.f32 %v7184_v0, %v7183_v50 }
 0x789   : > { %v7216_v37 = vrot.slane %v7215_v38, 1  ;;  %v7236_v35 = vadd.f32 %v7235_v58, %v7234_v59  ;;  %v7191_v30 = vrot.slane %v7190_v24, 4  ;;  %v7198_v17 = vrot.slane %v7197_v32, 4 }
 0x78a   : > { %v7205_v36 = vrot.slane %v7204_v44, 4  ;;  %v7223_v34 = vrot.slane %v7222_v29, 1  ;;  %v7230_v2 = vrot.slane %v7229_v26, 1  ;;  %v7186_v57 = vrot.slane %v7185_v23, 2 }
 0x78b   : > { %v7217_v28 = vadd.f32 %v7216_v37, %v7215_v38  ;;  %v7237_v9 = vrot.slane %v7236_v35, 1  ;;  %v7192_v5 = vadd.f32 %v7191_v30, %v7190_v24  ;;  %v7199_v20 = vadd.f32 %v7198_v17, %v7197_v32 }
 0x78c   : > { %v7206_v25 = vadd.f32 %v7205_v36, %v7204_v44  ;;  %v7224_v15 = vadd.f32 %v7223_v34, %v7222_v29  ;;  %v7231_v13 = vadd.f32 %v7230_v2, %v7229_v26  ;;  %v7187_v55 = vadd.f32 %v7186_v57, %v7185_v23 }
 0x78d   : > { %v8501_v18 = vrot.slane %v15159_v7, 2  ;;  %v7238_v53 = vadd.f32 %v7237_v9, %v7236_v35  ;;  %v7193_v4 = vrot.slane %v7192_v5, 2  ;;  %v7200_v45 = vrot.slane %v7199_v20, 2 }
 0x78e   : > { %v7207_v14 = vrot.slane %v7206_v25, 2  ;;  %v7299_v48 = vmul.f32 0.25, %v7217_v28  ;;  %v7300_v56 = vmul.f32 0.25, %v7224_v15  ;;  %v7301_v11 = vmul.f32 0.25, %v7231_v13 }
 0x78f   : > { %v7188_v12 = vrot.slane %v7187_v55, 1  ;;  %v7302_v60 = vmul.f32 0.25, %v7238_v53  ;;  %v7194_v54 = vadd.f32 %v7193_v4, %v7192_v5  ;;  %v7201_v21 = vadd.f32 %v7200_v45, %v7199_v20 }
 0x790   : > { %v7208_v61 = vadd.f32 %v7207_v14, %v7206_v25  ;;  %v8503_v33 = vrot.slane %v15159_v7, 4  ;;  %v8504_v42 = vrot.slane %v15159_v7, 5  ;;  %v8505_v43 = vrot.slane %v15159_v7, 6 }
 0x791   : > { %v7189_v41 = vadd.f32 %v7188_v12, %v7187_v55  ;;  %v7195_v8 = vrot.slane %v7194_v54, 1  ;;  %v7202_v62 = vrot.slane %v7201_v21, 1  ;;  %v8506_v39 = vrot.slane %v15159_v7, 7 }
 0x792   : > { %v7209_v16 = vrot.slane %v7208_v61, 1  ;;  %v8631_v3 = vadd.f32 %v8503_v33, %v7299_v48  ;;  %v8632_v47 = vadd.f32 %v8504_v42, %v7300_v56  ;;  %v8633_v50 = vadd.f32 %v8505_v43, %v7301_v11 }
 0x793   : > { %v7295_v59 = vmul.f32 0.25, %v7189_v41  ;;  %v7196_v38 = vadd.f32 %v7195_v8, %v7194_v54  ;;  %v7203_v10 = vadd.f32 %v7202_v62, %v7201_v21  ;;  %v8634_v0 = vadd.f32 %v8506_v39, %v7302_v60 }
 0x794   : > { %v7210_v63 = vadd.f32 %v7209_v16, %v7208_v61  ;;  %v7294_v58 = vmul.f32 0.25, %v15161_v6  ;;  %v7287_v24 = vmul.f32 0.25, %v15165_v1  ;;  %v7288_v32 = vmul.f32 0.25, %v15172_v27 }
 0x795   : > { %v8627_v44 = vadd.f32 %v15159_v7, %v7295_v59  ;;  %v7296_v37 = vmul.f32 0.25, %v7196_v38  ;;  %v7297_v29 = vmul.f32 0.25, %v7203_v10  ;;  %v8502_v23 = vrot.slane %v15159_v7, 3 }
 0x796   : > { %v7298_v26 = vmul.f32 0.25, %v7210_v63  ;;  %v7289_v35 = vmul.f32 0.25, %v15177_v19  ;;  %v7290_v30 = vmul.f32 0.25, %v15179_v22  ;;  %v8803_v17 = vrot.slane %v8631_v3, 4 }
 0x797   : > { %v8435_v36 = vadd.f32 %v15077_v46, %v14886_v31  ;;  %v8628_v6 = vadd.f32 %v8500_v51, %v7296_v37  ;;  %v8629_v1 = vadd.f32 %v8501_v18, %v7297_v29  ;;  %v8805_v28 = vrot.slane %v8632_v47, 3 }
 0x798   : > { %v8630_v27 = vadd.f32 %v8502_v23, %v7298_v26  ;;  %v8807_v60 = vrot.slane %v8633_v50, 2 }
 0x799   : > { %v8493_v34 = vrot.slane %v8435_v36, 1  ;;  %v8494_v2 = vrot.slane %v8435_v36, 2  ;;  %v8495_v57 = vrot.slane %v8435_v36, 3  ;;  %v8496_v9 = vrot.slane %v8435_v36, 4 }
 0x79a   : > { %v8797_v5 = vrot.slane %v8628_v6, 7  ;;  %v8799_v20 = vrot.slane %v8629_v1, 6  ;;  %v8801_v25 = vrot.slane %v8630_v27, 5  ;;  %v8497_v19 = vrot.slane %v8435_v36, 5 }
 0x79b   : > { %v8498_v15 = vrot.slane %v8435_v36, 6  ;;  %v8499_v22 = vrot.slane %v8435_v36, 7  ;;  %v8619_v13 = vadd.f32 %v8435_v36, %v7287_v24  ;;  %v8620_v55 = vadd.f32 %v8493_v34, %v7288_v32 }
 0x79c   : > { %v8798_v31 = vsel %vm8256_vm1, %v8797_v5, %v8627_v44  ;;  %v8621_v46 = vadd.f32 %v8494_v2, %v7289_v35  ;;  %v8622_v7 = vadd.f32 %v8495_v57, %v7290_v30  ;;  %v8623_v51 = vadd.f32 %v8496_v9, %v15163_v49 }
 0x79d   : > { %v8800_v18 = vsel %vm8258_vm8, %v8799_v20, %v8798_v31  ;;  %v8624_v53 = vadd.f32 %v8497_v19, %v15168_v40  ;;  %v8625_v4 = vadd.f32 %v8498_v15, %v15170_v52  ;;  %v8626_v45 = vadd.f32 %v8499_v22, %v7294_v58 }
 0x79e   : > { %v8802_v14 = vsel %vm8260_vm10, %v8801_v25, %v8800_v18  ;;  %v8783_v48 = vrot.slane %v8620_v55, 7  ;;  %v8785_v56 = vrot.slane %v8621_v46, 6  ;;  %v8787_v11 = vrot.slane %v8622_v7, 5 }
 0x79f   : > { %v8804_v12 = vsel %vm8262_vm11, %v8803_v17, %v8802_v14  ;;  %v8809_v49 = vrot.slane %v8634_v0, 1  ;;  %v8789_v61 = vrot.slane %v8623_v51, 4  ;;  %v8791_v42 = vrot.slane %v8624_v53, 3 }
 0x7a0   : > { %v8806_v54 = vsel %vm8264_vm12, %v8805_v28, %v8804_v12  ;;  %v8784_v21 = vsel %vm8256_vm1, %v8783_v48, %v8619_v13  ;;  %v8793_v8 = vrot.slane %v8625_v4, 2  ;;  %v8795_v16 = vrot.slane %v8626_v45, 1 }
 0x7a1   : > { %v8808_v40 = vsel %vm8266_vm13, %v8807_v60, %v8806_v54  ;;  %v8786_v52 = vsel %vm8258_vm8, %v8785_v56, %v8784_v21 }
 0x7a2   : > { %v8810_v41 = vsel %vm8268_vm14, %v8809_v49, %v8808_v40  ;;  %v8788_v33 = vsel %vm8260_vm10, %v8787_v11, %v8786_v52 }
 0x7a3   : > { %8827 = vst.msk [vmem:[%s14903_s11 + $0x38] sm:$0xff] %vm8819_vm6, %v8810_v41  ;;  %v8790_v43 = vsel %vm8262_vm11, %v8789_v61, %v8788_v33 }
 0x7a4   : > { %v8792_v62 = vsel %vm8264_vm12, %v8791_v42, %v8790_v43 }
 0x7a5   : > { %v8794_v39 = vsel %vm8266_vm13, %v8793_v8, %v8792_v62 }
 0x7a6   : > { %v8796_v59 = vsel %vm8268_vm14, %v8795_v16, %v8794_v39 }
 0x7a7   : > { %8826 = vst.msk [vmem:[%s14903_s11 + $0x30] sm:$0xff] %vm8819_vm6, %v8796_v59 }
 0x7a8 PF: > { %s17_s24 = sadd.s32 1, %s11645_s24  }
 0x7a9   : > { %p14_p4 = scmp.ge.s32.totalorder %s17_s24, 4  }
 0x7ab   :  { %16 = sbr.rel (!%p14_p4) target bundleno = 1 (0x1), region = 94 }

</bundles_post_ra>
